<compile_context>
chip_gen: v6e
topology: v6e:2x2x1
jax: 0.10.0
libtpu: 0.0.40
codegen_flags: <defaults>
</compile_context>

<pallas_src>
import functools

import jax
import jax.numpy as jnp
import numpy as np
from jax.experimental import pallas as pl
from jax.experimental.pallas import tpu as pltpu

BN_EPS = 1e-5
LANE = 128
TILE_B = 256      # batch-tile upper bound: fills the 256-wide MXU on v6e/v7x
NUM_LAYERS = 7    # 3 folded Conv1d(k=1)+BN+ReLU layers + 4 Linear layers
NUM_RELU = 3      # ReLU only after the conv/BN layers (Linear head has none)


def _round_up(n, m):
    return ((n + m - 1) // m) * m


def facenet_kernel(x_ref, w1, w2, w3, w4, w5, w6, w7, bias_ref, out_ref, *, out_dims):
    """One batch tile through the whole (BN-folded) 7-matmul chain."""
    h = x_ref[...]                                   # (tile_b, cin_pad) bf16
    w_refs = (w1, w2, w3, w4, w5, w6, w7)
    for i, w_ref in enumerate(w_refs):
        cout = out_dims[i]
        # bf16 x bf16 -> f32 accumulation on the MXU; bias / ReLU stay f32 on the VPU.
        acc = jnp.dot(h, w_ref[...], preferred_element_type=jnp.float32)
        acc = acc + bias_ref[i:i + 1, 0:cout]        # static slice of the packed bias block
        if i < NUM_RELU:
            acc = jnp.maximum(acc, 0.0)
        if i + 1 < NUM_LAYERS:
            h = acc.astype(jnp.bfloat16)             # feed the next MXU matmul in bf16
        else:
            out_ref[...] = acc                       # lane-dense f32 store (tile_b, out_pad)
    # MaxPool1d(kernel_size=1, stride=1) and view(B, -1) with L == 1 are identities.


def prepare_facenet_params(params):
    """One-time host prep: fold BN into conv weights, pad, cast to bf16, pack biases.

    Hoisted out of facenet_forward so repeated forward calls never redo the
    fold/pad/cast or re-stream freshly-materialized weights.
    """
    weights, biases = [], []
    for i in (1, 2, 3):
        scale = params[f"bn{i}_g"] * jax.lax.rsqrt(params[f"bn{i}_v"] + BN_EPS)  # (1, cout)
        weights.append(params[f"conv{i}_w"] * scale)
        biases.append((params[f"conv{i}_b"] - params[f"bn{i}_m"]) * scale + params[f"bn{i}_b"])
    for i in (1, 2, 3, 4):
        weights.append(params[f"lin{i}_w"])
        biases.append(params[f"lin{i}_b"])

    cin = weights[0].shape[0]
    out_dim = weights[-1].shape[1]
    cin_pad = _round_up(cin, LANE)        # 144 -> 256
    out_pad = _round_up(out_dim, LANE)    # 26  -> 128

    # Zero-pad first-layer K rows and last-layer output lanes (slice off in wrapper).
    weights[0] = jnp.pad(weights[0], ((0, cin_pad - cin), (0, 0)))
    weights[-1] = jnp.pad(weights[-1], ((0, 0), (0, out_pad - out_dim)))
    biases[-1] = jnp.pad(biases[-1], ((0, 0), (0, out_pad - out_dim)))

    # ~4.9 MB of bf16 weights total; single-buffered VMEM-resident in the kernel.
    # NOTE: real trained checkpoints with tiny BN variance may want the last two
    # linear layers kept in f32 for accuracy; synthetic init is fine in bf16.
    weights = tuple(w.astype(jnp.bfloat16) for w in weights)

    # Pack the 7 bias rows into one lane-dense (8, 1024) f32 block.
    max_c = max(int(b.shape[1]) for b in biases)
    bias_block = jnp.zeros((8, max_c), jnp.float32)
    for i, b in enumerate(biases):
        bias_block = bias_block.at[i, : b.shape[1]].set(b[0].astype(jnp.float32))

    return {
        "weights": weights,
        "bias_block": bias_block,
        "out_dims": tuple(int(w.shape[1]) for w in weights),
        "cin": int(cin),
        "cin_pad": int(cin_pad),
        "out_dim": int(out_dim),
        "out_pad": int(out_pad),
    }


def facenet_forward(x_ncl, prepped):
    """x_ncl: (B, inchanels, 1) float32. Returns (B, outchanels) float32."""
    B = x_ncl.shape[0]
    cin, cin_pad = prepped["cin"], prepped["cin_pad"]
    out_dim, out_pad = prepped["out_dim"], prepped["out_pad"]
    weights, bias_block = prepped["weights"], prepped["bias_block"]

    x2d = x_ncl.reshape(B, -1)  # L == 1

    # Small batches: pad the sublane dim only to a multiple of 8 (B=2 -> 8-row tile,
    # not 128/256 -> no ~98% wasted MXU rows). Large batches tile at 256 rows to
    # fill the 256-wide MXU on v6e/v7x.
    tile_b = min(TILE_B, _round_up(max(B, 1), 8))
    b_pad = _round_up(B, tile_b)
    num_tiles = b_pad // tile_b

    x_pad = jnp.pad(x2d.astype(jnp.bfloat16), ((0, b_pad - B), (0, cin_pad - cin)))

    # Resident weights / packed bias: constant block index + single-buffered
    # (pl.Buffered(1)) so the ~4.9 MB of bf16 weights is not double-buffered.
    # x and output tiles keep the default double-buffering.
    def resident(shape):
        return pl.BlockSpec(shape, lambda i: (0, 0), pipeline_mode=pl.Buffered(1))

    in_specs = [pl.BlockSpec((tile_b, cin_pad), lambda i: (i, 0))]
    in_specs += [resident(w.shape) for w in weights]
    in_specs += [resident(bias_block.shape)]

    # v7x has 2 TensorCores per chip: CORE_PARALLEL actually splits the batch-tile
    # grid across them (plain "parallel" has near-zero codegen effect). Fall back
    # to a sequential grid when the tile count doesn't split evenly (or is 1).
    if num_tiles >= 2 and num_tiles % 2 == 0:
        dim_sem = (pltpu.CORE_PARALLEL,)
    else:
        dim_sem = ("arbitrary",)

    weight_bytes = sum(int(np.prod(w.shape)) * 2 for w in weights) + bias_block.size * 4
    flops = 2 * b_pad * sum(int(w.shape[0]) * int(w.shape[1]) for w in weights)
    bytes_accessed = weight_bytes + x_pad.size * 2 + b_pad * out_pad * 4

    out = pl.pallas_call(
        functools.partial(facenet_kernel, out_dims=prepped["out_dims"]),
        out_shape=jax.ShapeDtypeStruct((b_pad, out_pad), jnp.float32),
        grid=(num_tiles,),
        in_specs=in_specs,
        out_specs=pl.BlockSpec((tile_b, out_pad), lambda i: (i, 0)),
        compiler_params=pltpu.CompilerParams(
            dimension_semantics=dim_sem,
            vmem_limit_bytes=32 * 1024 * 1024,   # safe on v7x (64 MiB/TC); ample everywhere
        ),
        cost_estimate=pl.CostEstimate(
            flops=flops, transcendentals=0, bytes_accessed=bytes_accessed),
    )(x_pad, *weights, bias_block)

    return out[:B, :out_dim]


def init_params(key, inchanels=144, outchanels=26):
    """Deterministic synthetic parameters (PyTorch-style uniform fan-in init).

    Conv/Linear weights are stored transposed: (C_in, C_out).
    Biases and BN vectors are stored as (1, C) rows.
    """
    dims_conv = [(inchanels, 256), (256, 512), (512, 1024)]
    dims_lin = [(1024, 1024), (1024, 512), (512, 256), (256, outchanels)]
    params = {}
    keys = jax.random.split(key, 32)
    k = 0

    for i, (cin, cout) in enumerate(dims_conv, start=1):
        bound = 1.0 / np.sqrt(cin)
        params[f"conv{i}_w"] = jax.random.uniform(
            keys[k], (cin, cout), jnp.float32, -bound, bound); k += 1
        params[f"conv{i}_b"] = jax.random.uniform(
            keys[k], (1, cout), jnp.float32, -bound, bound); k += 1
        params[f"bn{i}_g"] = 1.0 + 0.1 * jax.random.normal(keys[k], (1, cout), jnp.float32); k += 1
        params[f"bn{i}_b"] = 0.1 * jax.random.normal(keys[k], (1, cout), jnp.float32); k += 1
        params[f"bn{i}_m"] = 0.05 * jax.random.normal(keys[k], (1, cout), jnp.float32); k += 1
        params[f"bn{i}_v"] = jax.random.uniform(
            keys[k], (1, cout), jnp.float32, 0.5, 1.5); k += 1

    for i, (cin, cout) in enumerate(dims_lin, start=1):
        bound = 1.0 / np.sqrt(cin)
        params[f"lin{i}_w"] = jax.random.uniform(
            keys[k], (cin, cout), jnp.float32, -bound, bound); k += 1
        params[f"lin{i}_b"] = jax.random.uniform(
            keys[k], (1, cout), jnp.float32, -bound, bound); k += 1

    return params


def facenet_reference(x_ncl, params):
    """Plain-JAX f32 reference mirroring the PyTorch forward (eval-mode BN)."""
    h = x_ncl.reshape(x_ncl.shape[0], -1)
    for i in (1, 2, 3):
        h = h @ params[f"conv{i}_w"] + params[f"conv{i}_b"]
        h = (h - params[f"bn{i}_m"]) / jnp.sqrt(params[f"bn{i}_v"] + BN_EPS)
        h = h * params[f"bn{i}_g"] + params[f"bn{i}_b"]
        h = jnp.maximum(h, 0.0)
    for i in (1, 2, 3, 4):
        h = h @ params[f"lin{i}_w"] + params[f"lin{i}_b"]
    return h


if __name__ == "__main__":
    key = jax.random.PRNGKey(0)
    k_params, k_x = jax.random.split(key)

    B, CIN, L = 2, 144, 1  # length must be 1 for flatten -> Linear(1024, .) to be valid
    params = init_params(k_params, inchanels=CIN, outchanels=26)
    x = jax.random.normal(k_x, (B, CIN, L), jnp.float32)

    prepped = prepare_facenet_params(params)  # one-time fold/pad/cast (hoisted out of forward)
    out = jax.block_until_ready(facenet_forward(x, prepped))

    ref = facenet_reference(x, params)
    assert out.shape == (B, 26), out.shape
    # bf16 weights/activations with f32 accumulation: loosened tolerance vs pure-f32 reference.
    np.testing.assert_allclose(np.asarray(out), np.asarray(ref), rtol=2e-2, atol=2e-2)

    print("KERNEL_OK")
</pallas_src>

<mosaic_0001>
module attributes {stable_mosaic.version = 11 : i64} {
  func.func @facenet_kernel(%arg0: i32, %arg1: memref<8x256xbf16, #tpu.memory_space<vmem>>, %arg2: memref<256x256xbf16, #tpu.memory_space<vmem>>, %arg3: memref<256x512xbf16, #tpu.memory_space<vmem>>, %arg4: memref<512x1024xbf16, #tpu.memory_space<vmem>>, %arg5: memref<1024x1024xbf16, #tpu.memory_space<vmem>>, %arg6: memref<1024x512xbf16, #tpu.memory_space<vmem>>, %arg7: memref<512x256xbf16, #tpu.memory_space<vmem>>, %arg8: memref<256x128xbf16, #tpu.memory_space<vmem>>, %arg9: memref<8x1024xf32, #tpu.memory_space<vmem>>, %arg10: memref<8x128xf32, #tpu.memory_space<vmem>>) attributes {dimension_semantics = [#tpu.dimension_semantics<arbitrary>], iteration_bounds = array<i64: 1>, scalar_prefetch = 0 : i64, scratch_operands = 0 : i64, tpu.core_type = #tpu.core_type<tc>, window_params = [{transform_indices = @transform_0, window_bounds = array<i64: 8, 256>}, {pipeline_mode = #tpu.pipeline_mode<synchronous>, transform_indices = @transform_1, window_bounds = array<i64: 256, 256>}, {pipeline_mode = #tpu.pipeline_mode<synchronous>, transform_indices = @transform_2, window_bounds = array<i64: 256, 512>}, {pipeline_mode = #tpu.pipeline_mode<synchronous>, transform_indices = @transform_3, window_bounds = array<i64: 512, 1024>}, {pipeline_mode = #tpu.pipeline_mode<synchronous>, transform_indices = @transform_4, window_bounds = array<i64: 1024, 1024>}, {pipeline_mode = #tpu.pipeline_mode<synchronous>, transform_indices = @transform_5, window_bounds = array<i64: 1024, 512>}, {pipeline_mode = #tpu.pipeline_mode<synchronous>, transform_indices = @transform_6, window_bounds = array<i64: 512, 256>}, {pipeline_mode = #tpu.pipeline_mode<synchronous>, transform_indices = @transform_7, window_bounds = array<i64: 256, 128>}, {pipeline_mode = #tpu.pipeline_mode<synchronous>, transform_indices = @transform_8, window_bounds = array<i64: 8, 1024>}, {transform_indices = @transform_9, window_bounds = array<i64: 8, 128>}]} {
    %c0 = arith.constant 0 : index
    %c0_0 = arith.constant 0 : index
    %0 = vector.load %arg1[%c0, %c0_0] : memref<8x256xbf16, #tpu.memory_space<vmem>>, vector<8x256xbf16>
    %c0_1 = arith.constant 0 : index
    %c0_2 = arith.constant 0 : index
    %1 = vector.load %arg2[%c0_1, %c0_2] : memref<256x256xbf16, #tpu.memory_space<vmem>>, vector<256x256xbf16>
    %cst = arith.constant dense<0.000000e+00> : vector<8x256xf32>
    %2 = tpu.matmul %0, %1, %cst {dimension_numbers = #tpu.dot_dimension_numbers<[1], [0], [0], [1], [0, 0, 1, 1], [], []>} : vector<8x256xbf16>, vector<256x256xbf16>, vector<8x256xf32> -> vector<8x256xf32>
    %c0_3 = arith.constant 0 : index
    %c0_4 = arith.constant 0 : index
    %3 = vector.load %arg9[%c0_3, %c0_4] : memref<8x1024xf32, #tpu.memory_space<vmem>>, vector<1x256xf32>
    %4 = vector.broadcast %3 : vector<1x256xf32> to vector<8x256xf32>
    %5 = arith.addf %2, %4 : vector<8x256xf32>
    %cst_5 = arith.constant 0.000000e+00 : f32
    %6 = vector.broadcast %cst_5 : f32 to vector<8x256xf32>
    %7 = arith.maximumf %5, %6 : vector<8x256xf32>
    %8 = arith.truncf %7 : vector<8x256xf32> to vector<8x256xbf16>
    %c0_6 = arith.constant 0 : index
    %c0_7 = arith.constant 0 : index
    %9 = vector.load %arg3[%c0_6, %c0_7] : memref<256x512xbf16, #tpu.memory_space<vmem>>, vector<256x512xbf16>
    %cst_8 = arith.constant dense<0.000000e+00> : vector<8x512xf32>
    %10 = tpu.matmul %8, %9, %cst_8 {dimension_numbers = #tpu.dot_dimension_numbers<[1], [0], [0], [1], [0, 0, 1, 1], [], []>} : vector<8x256xbf16>, vector<256x512xbf16>, vector<8x512xf32> -> vector<8x512xf32>
    %c1 = arith.constant 1 : index
    %c0_9 = arith.constant 0 : index
    %11 = vector.load %arg9[%c1, %c0_9] : memref<8x1024xf32, #tpu.memory_space<vmem>>, vector<1x512xf32>
    %12 = vector.broadcast %11 : vector<1x512xf32> to vector<8x512xf32>
    %13 = arith.addf %10, %12 : vector<8x512xf32>
    %cst_10 = arith.constant 0.000000e+00 : f32
    %14 = vector.broadcast %cst_10 : f32 to vector<8x512xf32>
    %15 = arith.maximumf %13, %14 : vector<8x512xf32>
    %16 = arith.truncf %15 : vector<8x512xf32> to vector<8x512xbf16>
    %c0_11 = arith.constant 0 : index
    %c0_12 = arith.constant 0 : index
    %17 = vector.load %arg4[%c0_11, %c0_12] : memref<512x1024xbf16, #tpu.memory_space<vmem>>, vector<512x1024xbf16>
    %cst_13 = arith.constant dense<0.000000e+00> : vector<8x1024xf32>
    %18 = tpu.matmul %16, %17, %cst_13 {dimension_numbers = #tpu.dot_dimension_numbers<[1], [0], [0], [1], [0, 0, 1, 1], [], []>} : vector<8x512xbf16>, vector<512x1024xbf16>, vector<8x1024xf32> -> vector<8x1024xf32>
    %c2 = arith.constant 2 : index
    %c0_14 = arith.constant 0 : index
    %19 = vector.load %arg9[%c2, %c0_14] : memref<8x1024xf32, #tpu.memory_space<vmem>>, vector<1x1024xf32>
    %20 = vector.broadcast %19 : vector<1x1024xf32> to vector<8x1024xf32>
    %21 = arith.addf %18, %20 : vector<8x1024xf32>
    %cst_15 = arith.constant 0.000000e+00 : f32
    %22 = vector.broadcast %cst_15 : f32 to vector<8x1024xf32>
    %23 = arith.maximumf %21, %22 : vector<8x1024xf32>
    %24 = arith.truncf %23 : vector<8x1024xf32> to vector<8x1024xbf16>
    %c0_16 = arith.constant 0 : index
    %c0_17 = arith.constant 0 : index
    %25 = vector.load %arg5[%c0_16, %c0_17] : memref<1024x1024xbf16, #tpu.memory_space<vmem>>, vector<1024x1024xbf16>
    %cst_18 = arith.constant dense<0.000000e+00> : vector<8x1024xf32>
    %26 = tpu.matmul %24, %25, %cst_18 {dimension_numbers = #tpu.dot_dimension_numbers<[1], [0], [0], [1], [0, 0, 1, 1], [], []>} : vector<8x1024xbf16>, vector<1024x1024xbf16>, vector<8x1024xf32> -> vector<8x1024xf32>
    %c3 = arith.constant 3 : index
    %c0_19 = arith.constant 0 : index
    %27 = vector.load %arg9[%c3, %c0_19] : memref<8x1024xf32, #tpu.memory_space<vmem>>, vector<1x1024xf32>
    %28 = vector.broadcast %27 : vector<1x1024xf32> to vector<8x1024xf32>
    %29 = arith.addf %26, %28 : vector<8x1024xf32>
    %30 = arith.truncf %29 : vector<8x1024xf32> to vector<8x1024xbf16>
    %c0_20 = arith.constant 0 : index
    %c0_21 = arith.constant 0 : index
    %31 = vector.load %arg6[%c0_20, %c0_21] : memref<1024x512xbf16, #tpu.memory_space<vmem>>, vector<1024x512xbf16>
    %cst_22 = arith.constant dense<0.000000e+00> : vector<8x512xf32>
    %32 = tpu.matmul %30, %31, %cst_22 {dimension_numbers = #tpu.dot_dimension_numbers<[1], [0], [0], [1], [0, 0, 1, 1], [], []>} : vector<8x1024xbf16>, vector<1024x512xbf16>, vector<8x512xf32> -> vector<8x512xf32>
    %c4 = arith.constant 4 : index
    %c0_23 = arith.constant 0 : index
    %33 = vector.load %arg9[%c4, %c0_23] : memref<8x1024xf32, #tpu.memory_space<vmem>>, vector<1x512xf32>
    %34 = vector.broadcast %33 : vector<1x512xf32> to vector<8x512xf32>
    %35 = arith.addf %32, %34 : vector<8x512xf32>
    %36 = arith.truncf %35 : vector<8x512xf32> to vector<8x512xbf16>
    %c0_24 = arith.constant 0 : index
    %c0_25 = arith.constant 0 : index
    %37 = vector.load %arg7[%c0_24, %c0_25] : memref<512x256xbf16, #tpu.memory_space<vmem>>, vector<512x256xbf16>
    %cst_26 = arith.constant dense<0.000000e+00> : vector<8x256xf32>
    %38 = tpu.matmul %36, %37, %cst_26 {dimension_numbers = #tpu.dot_dimension_numbers<[1], [0], [0], [1], [0, 0, 1, 1], [], []>} : vector<8x512xbf16>, vector<512x256xbf16>, vector<8x256xf32> -> vector<8x256xf32>
    %c5 = arith.constant 5 : index
    %c0_27 = arith.constant 0 : index
    %39 = vector.load %arg9[%c5, %c0_27] : memref<8x1024xf32, #tpu.memory_space<vmem>>, vector<1x256xf32>
    %40 = vector.broadcast %39 : vector<1x256xf32> to vector<8x256xf32>
    %41 = arith.addf %38, %40 : vector<8x256xf32>
    %42 = arith.truncf %41 : vector<8x256xf32> to vector<8x256xbf16>
    %c0_28 = arith.constant 0 : index
    %c0_29 = arith.constant 0 : index
    %43 = vector.load %arg8[%c0_28, %c0_29] : memref<256x128xbf16, #tpu.memory_space<vmem>>, vector<256x128xbf16>
    %cst_30 = arith.constant dense<0.000000e+00> : vector<8x128xf32>
    %44 = tpu.matmul %42, %43, %cst_30 {dimension_numbers = #tpu.dot_dimension_numbers<[1], [0], [0], [1], [0, 0, 1, 1], [], []>} : vector<8x256xbf16>, vector<256x128xbf16>, vector<8x128xf32> -> vector<8x128xf32>
    %c6 = arith.constant 6 : index
    %c0_31 = arith.constant 0 : index
    %45 = vector.load %arg9[%c6, %c0_31] : memref<8x1024xf32, #tpu.memory_space<vmem>>, vector<1x128xf32>
    %46 = vector.broadcast %45 : vector<1x128xf32> to vector<8x128xf32>
    %47 = arith.addf %44, %46 : vector<8x128xf32>
    %c0_32 = arith.constant 0 : index
    %c0_33 = arith.constant 0 : index
    %48 = vector.load %arg10[%c0_32, %c0_33] : memref<8x128xf32, #tpu.memory_space<vmem>>, vector<8x128xf32>
    tpu.vector_store %arg10[%c0_32, %c0_33], %47 {strides = array<i32>} : memref<8x128xf32, #tpu.memory_space<vmem>>, vector<8x128xf32>,
    return
  }
  func.func @transform_0(%arg0: i32) -> (i32, i32) {
    %c0_i32 = arith.constant 0 : i32
    %c0_i32_0 = arith.constant 0 : i32
    return %arg0, %c0_i32 : i32, i32
  }
  func.func @transform_1(%arg0: i32) -> (i32, i32) {
    %c0_i32 = arith.constant 0 : i32
    %c0_i32_0 = arith.constant 0 : i32
    %c0_i32_1 = arith.constant 0 : i32
    return %c0_i32, %c0_i32_0 : i32, i32
  }
  func.func @transform_2(%arg0: i32) -> (i32, i32) {
    %c0_i32 = arith.constant 0 : i32
    %c0_i32_0 = arith.constant 0 : i32
    %c0_i32_1 = arith.constant 0 : i32
    return %c0_i32, %c0_i32_0 : i32, i32
  }
  func.func @transform_3(%arg0: i32) -> (i32, i32) {
    %c0_i32 = arith.constant 0 : i32
    %c0_i32_0 = arith.constant 0 : i32
    %c0_i32_1 = arith.constant 0 : i32
    return %c0_i32, %c0_i32_0 : i32, i32
  }
  func.func @transform_4(%arg0: i32) -> (i32, i32) {
    %c0_i32 = arith.constant 0 : i32
    %c0_i32_0 = arith.constant 0 : i32
    %c0_i32_1 = arith.constant 0 : i32
    return %c0_i32, %c0_i32_0 : i32, i32
  }
  func.func @transform_5(%arg0: i32) -> (i32, i32) {
    %c0_i32 = arith.constant 0 : i32
    %c0_i32_0 = arith.constant 0 : i32
    %c0_i32_1 = arith.constant 0 : i32
    return %c0_i32, %c0_i32_0 : i32, i32
  }
  func.func @transform_6(%arg0: i32) -> (i32, i32) {
    %c0_i32 = arith.constant 0 : i32
    %c0_i32_0 = arith.constant 0 : i32
    %c0_i32_1 = arith.constant 0 : i32
    return %c0_i32, %c0_i32_0 : i32, i32
  }
  func.func @transform_7(%arg0: i32) -> (i32, i32) {
    %c0_i32 = arith.constant 0 : i32
    %c0_i32_0 = arith.constant 0 : i32
    %c0_i32_1 = arith.constant 0 : i32
    return %c0_i32, %c0_i32_0 : i32, i32
  }
  func.func @transform_8(%arg0: i32) -> (i32, i32) {
    %c0_i32 = arith.constant 0 : i32
    %c0_i32_0 = arith.constant 0 : i32
    %c0_i32_1 = arith.constant 0 : i32
    return %c0_i32, %c0_i32_0 : i32, i32
  }
  func.func @transform_9(%arg0: i32) -> (i32, i32) {
    %c0_i32 = arith.constant 0 : i32
    %c0_i32_0 = arith.constant 0 : i32
    return %arg0, %c0_i32 : i32, i32
  }
}

</mosaic_0001>

<bundles_post_ra>
// kernel: tpu_custom_call.1
= control target key start
LH: loop header
LB: loop body
LE: loop exit
PB: predicated region body
PF: predicated region fallthrough
CT: control target
= control target key end

     0   :  { %14 = vsyncpa [#allocation3], 0  ;;  %s11687_s0 = inlined_call_operand.hbm [shape: bf16[8,256], index: 0, kind: input, shape index: {}]   ;;  %s11688_s1 = inlined_call_operand.hbm [shape: bf16[256,256], index: 1, kind: input, shape index: {}]   ;;  %s11689_s2 = inlined_call_operand.hbm [shape: bf16[256,512], index: 2, kind: input, shape index: {}]   ;;  %s11690_s3 = inlined_call_operand.hbm [shape: bf16[512,1024], index: 3, kind: input, shape index: {}]   ;;  %s11691_s4 = inlined_call_operand.hbm [shape: bf16[1024,1024], index: 4, kind: input, shape index: {}]   ;;  %s11692_s5 = inlined_call_operand.hbm [shape: bf16[1024,512], index: 5, kind: input, shape index: {}]   ;;  %s11693_s6 = inlined_call_operand.hbm [shape: bf16[512,256], index: 6, kind: input, shape index: {}]   ;;  %s11694_s7 = inlined_call_operand.hbm [shape: bf16[256,128], index: 7, kind: input, shape index: {}]   ;;  %s11695_s8 = inlined_call_operand.hbm [shape: f32[8,1024], index: 8, kind: input, shape index: {}]   ;;  %s11696_s9 = inlined_call_operand.hbm [shape: f32[8,128], index: 9, kind: output, shape index: {}]  }
   0x1   :  { %15 = vsyncpa [#allocation6], 0 }
   0x2   :  { %16 = vsyncpa [#allocation9], 0 }
   0x3   :  { %17 = vsyncpa [#allocation12], 0 }
   0x4   :  { %18 = vsyncpa [#allocation15], 0 }
   0x5   :  { %19 = vsyncpa [#allocation4], 0  ;;  %s11269_s30 = smov [#allocation5]  }
   0x6   :  { %s35_s10 = sshll.u32 %s11269_s30, 4  ;;  %s36_s10 = int_to_ptr.vmem [resolvable:$true] %s35_s10 }
   0x7   :  { %s11065_s11 = scalar_lea.vmem %s36_s10, 4096  ;;  %p11070_p1 = scmp.lt.s32.totalorder %s36_s10, %s36_s10 }
   0x8   :  { %p11066_p0 = scmp.ne.s32.totalorder %s36_s10, %s11065_s11  ;;  %p11071_p2 = scmp.lt.s32.totalorder %s11065_s11, %s11065_s11 }
   0xa   :  { %p11072_p3 = por %p11071_p2, %p11070_p1 }
   0xc   :  { %p11073_p4 = pnand %p11072_p3, %p11066_p0 }
   0xe   :  { %11076 = shalt.err (!%p11073_p4)
}
   0xf   :  { %s11270_s12 = smov 128   ;;  %s11271_s13 = smov 8  }
  0x10   :  { %41 = dma.hbm_to_vmem [thread:$0]  %s11688_s1, 4096, %s36_s10, [#allocation6], %s11270_s12, %s11270_s12, %s11271_s13  }
  0x11   :  { %s11272_s16 = smov [#allocation8]  }
  0x12   :  { %s59_s17 = sshll.u32 %s11272_s16, 4  ;;  %s60_s17 = int_to_ptr.vmem [resolvable:$true] %s59_s17 }
  0x13   :  { %s11085_s18 = scalar_lea.vmem %s60_s17, 32768  ;;  %p11090_p6 = scmp.lt.s32.totalorder %s60_s17, %s60_s17 }
  0x14   :  { %p11086_p5 = scmp.ne.s32.totalorder %s60_s17, %s11085_s18  ;;  %p11091_p7 = scmp.lt.s32.totalorder %s11085_s18, %s11085_s18 }
  0x16   :  { %p11092_p8 = por %p11091_p7, %p11090_p6 }
  0x18   :  { %p11093_p9 = pnand %p11092_p8, %p11086_p5 }
  0x1a   :  { %11096 = shalt.err (!%p11093_p9)
}
  0x1b   :  { %s11273_s19 = smov 512   ;;  %s11274_s20 = smov 32  }
  0x1c   :  { %65 = dma.hbm_to_vmem [thread:$0]  %s11690_s3, 32768, %s60_s17, [#allocation9], %s11273_s19, %s11273_s19, %s11274_s20  }
  0x1d   :  { %s11275_s1 = smov [#allocation11]   ;;  %s11276_s24 = smov [#allocation14]  }
  0x1e   :  { %s83_s23 = sshll.u32 %s11275_s1, 4  ;;  %s107_s25 = sshll.u32 %s11276_s24, 4  ;;  %s84_s23 = int_to_ptr.vmem [resolvable:$true] %s83_s23  ;;  %s108_s25 = int_to_ptr.vmem [resolvable:$true] %s107_s25 }
  0x1f   :  { %s11105_s26 = scalar_lea.vmem %s84_s23, 32768  ;;  %p11110_p11 = scmp.lt.s32.totalorder %s84_s23, %s84_s23 }
  0x20   :  { %p11106_p10 = scmp.ne.s32.totalorder %s84_s23, %s11105_s26  ;;  %p11111_p12 = scmp.lt.s32.totalorder %s11105_s26, %s11105_s26 }
  0x22   :  { %p11112_p13 = por %p11111_p12, %p11110_p11 }
  0x24   :  { %p11113_p0 = pnand %p11112_p13, %p11106_p10 }
  0x26   :  { %11116 = shalt.err (!%p11113_p0)
}
  0x27   :  { %s11277_s27 = smov 256   ;;  %s11278_s28 = smov 16  }
  0x28   :  { %89 = dma.hbm_to_vmem [thread:$0]  %s11692_s5, 32768, %s84_s23, [#allocation12], %s11277_s27, %s11277_s27, %s11278_s28  }
  0x29   :  { %s11125_s30 = scalar_lea.vmem %s108_s25, 2048  ;;  %p11130_p2 = scmp.lt.s32.totalorder %s108_s25, %s108_s25 }
  0x2a   :  { %p11126_p1 = scmp.ne.s32.totalorder %s108_s25, %s11125_s30  ;;  %p11131_p3 = scmp.lt.s32.totalorder %s11125_s30, %s11125_s30 }
  0x2c   :  { %p11132_p4 = por %p11131_p3, %p11130_p2 }
  0x2e   :  { %p11133_p5 = pnand %p11132_p4, %p11126_p1 }
  0x30   :  { %11136 = shalt.err (!%p11133_p5)
}
  0x31   :  { %s11279_s10 = smov 64   ;;  %s11280_s11 = smov 4  }
  0x32   :  { %113 = dma.hbm_to_vmem [thread:$0]  %s11694_s7, 2048, %s108_s25, [#allocation15], %s11279_s10, %s11279_s10, %s11280_s11  }
  0x33   :  { %s11281_s16 = smov [#allocation2]   ;;  %s11282_s18 = smov [#allocation7]  }
  0x34   :  { %s26_s17 = sshll.u32 %s11281_s16, 4  ;;  %s47_s21 = sshll.u32 %s11282_s18, 4  ;;  %s27_s17 = int_to_ptr.vmem [resolvable:$true] %s26_s17  ;;  %s48_s21 = int_to_ptr.vmem [resolvable:$true] %s47_s21 }
  0x35   :  { %s11145_s5 = scalar_lea.vmem %s27_s17, 128  ;;  %p11150_p7 = scmp.lt.s32.totalorder %s27_s17, %s27_s17 }
  0x36   :  { %p11146_p6 = scmp.ne.s32.totalorder %s27_s17, %s11145_s5  ;;  %p11151_p8 = scmp.lt.s32.totalorder %s11145_s5, %s11145_s5 }
  0x38   :  { %p11152_p9 = por %p11151_p8, %p11150_p7 }
  0x3a   :  { %p11153_p10 = pnand %p11152_p9, %p11146_p6 }
  0x3c   :  { %11156 = shalt.err (!%p11153_p10)
}
  0x3d   :  { %29 = dma.hbm_to_vmem [thread:$0]  %s11687_s0, 128, %s27_s17, [#allocation3]  }
  0x3e   :  { %s11165_s23 = scalar_lea.vmem %s48_s21, 8192  ;;  %p11170_p12 = scmp.lt.s32.totalorder %s48_s21, %s48_s21 }
  0x3f   :  { %p11166_p11 = scmp.ne.s32.totalorder %s48_s21, %s11165_s23  ;;  %p11171_p13 = scmp.lt.s32.totalorder %s11165_s23, %s11165_s23 }
  0x41   :  { %p11172_p0 = por %p11171_p13, %p11170_p12 }
  0x43   :  { %p11173_p1 = pnand %p11172_p0, %p11166_p11 }
  0x45   :  { %11176 = shalt.err (!%p11173_p1)
}
  0x46   :  { %53 = dma.hbm_to_vmem [thread:$0]  %s11689_s2, 8192, %s48_s21, [#allocation6], %s11277_s27, %s11277_s27, %s11278_s28  }
  0x47   :  { %s11283_s25 = smov [#allocation10]   ;;  %s11284_s29 = smov [#allocation13]  }
  0x48   :  { %s71_s26 = sshll.u32 %s11283_s25, 4  ;;  %s95_s3 = sshll.u32 %s11284_s29, 4  ;;  %s72_s26 = int_to_ptr.vmem [resolvable:$true] %s71_s26  ;;  %s96_s3 = int_to_ptr.vmem [resolvable:$true] %s95_s3 }
  0x49   :  { %s11185_s0 = scalar_lea.vmem %s72_s26, 65536  ;;  %p11190_p3 = scmp.lt.s32.totalorder %s72_s26, %s72_s26 }
  0x4a   :  { %p11186_p2 = scmp.ne.s32.totalorder %s72_s26, %s11185_s0  ;;  %p11191_p4 = scmp.lt.s32.totalorder %s11185_s0, %s11185_s0 }
  0x4c   :  { %p11192_p5 = por %p11191_p4, %p11190_p3 }
  0x4e   :  { %p11193_p6 = pnand %p11192_p5, %p11186_p2 }
  0x50   :  { %11196 = shalt.err (!%p11193_p6)
}
  0x51   :  { %77 = dma.hbm_to_vmem [thread:$0]  %s11691_s4, 65536, %s72_s26, [#allocation9], %s11273_s19, %s11273_s19, %s11274_s20  }
  0x52   :  { %s11205_s2 = scalar_lea.vmem %s96_s3, 8192  ;;  %p11210_p8 = scmp.lt.s32.totalorder %s96_s3, %s96_s3 }
  0x53   :  { %p11206_p7 = scmp.ne.s32.totalorder %s96_s3, %s11205_s2  ;;  %p11211_p9 = scmp.lt.s32.totalorder %s11205_s2, %s11205_s2 }
  0x55   :  { %p11212_p10 = por %p11211_p9, %p11210_p8 }
  0x57   :  { %p11213_p11 = pnand %p11212_p10, %p11206_p7 }
  0x59   :  { %11216 = shalt.err (!%p11213_p11)
}
  0x5a   :  { %101 = dma.hbm_to_vmem [thread:$0]  %s11693_s6, 8192, %s96_s3, [#allocation12], %s11270_s12, %s11270_s12, %s11271_s13  }
  0x5b   :  { %s11285_s11 = smov [#allocation16]  }
  0x5c   :  { %s120_s14 = sshll.u32 %s11285_s11, 4  ;;  %s121_s14 = int_to_ptr.vmem [resolvable:$true] %s120_s14 }
  0x5d   :  { %s11225_s15 = scalar_lea.vmem %s121_s14, 1024  ;;  %p11230_p13 = scmp.lt.s32.totalorder %s121_s14, %s121_s14 }
  0x5e   :  { %p11226_p12 = scmp.ne.s32.totalorder %s121_s14, %s11225_s15  ;;  %p11231_p0 = scmp.lt.s32.totalorder %s11225_s15, %s11225_s15 }
  0x60   :  { %p11232_p1 = por %p11231_p0, %p11230_p13 }
  0x62   :  { %p11233_p2 = pnand %p11232_p1, %p11226_p12 }
  0x64   :  { %11236 = shalt.err (!%p11233_p2)
}
  0x65   :  { %123 = dma.hbm_to_vmem [thread:$0]  %s11695_s8, 1024, %s121_s14, [#allocation15]  }
  0x66   :  { %11257 = dma.done.wait [#allocation3], 128  }
  0x67   :  { %11258 = vsyncadd [#allocation3], 4294967168 }
  0x68   :  { %11259 = dma.done.wait [#allocation6], 12288  }
  0x69   :  { %11260 = vsyncadd [#allocation6], 4294955008 }
  0x6a   :  { %11261 = dma.done.wait [#allocation9], 98304  }
  0x6b   :  { %11262 = vsyncadd [#allocation9], 4294868992 }
  0x6c   :  { %11263 = dma.done.wait [#allocation12], 40960  }
  0x6d   :  { %11264 = vsyncadd [#allocation12], 4294926336 }
  0x6e   :  { %11265 = dma.done.wait [#allocation15], 3072  }
  0x6f   :  { %11266 = vsyncadd [#allocation15], 4294964224  ;;  %v10415_v0 = vld [vmem:[#allocation5 + $0x74] ss:$8 sps:$4 sm:$0xff]   ;;  %v10417_v1 = vld [vmem:[#allocation5 + $0x70] ss:$8 sps:$4 sm:$0xff]  }
  0x70   :  { %364 = vmatprep.subr.bf16.mxu0 %v10415_v0  ;;  %v10418_v2 = vld [vmem:[#allocation5 + $0x64] ss:$8 sps:$4 sm:$0xff]   ;;  %v10420_v3 = vld [vmem:[#allocation5 + $0x60] ss:$8 sps:$4 sm:$0xff]   ;;  %v10421_v4 = vld [vmem:[#allocation5 + $0x54] ss:$8 sps:$4 sm:$0xff]  }
  0x71   :  { %365 = vmatpush1.bf16.msra.mxu0 %v10417_v1  ;;  %v10423_v5 = vld [vmem:[#allocation5 + $0x50] ss:$8 sps:$4 sm:$0xff]   ;;  %v10424_v6 = vld [vmem:[#allocation5 + $0x44] ss:$8 sps:$4 sm:$0xff]   ;;  %v10426_v7 = vld [vmem:[#allocation5 + $0x40] ss:$8 sps:$4 sm:$0xff]  }
  0x72   :  { %366 = vmatprep.subr.bf16.mxu0 %v10418_v2  ;;  %v10427_v8 = vld [vmem:[#allocation5 + $0x34] ss:$8 sps:$4 sm:$0xff]   ;;  %v10429_v9 = vld [vmem:[#allocation5 + $0x30] ss:$8 sps:$4 sm:$0xff]   ;;  %v10430_v10 = vld [vmem:[#allocation5 + $0x24] ss:$8 sps:$4 sm:$0xff]  }
  0x73   :  { %v10432_v11 = vld [vmem:[#allocation5 + $0x20] ss:$8 sps:$4 sm:$0xff]   ;;  %v10433_v12 = vld [vmem:[#allocation5 + $0x14] ss:$8 sps:$4 sm:$0xff]   ;;  %v10435_v16 = vld [vmem:[#allocation5 + $0x10] ss:$8 sps:$4 sm:$0xff]  }
  0x74   :  { %v11382_v13 = vld [vmem:[#allocation2] sm:$0xff]  ;;  %v10465_v15 = vld [vmem:[#allocation7 + $0xe4] ss:$16 sps:$4 sm:$0xff]   ;;  %v10470_v18 = vld [vmem:[#allocation7 + $0xe0] ss:$16 sps:$4 sm:$0xff]   ;;  %s11286_s6 = smov [#allocation17]  }
  0x75   :  { %367 = vmatpush1.bf16.msra.mxu0 %v10420_v3  ;;  %v9174_v14 = vcombine.high %v11382_v13, %v11382_v13  ;;  %v10436_v17 = vld [vmem:[#allocation5 + $0x4] ss:$8 sps:$4 sm:$0xff]   ;;  %816 = vmatprep.subr.bf16.mxu1 %v10465_v15  ;;  %v10438_v20 = vld [vmem:[#allocation5] ss:$8 sps:$4 sm:$0xff]   ;;  %v10439_v23 = vld [vmem:[#allocation5 + $0xf4] ss:$8 sps:$4 sm:$0xff]   ;;  %v9173_v59 = vcombine.low %v11382_v13, %v11382_v13 }
  0x76   :  { %368 = vmatprep.subr.bf16.mxu0 %v10421_v4  ;;  %v10471_v19 = vld [vmem:[#allocation7 + $0xc4] ss:$16 sps:$4 sm:$0xff]   ;;  %817 = vmatpush1.bf16.msra.mxu1 %v10470_v18  ;;  %v10476_v21 = vld [vmem:[#allocation7 + $0xc0] ss:$16 sps:$4 sm:$0xff]   ;;  %v10469_v53 = vld [vmem:[#allocation7 + $0xec] ss:$16 sps:$4 sm:$0xff]  }
  0x77   :  { %396 = vmatprep.mubr.bf16.mxu0 %v9174_v14  ;;  %818 = vmatprep.subr.bf16.mxu1 %v10471_v19  ;;  %v10477_v22 = vld [vmem:[#allocation7 + $0xa4] ss:$16 sps:$4 sm:$0xff]   ;;  %v10482_v24 = vld [vmem:[#allocation7 + $0xa0] ss:$16 sps:$4 sm:$0xff]   ;;  %v10467_v57 = vld [vmem:[#allocation7 + $0xe8] ss:$16 sps:$4 sm:$0xff]  }
  0x78   :  { %v10441_v25 = vld [vmem:[#allocation5 + $0xf0] ss:$8 sps:$4 sm:$0xff]   ;;  %v10483_v26 = vld [vmem:[#allocation7 + $0x84] ss:$16 sps:$4 sm:$0xff]   ;;  %v10444_v28 = vld [vmem:[#allocation5 + $0xe0] ss:$8 sps:$4 sm:$0xff]  }
  0x79   :  { %369 = vmatpush1.bf16.msra.mxu0 %v10423_v5  ;;  %v10442_v27 = vld [vmem:[#allocation5 + $0xe4] ss:$8 sps:$4 sm:$0xff]   ;;  %v10488_v29 = vld [vmem:[#allocation7 + $0x80] ss:$16 sps:$4 sm:$0xff]   ;;  %v10445_v31 = vld [vmem:[#allocation5 + $0xd4] ss:$8 sps:$4 sm:$0xff]  }
  0x7a   :  { %370 = vmatprep.subr.bf16.mxu0 %v10424_v6  ;;  %819 = vmatpush1.bf16.msra.mxu1 %v10476_v21  ;;  %v10489_v30 = vld [vmem:[#allocation7 + $0x64] ss:$16 sps:$4 sm:$0xff]   ;;  %v10494_v32 = vld [vmem:[#allocation7 + $0x60] ss:$16 sps:$4 sm:$0xff]   ;;  %v10475_v60 = vld [vmem:[#allocation7 + $0xcc] ss:$16 sps:$4 sm:$0xff]  }
  0x7b   :  { %820 = vmatprep.subr.bf16.mxu1 %v10477_v22  ;;  %v10447_v33 = vld [vmem:[#allocation5 + $0xd0] ss:$8 sps:$4 sm:$0xff]   ;;  %v10495_v34 = vld [vmem:[#allocation7 + $0x44] ss:$16 sps:$4 sm:$0xff]   ;;  %v10450_v36 = vld [vmem:[#allocation5 + $0xc0] ss:$8 sps:$4 sm:$0xff]  }
  0x7c   :  { %v10448_v35 = vld [vmem:[#allocation5 + $0xc4] ss:$8 sps:$4 sm:$0xff]   ;;  %v10500_v37 = vld [vmem:[#allocation7 + $0x40] ss:$16 sps:$4 sm:$0xff]   ;;  %v10451_v39 = vld [vmem:[#allocation5 + $0xb4] ss:$8 sps:$4 sm:$0xff]  }
  0x7d   :  { %371 = vmatpush1.bf16.msra.mxu0 %v10426_v7  ;;  %v10501_v38 = vld [vmem:[#allocation7 + $0x24] ss:$16 sps:$4 sm:$0xff]   ;;  %v10506_v40 = vld [vmem:[#allocation7 + $0x20] ss:$16 sps:$4 sm:$0xff]   ;;  %v10473_v62 = vld [vmem:[#allocation7 + $0xc8] ss:$16 sps:$4 sm:$0xff]  }
  0x7e   :  { %372 = vmatprep.subr.bf16.mxu0 %v10427_v8  ;;  %821 = vmatpush1.bf16.msra.mxu1 %v10482_v24  ;;  %v10453_v41 = vld [vmem:[#allocation5 + $0xb0] ss:$8 sps:$4 sm:$0xff]   ;;  %v10507_v42 = vld [vmem:[#allocation7 + $0x4] ss:$16 sps:$4 sm:$0xff]   ;;  %v10456_v44 = vld [vmem:[#allocation5 + $0xa0] ss:$8 sps:$4 sm:$0xff]  }
  0x7f   :  { %822 = vmatprep.subr.bf16.mxu1 %v10483_v26  ;;  %v10454_v43 = vld [vmem:[#allocation5 + $0xa4] ss:$8 sps:$4 sm:$0xff]   ;;  %v10512_v45 = vld [vmem:[#allocation7] ss:$16 sps:$4 sm:$0xff]   ;;  %v10457_v47 = vld [vmem:[#allocation5 + $0x94] ss:$8 sps:$4 sm:$0xff]  }
  0x80   :  { %v10513_v46 = vld [vmem:[#allocation7 + $0x1e4] ss:$16 sps:$4 sm:$0xff]   ;;  %v10518_v48 = vld [vmem:[#allocation7 + $0x1e0] ss:$16 sps:$4 sm:$0xff]   ;;  %v10481_v0 = vld [vmem:[#allocation7 + $0xac] ss:$16 sps:$4 sm:$0xff]  }
  0x81   :  { %373 = vmatpush1.bf16.msra.mxu0 %v10429_v9  ;;  %v10459_v49 = vld [vmem:[#allocation5 + $0x90] ss:$8 sps:$4 sm:$0xff]   ;;  %v10519_v50 = vld [vmem:[#allocation7 + $0x1c4] ss:$16 sps:$4 sm:$0xff]   ;;  %v10462_v52 = vld [vmem:[#allocation5 + $0x80] ss:$8 sps:$4 sm:$0xff]  }
  0x82   :  { %374 = vmatprep.subr.bf16.mxu0 %v10430_v10  ;;  %823 = vmatpush1.bf16.msra.mxu1 %v10488_v29  ;;  %v10460_v51 = vld [vmem:[#allocation5 + $0x84] ss:$8 sps:$4 sm:$0xff]   ;;  %v10524_v54 = vld [vmem:[#allocation7 + $0x1c0] ss:$16 sps:$4 sm:$0xff]   ;;  %v10479_v2 = vld [vmem:[#allocation7 + $0xa8] ss:$16 sps:$4 sm:$0xff]  }
  0x83   :  { %824 = vmatprep.subr.bf16.mxu1 %v10489_v30  ;;  %v10525_v55 = vld [vmem:[#allocation7 + $0x1a4] ss:$16 sps:$4 sm:$0xff]   ;;  %v10530_v56 = vld [vmem:[#allocation7 + $0x1a0] ss:$16 sps:$4 sm:$0xff]   ;;  %v10487_v4 = vld [vmem:[#allocation7 + $0x8c] ss:$16 sps:$4 sm:$0xff]  }
  0x84   :  { %v10531_v58 = vld [vmem:[#allocation7 + $0x184] ss:$16 sps:$4 sm:$0xff]   ;;  %v10536_v61 = vld [vmem:[#allocation7 + $0x180] ss:$16 sps:$4 sm:$0xff]   ;;  %v10485_v6 = vld [vmem:[#allocation7 + $0x88] ss:$16 sps:$4 sm:$0xff]  }
  0x85   :  { %375 = vmatpush1.bf16.msra.mxu0 %v10432_v11  ;;  %v10537_v63 = vld [vmem:[#allocation7 + $0x164] ss:$16 sps:$4 sm:$0xff]   ;;  %v10542_v1 = vld [vmem:[#allocation7 + $0x160] ss:$16 sps:$4 sm:$0xff]   ;;  %v10493_v7 = vld [vmem:[#allocation7 + $0x6c] ss:$16 sps:$4 sm:$0xff]  }
  0x86   :  { %376 = vmatprep.subr.bf16.mxu0 %v10433_v12  ;;  %825 = vmatpush1.bf16.msra.mxu1 %v10494_v32  ;;  %v10543_v3 = vld [vmem:[#allocation7 + $0x144] ss:$16 sps:$4 sm:$0xff]   ;;  %v10548_v5 = vld [vmem:[#allocation7 + $0x140] ss:$16 sps:$4 sm:$0xff]   ;;  %v10491_v8 = vld [vmem:[#allocation7 + $0x68] ss:$16 sps:$4 sm:$0xff]  }
  0x87   :  { %826 = vmatprep.subr.bf16.mxu1 %v10495_v34  ;;  %v10499_v9 = vld [vmem:[#allocation7 + $0x4c] ss:$16 sps:$4 sm:$0xff]   ;;  %v10497_v10 = vld [vmem:[#allocation7 + $0x48] ss:$16 sps:$4 sm:$0xff]   ;;  %v10554_v30 = vld [vmem:[#allocation7 + $0x120] ss:$16 sps:$4 sm:$0xff]  }
  0x88   :  { %v10505_v11 = vld [vmem:[#allocation7 + $0x2c] ss:$16 sps:$4 sm:$0xff]   ;;  %v10503_v12 = vld [vmem:[#allocation7 + $0x28] ss:$16 sps:$4 sm:$0xff]   ;;  %v10560_v34 = vld [vmem:[#allocation7 + $0x100] ss:$16 sps:$4 sm:$0xff]  }
  0x89   :  { %377 = vmatpush1.bf16.msra.mxu0 %v10435_v16  ;;  %v10511_v13 = vld [vmem:[#allocation7 + $0xc] ss:$16 sps:$4 sm:$0xff]   ;;  %v10509_v14 = vld [vmem:[#allocation7 + $0x8] ss:$16 sps:$4 sm:$0xff]   ;;  %s9160_s8 = sshll.u32 %s11286_s6, 4  ;;  %s9161_s8 = int_to_ptr.vmem [resolvable:$true] %s9160_s8 }
  0x8a   :  { %378 = vmatprep.subr.bf16.mxu0 %v10436_v17  ;;  %827 = vmatpush1.bf16.msra.mxu1 %v10500_v37  ;;  %v10517_v15 = vld [vmem:[#allocation7 + $0x1ec] ss:$16 sps:$4 sm:$0xff]   ;;  %v10515_v16 = vld [vmem:[#allocation7 + $0x1e8] ss:$16 sps:$4 sm:$0xff]   ;;  %v1090_v37 = vld [vmem:[#allocation8 + $0x5c0] sm:$0xff]  ;;  %s11237_s12 = scalar_lea.vmem %s9161_s8, 128  ;;  %p11242_p4 = scmp.lt.s32.totalorder %s9161_s8, %s9161_s8 }
  0x8b   :  { %828 = vmatprep.subr.bf16.mxu1 %v10501_v38  ;;  %v10523_v17 = vld [vmem:[#allocation7 + $0x1cc] ss:$16 sps:$4 sm:$0xff]   ;;  %v10521_v18 = vld [vmem:[#allocation7 + $0x1c8] ss:$16 sps:$4 sm:$0xff]   ;;  %p11238_p3 = scmp.ne.s32.totalorder %s9161_s8, %s11237_s12  ;;  %p11243_p5 = scmp.lt.s32.totalorder %s11237_s12, %s11237_s12 }
  0x8c   :  { %v10529_v19 = vld [vmem:[#allocation7 + $0x1ac] ss:$16 sps:$4 sm:$0xff]   ;;  %v10533_v22 = vld [vmem:[#allocation7 + $0x188] ss:$16 sps:$4 sm:$0xff]  }
  0x8d   :  { %379 = vmatpush1.bf16.msra.mxu0 %v10438_v20  ;;  %v10527_v20 = vld [vmem:[#allocation7 + $0x1a8] ss:$16 sps:$4 sm:$0xff]   ;;  %v10535_v21 = vld [vmem:[#allocation7 + $0x18c] ss:$16 sps:$4 sm:$0xff]   ;;  %p11244_p6 = por %p11243_p5, %p11242_p4 }
  0x8e   :  { %380 = vmatprep.subr.bf16.mxu0 %v10439_v23  ;;  %829 = vmatpush1.bf16.msra.mxu1 %v10506_v40  ;;  %v10541_v23 = vld [vmem:[#allocation7 + $0x16c] ss:$16 sps:$4 sm:$0xff]   ;;  %v10539_v24 = vld [vmem:[#allocation7 + $0x168] ss:$16 sps:$4 sm:$0xff]   ;;  %v1094_v40 = vld [vmem:[#allocation8 + $0x5e0] sm:$0xff] }
  0x8f   :  { %830 = vmatprep.subr.bf16.mxu1 %v10507_v42  ;;  %v10545_v26 = vld [vmem:[#allocation7 + $0x148] ss:$16 sps:$4 sm:$0xff]   ;;  %v10559_v32 = vld [vmem:[#allocation7 + $0x10c] ss:$16 sps:$4 sm:$0xff]   ;;  %v9456_v42 = vcombine.high %v1090_v37, %v1094_v40  ;;  %p11245_p7 = pnand %p11244_p6, %p11238_p3 }
  0x90   :  { %v10551_v29 = vld [vmem:[#allocation7 + $0x128] ss:$16 sps:$4 sm:$0xff]  }
  0x91   :  { %381 = vmatpush2.bf16.msra.mxu0 %v10441_v25  ;;  %v10547_v25 = vld [vmem:[#allocation7 + $0x14c] ss:$16 sps:$4 sm:$0xff]  }
  0x92   :  { %382 = vmatprep.subr.bf16.mxu0 %v10442_v27  ;;  %831 = vmatpush1.bf16.msra.mxu1 %v10512_v45  ;;  %v10549_v27 = vld [vmem:[#allocation7 + $0x124] ss:$16 sps:$4 sm:$0xff]  }
  0x93   :  { %832 = vmatprep.subr.bf16.mxu1 %v10513_v46  ;;  %v185_v46 = vld [vmem:[#allocation16] ss:$8 sm:$0x3] }
  0x95   :  { %383 = vmatpush2.bf16.msra.mxu0 %v10444_v28  ;;  %v10553_v28 = vld [vmem:[#allocation7 + $0x12c] ss:$16 sps:$4 sm:$0xff]  }
  0x96   :  { %384 = vmatprep.subr.bf16.mxu0 %v10445_v31  ;;  %833 = vmatpush2.bf16.msra.mxu1 %v10518_v48  ;;  %v10555_v31 = vld [vmem:[#allocation7 + $0x104] ss:$16 sps:$4 sm:$0xff]  }
  0x97   :  { %834 = vmatprep.subr.bf16.mxu1 %v10519_v50 }
  0x99   :  { %385 = vmatpush2.bf16.msra.mxu0 %v10447_v33  ;;  %v10557_v33 = vld [vmem:[#allocation7 + $0x108] ss:$16 sps:$4 sm:$0xff]  }
  0x9a   :  { %386 = vmatprep.subr.bf16.mxu0 %v10448_v35  ;;  %835 = vmatpush2.bf16.msra.mxu1 %v10524_v54  ;;  %v962_v35 = vld [vmem:[#allocation8 + $0x1c0] sm:$0xff] }
  0x9b   :  { %836 = vmatprep.subr.bf16.mxu1 %v10525_v55 }
  0x9d   :  { %387 = vmatpush2.bf16.msra.mxu0 %v10450_v36  ;;  %v966_v36 = vld [vmem:[#allocation8 + $0x1e0] sm:$0xff] }
  0x9e   :  { %388 = vmatprep.subr.bf16.mxu0 %v10451_v39  ;;  %837 = vmatpush2.bf16.msra.mxu1 %v10530_v56  ;;  %v9327_v38 = vcombine.low %v962_v35, %v966_v36  ;;  %v9328_v39 = vcombine.high %v962_v35, %v966_v36  ;;  %v954_v56 = vld [vmem:[#allocation8 + $0x180] sm:$0xff] }
  0x9f   :  { %838 = vmatprep.subr.bf16.mxu1 %v10531_v58  ;;  %v958_v58 = vld [vmem:[#allocation8 + $0x1a0] sm:$0xff] }
  0xa0   :  { %v918_v35 = vld [vmem:[#allocation8 + $0x60] sm:$0xff] }
  0xa1   :  { %389 = vmatpush2.bf16.msra.mxu0 %v10453_v41  ;;  %v9455_v41 = vcombine.low %v1090_v37, %v1094_v40  ;;  %v1042_v36 = vld [vmem:[#allocation8 + $0x440] sm:$0xff] }
  0xa2   :  { %390 = vmatprep.subr.bf16.mxu0 %v10454_v43  ;;  %839 = vmatpush2.bf16.msra.mxu1 %v10536_v61  ;;  %v187_v43 = vlaneseq  ;;  %v1046_v37 = vld [vmem:[#allocation8 + $0x460] sm:$0xff] }
  0xa3   :  { %840 = vmatprep.subr.bf16.mxu1 %v10537_v63 }
  0xa5   :  { %391 = vmatpush2.bf16.msra.mxu0 %v10456_v44  ;;  %v11388_v44 = vshrl.u32 %v187_v43, 7  ;;  %v910_v43 = vld [vmem:[#allocation8 + $0x20] sm:$0xff] }
  0xa6   :  { %392 = vmatprep.subr.bf16.mxu0 %v10457_v47  ;;  %841 = vmatpush2.bf16.msra.mxu1 %v10542_v1 }
  0xa7   :  { %842 = vmatprep.subr.bf16.mxu1 %v10543_v3  ;;  %v11391_v45 = vsub.s32 0, %v11388_v44  ;;  %v11394_v47 = vsub.s32 1, %v11388_v44  ;;  %v950_v3 = vld [vmem:[#allocation8 + $0x160] sm:$0xff] }
  0xa9   :  { %393 = vmatpush2.bf16.msra.mxu0 %v10459_v49  ;;  %v190_v48 = vrot.slane %v185_v46, %v11391_v45  ;;  %v194_v49 = vrot.slane %v185_v46, %v11394_v47  ;;  %v1034_v46 = vld [vmem:[#allocation8 + $0x400] sm:$0xff] }
  0xaa   :  { %394 = vmatprep.subr.bf16.mxu0 %v10460_v51  ;;  %843 = vmatpush2.bf16.msra.mxu1 %v10548_v5  ;;  %v1078_v5 = vld [vmem:[#allocation8 + $0x560] sm:$0xff] }
  0xab   :  { %844 = vmatprep.subr.bf16.mxu1 %v10549_v27  ;;  %v926_v27 = vld [vmem:[#allocation8 + $0xa0] sm:$0xff] }
  0xad   :  { %395 = vmatpush2.bf16.msra.mxu0 %v10462_v52 }
  0xae   :  { %857 = vmatprep.subr.bf16.mxu0 %v10469_v53  ;;  %845 = vmatpush2.bf16.msra.mxu1 %v10554_v30 }
  0xaf   :  { %846 = vmatprep.subr.bf16.mxu1 %v10555_v31 }
  0xb0   :  { %397 = vmatmul.mubr.bf16.vlgmr.msra.gmra.mxu0 %v9173_v59  ;;  %v1082_v59 = vld [vmem:[#allocation8 + $0x580] sm:$0xff] }
  0xb1   :  { %858 = vmatpush1.bf16.msra.mxu0 %v10467_v57 }
  0xb2   :  { %859 = vmatprep.subr.bf16.mxu0 %v10475_v60  ;;  %847 = vmatpush2.bf16.msra.mxu1 %v10560_v34  ;;  %v1086_v60 = vld [vmem:[#allocation8 + $0x5a0] sm:$0xff] }
  0xb3   :  { %2487 = vmatprep.subr.bf16.mxu1 %v9328_v39  ;;  %v9448_v1 = vcombine.high %v1082_v59, %v1086_v60  ;;  %v914_v34 = vld [vmem:[#allocation8 + $0x40] sm:$0xff] }
  0xb4   :  { %v9280_v40 = vcombine.high %v914_v34, %v918_v35 }
  0xb5   :  { %860 = vmatpush1.bf16.msra.mxu0 %v10473_v62 }
  0xb6   :  { %861 = vmatprep.subr.bf16.mxu0 %v10481_v0  ;;  %v9320_v0 = vcombine.high %v954_v56, %v958_v58 }
  0xb9   :  { %862 = vmatpush1.bf16.msra.mxu0 %v10479_v2  ;;  %v946_v2 = vld [vmem:[#allocation8 + $0x140] sm:$0xff] }
  0xba   :  { %863 = vmatprep.subr.bf16.mxu0 %v10487_v4  ;;  %v1074_v4 = vld [vmem:[#allocation8 + $0x540] sm:$0xff] }
  0xbd   :  { %864 = vmatpush1.bf16.msra.mxu0 %v10485_v6  ;;  %v9319_v6 = vcombine.low %v954_v56, %v958_v58  ;;  %v1158_v56 = vld [vmem:[#allocation8 + $0x7e0] sm:$0xff] }
  0xbe   :  { %865 = vmatprep.subr.bf16.mxu0 %v10493_v7  ;;  %v9447_v7 = vcombine.low %v1082_v59, %v1086_v60 }
  0xc1   :  { %866 = vmatpush1.bf16.msra.mxu0 %v10491_v8  ;;  %v9312_v8 = vcombine.high %v946_v2, %v950_v3 }
  0xc2   :  { %867 = vmatprep.subr.bf16.mxu0 %v10499_v9  ;;  %v9440_v9 = vcombine.high %v1074_v4, %v1078_v5 }
  0xc5   :  { %868 = vmatpush1.bf16.msra.mxu0 %v10497_v10  ;;  %v938_v10 = vld [vmem:[#allocation8 + $0x100] sm:$0xff] }
  0xc6   :  { %869 = vmatprep.subr.bf16.mxu0 %v10505_v11  ;;  %v942_v11 = vld [vmem:[#allocation8 + $0x120] sm:$0xff] }
  0xc9   :  { %870 = vmatpush1.bf16.msra.mxu0 %v10503_v12  ;;  %v1066_v12 = vld [vmem:[#allocation8 + $0x500] sm:$0xff] }
  0xca   :  { %871 = vmatprep.subr.bf16.mxu0 %v10511_v13  ;;  %v1070_v13 = vld [vmem:[#allocation8 + $0x520] sm:$0xff] }
  0xcd   :  { %872 = vmatpush1.bf16.msra.mxu0 %v10509_v14  ;;  %v9311_v14 = vcombine.low %v946_v2, %v950_v3 }
  0xce   :  { %873 = vmatprep.subr.bf16.mxu0 %v10517_v15  ;;  %v9439_v15 = vcombine.low %v1074_v4, %v1078_v5  ;;  %v1010_v5 = vld [vmem:[#allocation8 + $0x340] sm:$0xff] }
  0xd1   :  { %874 = vmatpush2.bf16.msra.mxu0 %v10515_v16  ;;  %v9304_v16 = vcombine.high %v938_v10, %v942_v11 }
  0xd2   :  { %875 = vmatprep.subr.bf16.mxu0 %v10523_v17  ;;  %v9432_v17 = vcombine.high %v1066_v12, %v1070_v13 }
  0xd5   :  { %876 = vmatpush2.bf16.msra.mxu0 %v10521_v18  ;;  %v930_v18 = vld [vmem:[#allocation8 + $0xc0] sm:$0xff] }
  0xd6   :  { %877 = vmatprep.subr.bf16.mxu0 %v10529_v19  ;;  %v934_v19 = vld [vmem:[#allocation8 + $0xe0] sm:$0xff] }
  0xd7   :  { %v9295_v30 = vcombine.low %v930_v18, %v934_v19 }
  0xd9   :  { %878 = vmatpush2.bf16.msra.mxu0 %v10527_v20  ;;  %v1058_v20 = vld [vmem:[#allocation8 + $0x4c0] sm:$0xff] }
  0xda   :  { %879 = vmatprep.subr.bf16.mxu0 %v10535_v21  ;;  %v1062_v21 = vld [vmem:[#allocation8 + $0x4e0] sm:$0xff] }
  0xdb   :  { %v9423_v31 = vcombine.low %v1058_v20, %v1062_v21 }
  0xdd   :  { %880 = vmatpush2.bf16.msra.mxu0 %v10533_v22  ;;  %v9303_v22 = vcombine.low %v938_v10, %v942_v11 }
  0xde   :  { %881 = vmatprep.subr.bf16.mxu0 %v10541_v23  ;;  %v9431_v23 = vcombine.low %v1066_v12, %v1070_v13  ;;  %v1002_v13 = vld [vmem:[#allocation8 + $0x300] sm:$0xff] }
  0xe1   :  { %882 = vmatpush2.bf16.msra.mxu0 %v10539_v24  ;;  %v9296_v24 = vcombine.high %v930_v18, %v934_v19 }
  0xe2   :  { %883 = vmatprep.subr.bf16.mxu0 %v10547_v25  ;;  %v9424_v25 = vcombine.high %v1058_v20, %v1062_v21  ;;  %v994_v21 = vld [vmem:[#allocation8 + $0x2c0] sm:$0xff] }
  0xe5   :  { %884 = vmatpush2.bf16.msra.mxu0 %v10545_v26  ;;  %v922_v26 = vld [vmem:[#allocation8 + $0x80] sm:$0xff] }
  0xe6   :  { %885 = vmatprep.subr.bf16.mxu0 %v10553_v28  ;;  %v1050_v28 = vld [vmem:[#allocation8 + $0x480] sm:$0xff] }
  0xe9   :  { %886 = vmatpush2.bf16.msra.mxu0 %v10551_v29  ;;  %v1054_v29 = vld [vmem:[#allocation8 + $0x4a0] sm:$0xff] }
  0xea   :  { %887 = vmatprep.subr.bf16.mxu0 %v10559_v32  ;;  %v9288_v32 = vcombine.high %v922_v26, %v926_v27  ;;  %v9415_v39 = vcombine.low %v1050_v28, %v1054_v29 }
  0xed   :  { %888 = vmatpush2.bf16.msra.mxu0 %v10557_v33  ;;  %v9416_v33 = vcombine.high %v1050_v28, %v1054_v29  ;;  %v986_v29 = vld [vmem:[#allocation8 + $0x280] sm:$0xff] }
  0xee   :  { %2528 = vmatprep.subr.bf16.mxu0 %v9456_v42  ;;  %v906_v42 = vld [vmem:[#allocation8] sm:$0xff] }
 0x170   :  { %v398_v50 = vpop.f32.mrf.mxu0 }
 0x171   :  { %v399_v51 = vadd.f32 %v398_v50, %v190_v48  ;;  %v1038_v48 = vld [vmem:[#allocation8 + $0x420] sm:$0xff]  ;;  %v9407_v50 = vcombine.low %v1042_v36, %v1046_v37 }
 0x172   :  { %v400_v52 = vpop.f32.mrf.mxu0  ;;  %v9399_v58 = vcombine.low %v1034_v46, %v1038_v48 }
 0x173   :  { %v401_v53 = vadd.f32 %v400_v52, %v194_v49  ;;  %v405_v54 = vmax.f32 %v399_v51, 0.0  ;;  %v9279_v49 = vcombine.low %v914_v34, %v918_v35  ;;  %v9272_v51 = vcombine.high %v906_v42, %v910_v43 }
 0x174   :  { %v402_v55 = vpop.f32.mrf.mxu0  ;;  %v9400_v52 = vcombine.high %v1034_v46, %v1038_v48 }
 0x175   :  { %v406_v57 = vmax.f32 %v401_v53, 0.0  ;;  %v407_v63 = vpack.c.bf16 %v405_v54, %v405_v54  ;;  %v1026_v53 = vld [vmem:[#allocation8 + $0x3c0] sm:$0xff] }
 0x176   :  { %v403_v61 = vpop.f32.mrf.mxu0  ;;  %v1030_v54 = vld [vmem:[#allocation8 + $0x3e0] sm:$0xff] }
 0x177   :  { %v408_v62 = vpack.c.bf16 %v406_v57, %v406_v57  ;;  %v1154_v55 = vld [vmem:[#allocation8 + $0x7c0] sm:$0xff]  ;;  %v9271_v57 = vcombine.low %v906_v42, %v910_v43  ;;  %v9392_v59 = vcombine.high %v1026_v53, %v1030_v54 }
 0x178   :  { %v9520_v60 = vcombine.high %v1154_v55, %v1158_v56  ;;  %v1018_v61 = vld [vmem:[#allocation8 + $0x380] sm:$0xff]  ;;  %v9519_v2 = vcombine.low %v1154_v55, %v1158_v56 }
 0x179   :  { %848 = vmatprep.mubr.bf16.mxu1 %v408_v62  ;;  %889 = vmatprep.mubr.bf16.mxu0 %v408_v62  ;;  %v1022_v62 = vld [vmem:[#allocation8 + $0x3a0] sm:$0xff] }
 0x17a   :  { %849 = vmatmul.mubr.bf16.vlgmr.msra.gmra.mxu1 %v407_v63  ;;  %890 = vmatmul.mubr.bf16.vlgmr.msra.gmra.mxu0 %v407_v63  ;;  %v1146_v63 = vld [vmem:[#allocation8 + $0x780] sm:$0xff]  ;;  %v9384_v3 = vcombine.high %v1018_v61, %v1022_v62 }
 0x17b   :  { %2488 = vmatpush1.bf16.msra.mxu1 %v9327_v38  ;;  %2529 = vmatpush1.bf16.msra.mxu0 %v9455_v41  ;;  %v9287_v38 = vcombine.low %v922_v26, %v926_v27  ;;  %v9408_v41 = vcombine.high %v1042_v36, %v1046_v37  ;;  %v1110_v43 = vld [vmem:[#allocation8 + $0x660] sm:$0xff] }
 0x17c   :  { %2489 = vmatprep.subr.bf16.mxu1 %v9320_v0  ;;  %2530 = vmatprep.subr.bf16.mxu0 %v9448_v1  ;;  %v1150_v0 = vld [vmem:[#allocation8 + $0x7a0] sm:$0xff]  ;;  %v9391_v1 = vcombine.low %v1026_v53, %v1030_v54 }
 0x17d   :  { %v9512_v4 = vcombine.high %v1146_v63, %v1150_v0  ;;  %v9511_v10 = vcombine.low %v1146_v63, %v1150_v0  ;;  %v1102_v54 = vld [vmem:[#allocation8 + $0x620] sm:$0xff] }
 0x17f   :  { %2490 = vmatpush1.bf16.msra.mxu1 %v9319_v6  ;;  %2531 = vmatpush1.bf16.msra.mxu0 %v9447_v7  ;;  %v1014_v6 = vld [vmem:[#allocation8 + $0x360] sm:$0xff] }
 0x180   :  { %2491 = vmatprep.subr.bf16.mxu1 %v9312_v8  ;;  %2532 = vmatprep.subr.bf16.mxu0 %v9440_v9  ;;  %v1138_v7 = vld [vmem:[#allocation8 + $0x740] sm:$0xff]  ;;  %v9383_v9 = vcombine.low %v1018_v61, %v1022_v62  ;;  %v9376_v11 = vcombine.high %v1010_v5, %v1014_v6  ;;  %v1095_v62 = vld [vmem:[#allocation8 + $0x5e8] sm:$0xff] }
 0x181   :  { %v1142_v8 = vld [vmem:[#allocation8 + $0x760] sm:$0xff] }
 0x182   :  { %v9504_v12 = vcombine.high %v1138_v7, %v1142_v8  ;;  %v9503_v18 = vcombine.low %v1138_v7, %v1142_v8 }
 0x183   :  { %2492 = vmatpush1.bf16.msra.mxu1 %v9311_v14  ;;  %2533 = vmatpush1.bf16.msra.mxu0 %v9439_v15  ;;  %v1006_v14 = vld [vmem:[#allocation8 + $0x320] sm:$0xff] }
 0x184   :  { %2493 = vmatprep.subr.bf16.mxu1 %v9304_v16  ;;  %2534 = vmatprep.subr.bf16.mxu0 %v9432_v17  ;;  %v1130_v15 = vld [vmem:[#allocation8 + $0x700] sm:$0xff]  ;;  %v9375_v17 = vcombine.low %v1010_v5, %v1014_v6  ;;  %v9368_v19 = vcombine.high %v1002_v13, %v1006_v14 }
 0x185   :  { %v1134_v16 = vld [vmem:[#allocation8 + $0x720] sm:$0xff] }
 0x186   :  { %v9496_v20 = vcombine.high %v1130_v15, %v1134_v16  ;;  %v9495_v26 = vcombine.low %v1130_v15, %v1134_v16 }
 0x187   :  { %2494 = vmatpush1.bf16.msra.mxu1 %v9303_v22  ;;  %2535 = vmatpush1.bf16.msra.mxu0 %v9431_v23  ;;  %v998_v22 = vld [vmem:[#allocation8 + $0x2e0] sm:$0xff] }
 0x188   :  { %2495 = vmatprep.subr.bf16.mxu1 %v9296_v24  ;;  %2536 = vmatprep.subr.bf16.mxu0 %v9424_v25  ;;  %v1122_v23 = vld [vmem:[#allocation8 + $0x6c0] sm:$0xff]  ;;  %v9367_v25 = vcombine.low %v1002_v13, %v1006_v14  ;;  %v9360_v27 = vcombine.high %v994_v21, %v998_v22 }
 0x189   :  { %v1126_v24 = vld [vmem:[#allocation8 + $0x6e0] sm:$0xff] }
 0x18a   :  { %v9488_v28 = vcombine.high %v1122_v23, %v1126_v24  ;;  %v9487_v34 = vcombine.low %v1122_v23, %v1126_v24  ;;  %v955_v23 = vld [vmem:[#allocation8 + $0x188] sm:$0xff] }
 0x18b   :  { %2496 = vmatpush1.bf16.msra.mxu1 %v9295_v30  ;;  %2537 = vmatpush1.bf16.msra.mxu0 %v9423_v31  ;;  %v990_v30 = vld [vmem:[#allocation8 + $0x2a0] sm:$0xff] }
 0x18c   :  { %2497 = vmatprep.subr.bf16.mxu1 %v9288_v32  ;;  %2538 = vmatprep.subr.bf16.mxu0 %v9416_v33  ;;  %v1114_v31 = vld [vmem:[#allocation8 + $0x680] sm:$0xff]  ;;  %v9359_v33 = vcombine.low %v994_v21, %v998_v22  ;;  %v9352_v35 = vcombine.high %v986_v29, %v990_v30  ;;  %v9351_v37 = vcombine.low %v986_v29, %v990_v30 }
 0x18d   :  { %v1118_v32 = vld [vmem:[#allocation8 + $0x6a0] sm:$0xff] }
 0x18e   :  { %v9480_v36 = vcombine.high %v1114_v31, %v1118_v32 }
 0x18f   :  { %2498 = vmatpush1.bf16.msra.mxu1 %v9287_v38  ;;  %2539 = vmatpush1.bf16.msra.mxu0 %v9415_v39  ;;  %v9479_v38 = vcombine.low %v1114_v31, %v1118_v32  ;;  %v978_v39 = vld [vmem:[#allocation8 + $0x240] sm:$0xff] }
 0x190   :  { %2499 = vmatprep.subr.bf16.mxu1 %v9280_v40  ;;  %2540 = vmatprep.subr.bf16.mxu0 %v9408_v41  ;;  %v982_v40 = vld [vmem:[#allocation8 + $0x260] sm:$0xff] }
 0x191   :  { %v1106_v41 = vld [vmem:[#allocation8 + $0x640] sm:$0xff]  ;;  %v9344_v42 = vcombine.high %v978_v39, %v982_v40  ;;  %v9343_v46 = vcombine.low %v978_v39, %v982_v40 }
 0x192   :  { %v9471_v48 = vcombine.low %v1106_v41, %v1110_v43 }
 0x193   :  { %2500 = vmatpush1.bf16.msra.mxu1 %v9279_v49  ;;  %2541 = vmatpush1.bf16.msra.mxu0 %v9407_v50  ;;  %v9472_v49 = vcombine.high %v1106_v41, %v1110_v43  ;;  %v970_v50 = vld [vmem:[#allocation8 + $0x200] sm:$0xff]  ;;  %v939_v43 = vld [vmem:[#allocation8 + $0x108] sm:$0xff] }
 0x194   :  { %2501 = vmatprep.subr.bf16.mxu1 %v9272_v51  ;;  %2542 = vmatprep.subr.bf16.mxu0 %v9400_v52  ;;  %v974_v51 = vld [vmem:[#allocation8 + $0x220] sm:$0xff] }
 0x195   :  { %v1098_v52 = vld [vmem:[#allocation8 + $0x600] sm:$0xff]  ;;  %v9336_v53 = vcombine.high %v970_v50, %v974_v51  ;;  %v9335_v55 = vcombine.low %v970_v50, %v974_v51 }
 0x196   :  { %v9463_v56 = vcombine.low %v1098_v52, %v1102_v54 }
 0x197   :  { %2502 = vmatpush1.bf16.msra.mxu1 %v9271_v57  ;;  %2543 = vmatpush1.bf16.msra.mxu0 %v9399_v58  ;;  %v9464_v57 = vcombine.high %v1098_v52, %v1102_v54  ;;  %v963_v58 = vld [vmem:[#allocation8 + $0x1c8] sm:$0xff] }
 0x198   :  { %2503 = vmatprep.subr.bf16.mxu1 %v9392_v59  ;;  %2544 = vmatprep.subr.bf16.mxu0 %v9520_v60  ;;  %v967_v59 = vld [vmem:[#allocation8 + $0x1e8] sm:$0xff] }
 0x199   :  { %v1091_v60 = vld [vmem:[#allocation8 + $0x5c8] sm:$0xff]  ;;  %v9330_v61 = vcombine.high %v963_v58, %v967_v59  ;;  %v9329_v63 = vcombine.low %v963_v58, %v967_v59 }
 0x19a   :  { %v9457_v0 = vcombine.low %v1091_v60, %v1095_v62  ;;  %v931_v54 = vld [vmem:[#allocation8 + $0xc8] sm:$0xff] }
 0x19b   :  { %2504 = vmatpush2.bf16.msra.mxu1 %v9391_v1  ;;  %2545 = vmatpush2.bf16.msra.mxu0 %v9519_v2  ;;  %v9458_v1 = vcombine.high %v1091_v60, %v1095_v62  ;;  %v11399_v2 = vsub.s32 2, %v11388_v44  ;;  %v923_v62 = vld [vmem:[#allocation8 + $0x88] sm:$0xff] }
 0x19c   :  { %2505 = vmatprep.subr.bf16.mxu1 %v9384_v3  ;;  %2546 = vmatprep.subr.bf16.mxu0 %v9512_v4  ;;  %v474_v3 = vld [vmem:[#allocation16 + $0x1] ss:$8 sm:$0xf]  ;;  %v11402_v4 = vsub.s32 3, %v11388_v44 }
 0x19d   :  { %v479_v5 = vrot.slane %v474_v3, %v11391_v45  ;;  %v487_v6 = vrot.slane %v474_v3, %v11399_v2  ;;  %v483_v7 = vrot.slane %v474_v3, %v11394_v47 }
 0x19e   :  { %v491_v8 = vrot.slane %v474_v3, %v11402_v4 }
 0x19f   :  { %2506 = vmatpush2.bf16.msra.mxu1 %v9383_v9  ;;  %2547 = vmatpush2.bf16.msra.mxu0 %v9511_v10 }
 0x1a0   :  { %2507 = vmatprep.subr.bf16.mxu1 %v9376_v11  ;;  %2548 = vmatprep.subr.bf16.mxu0 %v9504_v12 }
 0x1a3   :  { %2508 = vmatpush2.bf16.msra.mxu1 %v9375_v17  ;;  %2549 = vmatpush2.bf16.msra.mxu0 %v9503_v18 }
 0x1a4   :  { %2509 = vmatprep.subr.bf16.mxu1 %v9368_v19  ;;  %2550 = vmatprep.subr.bf16.mxu0 %v9496_v20 }
 0x1a7   :  { %2510 = vmatpush2.bf16.msra.mxu1 %v9367_v25  ;;  %2551 = vmatpush2.bf16.msra.mxu0 %v9495_v26  ;;  %v959_v26 = vld [vmem:[#allocation8 + $0x1a8] sm:$0xff] }
 0x1a8   :  { %2511 = vmatprep.subr.bf16.mxu1 %v9360_v27  ;;  %2552 = vmatprep.subr.bf16.mxu0 %v9488_v28  ;;  %v1083_v27 = vld [vmem:[#allocation8 + $0x588] sm:$0xff]  ;;  %v9321_v39 = vcombine.low %v955_v23, %v959_v26 }
 0x1a9   :  { %v1087_v28 = vld [vmem:[#allocation8 + $0x5a8] sm:$0xff] }
 0x1aa   :  { %v9449_v40 = vcombine.low %v1083_v27, %v1087_v28 }
 0x1ab   :  { %2512 = vmatpush2.bf16.msra.mxu1 %v9359_v33  ;;  %2553 = vmatpush2.bf16.msra.mxu0 %v9487_v34  ;;  %v947_v33 = vld [vmem:[#allocation8 + $0x148] sm:$0xff]  ;;  %v9322_v34 = vcombine.high %v955_v23, %v959_v26 }
 0x1ac   :  { %2513 = vmatprep.subr.bf16.mxu1 %v9352_v35  ;;  %2554 = vmatprep.subr.bf16.mxu0 %v9480_v36  ;;  %v9450_v35 = vcombine.high %v1083_v27, %v1087_v28  ;;  %v951_v36 = vld [vmem:[#allocation8 + $0x168] sm:$0xff] }
 0x1ad   :  { %v9314_v41 = vcombine.high %v947_v33, %v951_v36  ;;  %v9313_v50 = vcombine.low %v947_v33, %v951_v36  ;;  %v1155_v26 = vld [vmem:[#allocation8 + $0x7c8] sm:$0xff] }
 0x1ae   :  { %v1159_v27 = vld [vmem:[#allocation8 + $0x7e8] sm:$0xff] }
 0x1af   :  { %2514 = vmatpush2.bf16.msra.mxu1 %v9351_v37  ;;  %2555 = vmatpush2.bf16.msra.mxu0 %v9479_v38  ;;  %v1075_v37 = vld [vmem:[#allocation8 + $0x548] sm:$0xff] }
 0x1b0   :  { %2515 = vmatprep.subr.bf16.mxu1 %v9344_v42  ;;  %2556 = vmatprep.subr.bf16.mxu0 %v9472_v49  ;;  %v1079_v38 = vld [vmem:[#allocation8 + $0x568] sm:$0xff] }
 0x1b1   :  { %v9442_v42 = vcombine.high %v1075_v37, %v1079_v38  ;;  %v1071_v49 = vld [vmem:[#allocation8 + $0x528] sm:$0xff]  ;;  %v9441_v51 = vcombine.low %v1075_v37, %v1079_v38 }
 0x1b2   :  { %v1019_v36 = vld [vmem:[#allocation8 + $0x388] sm:$0xff] }
 0x1b3   :  { %2516 = vmatpush2.bf16.msra.mxu1 %v9343_v46  ;;  %2557 = vmatpush2.bf16.msra.mxu0 %v9471_v48  ;;  %v943_v46 = vld [vmem:[#allocation8 + $0x128] sm:$0xff] }
 0x1b4   :  { %2517 = vmatprep.subr.bf16.mxu1 %v9336_v53  ;;  %2558 = vmatprep.subr.bf16.mxu0 %v9464_v57  ;;  %v1067_v48 = vld [vmem:[#allocation8 + $0x508] sm:$0xff]  ;;  %v9306_v52 = vcombine.high %v939_v43, %v943_v46  ;;  %v9305_v58 = vcombine.low %v939_v43, %v943_v46 }
 0x1b5   :  { %v9434_v53 = vcombine.high %v1067_v48, %v1071_v49  ;;  %v1063_v57 = vld [vmem:[#allocation8 + $0x4e8] sm:$0xff]  ;;  %v9433_v59 = vcombine.low %v1067_v48, %v1071_v49 }
 0x1b6   :  { %v1023_v37 = vld [vmem:[#allocation8 + $0x3a8] sm:$0xff] }
 0x1b7   :  { %2518 = vmatpush2.bf16.msra.mxu1 %v9335_v55  ;;  %2559 = vmatpush2.bf16.msra.mxu0 %v9463_v56  ;;  %v935_v55 = vld [vmem:[#allocation8 + $0xe8] sm:$0xff] }
 0x1b8   :  { %2569 = vmatprep.subr.bf16.mxu1 %v9330_v61  ;;  %2610 = vmatprep.subr.bf16.mxu0 %v9458_v1  ;;  %v1059_v56 = vld [vmem:[#allocation8 + $0x4c8] sm:$0xff]  ;;  %v9298_v60 = vcombine.high %v931_v54, %v935_v55  ;;  %v9297_v3 = vcombine.low %v931_v54, %v935_v55 }
 0x1b9   :  { %v9426_v61 = vcombine.high %v1059_v56, %v1063_v57  ;;  %v1055_v1 = vld [vmem:[#allocation8 + $0x4a8] sm:$0xff] }
 0x1ba   :  { %v1147_v38 = vld [vmem:[#allocation8 + $0x788] sm:$0xff] }
 0x1bb   :  { %v1011_v46 = vld [vmem:[#allocation8 + $0x348] sm:$0xff] }
 0x1bc   :  { %v1015_v48 = vld [vmem:[#allocation8 + $0x368] sm:$0xff] }
 0x1bd   :  { %v1139_v49 = vld [vmem:[#allocation8 + $0x748] sm:$0xff] }
 0x1be   :  { %v1003_v55 = vld [vmem:[#allocation8 + $0x308] sm:$0xff] }
 0x23a   :  { %v850_v9 = vpop.f32.mrf.mxu1  ;;  %v891_v10 = vpop.f32.mrf.mxu0 }
 0x23b   :  { %v851_v11 = vadd.f32 %v850_v9, %v479_v5  ;;  %v892_v12 = vadd.f32 %v891_v10, %v487_v6  ;;  %v9425_v5 = vcombine.low %v1059_v56, %v1063_v57  ;;  %v919_v9 = vld [vmem:[#allocation8 + $0x68] sm:$0xff] }
 0x23c   :  { %v852_v13 = vpop.f32.mrf.mxu1  ;;  %v893_v14 = vpop.f32.mrf.mxu0  ;;  %v1043_v10 = vld [vmem:[#allocation8 + $0x448] sm:$0xff] }
 0x23d   :  { %v853_v15 = vadd.f32 %v852_v13, %v483_v7  ;;  %v894_v16 = vadd.f32 %v893_v14, %v491_v8  ;;  %v898_v17 = vmax.f32 %v851_v11, 0.0  ;;  %v900_v18 = vmax.f32 %v892_v12, 0.0  ;;  %v915_v8 = vld [vmem:[#allocation8 + $0x48] sm:$0xff] }
 0x23e   :  { %v854_v19 = vpop.f32.mrf.mxu1  ;;  %v895_v20 = vpop.f32.mrf.mxu0  ;;  %v1047_v11 = vld [vmem:[#allocation8 + $0x468] sm:$0xff]  ;;  %v9282_v14 = vcombine.high %v915_v8, %v919_v9 }
 0x23f   :  { %v899_v21 = vmax.f32 %v853_v15, 0.0  ;;  %v901_v22 = vmax.f32 %v894_v16, 0.0  ;;  %v11412_v31 = vpack.c.bf16 %v898_v17, %v898_v17  ;;  %v11414_v32 = vpack.c.bf16 %v900_v18, %v900_v18  ;;  %v907_v16 = vld [vmem:[#allocation8 + $0x8] sm:$0xff] }
 0x240   :  { %v855_v24 = vpop.f32.mrf.mxu1  ;;  %v896_v25 = vpop.f32.mrf.mxu0  ;;  %v9410_v15 = vcombine.high %v1043_v10, %v1047_v11  ;;  %v911_v17 = vld [vmem:[#allocation8 + $0x28] sm:$0xff]  ;;  %v9281_v20 = vcombine.low %v915_v8, %v919_v9 }
 0x241   :  { %v11408_v29 = vpack.c.bf16 %v899_v21, %v899_v21  ;;  %v11410_v30 = vpack.c.bf16 %v901_v22, %v901_v22  ;;  %v1035_v18 = vld [vmem:[#allocation8 + $0x408] sm:$0xff]  ;;  %v9409_v21 = vcombine.low %v1043_v10, %v1047_v11  ;;  %v9274_v22 = vcombine.high %v907_v16, %v911_v17 }
 0x242   :  { %v1039_v19 = vld [vmem:[#allocation8 + $0x428] sm:$0xff]  ;;  %v9273_v28 = vcombine.low %v907_v16, %v911_v17 }
 0x243   :  { %2519 = vmatprep.mubr.bf16.mxu1 %v11408_v29  ;;  %2560 = vmatprep.mubr.bf16.mxu0 %v11410_v30  ;;  %v9402_v23 = vcombine.high %v1035_v18, %v1039_v19  ;;  %v1027_v24 = vld [vmem:[#allocation8 + $0x3c8] sm:$0xff]  ;;  %v9401_v33 = vcombine.low %v1035_v18, %v1039_v19 }
 0x244   :  { %2520 = vmatmul.mubr.bf16.vlgmr.msra.gmra.mxu1 %v11412_v31  ;;  %2561 = vmatmul.mubr.bf16.vlgmr.msra.gmra.mxu0 %v11414_v32  ;;  %v1031_v25 = vld [vmem:[#allocation8 + $0x3e8] sm:$0xff] }
 0x245   :  { %2570 = vmatpush1.bf16.msra.mxu1 %v9329_v63  ;;  %2611 = vmatpush1.bf16.msra.mxu0 %v9457_v0  ;;  %v927_v63 = vld [vmem:[#allocation8 + $0xa8] sm:$0xff] }
 0x246   :  { %2601 = vmatprep.mubr.bf16.mxu1 %v11408_v29  ;;  %2642 = vmatprep.mubr.bf16.mxu0 %v11410_v30  ;;  %v1051_v0 = vld [vmem:[#allocation8 + $0x488] sm:$0xff]  ;;  %v9290_v6 = vcombine.high %v923_v62, %v927_v63  ;;  %v9289_v12 = vcombine.low %v923_v62, %v927_v63 }
 0x247   :  { %2571 = vmatprep.subr.bf16.mxu1 %v9322_v34  ;;  %2612 = vmatprep.subr.bf16.mxu0 %v9450_v35  ;;  %v9418_v7 = vcombine.high %v1051_v0, %v1055_v1  ;;  %v9417_v13 = vcombine.low %v1051_v0, %v1055_v1  ;;  %v9394_v34 = vcombine.high %v1027_v24, %v1031_v25  ;;  %v1007_v56 = vld [vmem:[#allocation8 + $0x328] sm:$0xff] }
 0x248   :  { %v9522_v35 = vcombine.high %v1155_v26, %v1159_v27  ;;  %v1131_v57 = vld [vmem:[#allocation8 + $0x708] sm:$0xff] }
 0x249   :  { %2572 = vmatpush1.bf16.msra.mxu1 %v9321_v39  ;;  %2613 = vmatpush1.bf16.msra.mxu0 %v9449_v40  ;;  %v1151_v39 = vld [vmem:[#allocation8 + $0x7a8] sm:$0xff]  ;;  %v9393_v40 = vcombine.low %v1027_v24, %v1031_v25 }
 0x24a   :  { %2573 = vmatprep.subr.bf16.mxu1 %v9314_v41  ;;  %2614 = vmatprep.subr.bf16.mxu0 %v9442_v42  ;;  %v9521_v41 = vcombine.low %v1155_v26, %v1159_v27  ;;  %v9386_v42 = vcombine.high %v1019_v36, %v1023_v37  ;;  %v9514_v43 = vcombine.high %v1147_v38, %v1151_v39  ;;  %v995_v63 = vld [vmem:[#allocation8 + $0x2c8] sm:$0xff] }
 0x24b   :  { %v999_v0 = vld [vmem:[#allocation8 + $0x2e8] sm:$0xff] }
 0x24c   :  { %v1123_v1 = vld [vmem:[#allocation8 + $0x6c8] sm:$0xff] }
 0x24d   :  { %2574 = vmatpush1.bf16.msra.mxu1 %v9313_v50  ;;  %2615 = vmatpush1.bf16.msra.mxu0 %v9441_v51  ;;  %v1143_v50 = vld [vmem:[#allocation8 + $0x768] sm:$0xff]  ;;  %v9385_v51 = vcombine.low %v1019_v36, %v1023_v37  ;;  %v964_v37 = vld [vmem:[#allocation8 + $0x1d0] sm:$0xff] }
 0x24e   :  { %2575 = vmatprep.subr.bf16.mxu1 %v9306_v52  ;;  %2616 = vmatprep.subr.bf16.mxu0 %v9434_v53  ;;  %v9513_v52 = vcombine.low %v1147_v38, %v1151_v39  ;;  %v9378_v53 = vcombine.high %v1011_v46, %v1015_v48  ;;  %v9506_v54 = vcombine.high %v1139_v49, %v1143_v50  ;;  %v987_v9 = vld [vmem:[#allocation8 + $0x288] sm:$0xff]  ;;  %v968_v38 = vld [vmem:[#allocation8 + $0x1f0] sm:$0xff] }
 0x24f   :  { %v991_v10 = vld [vmem:[#allocation8 + $0x2a8] sm:$0xff]  ;;  %v1092_v39 = vld [vmem:[#allocation8 + $0x5d0] sm:$0xff] }
 0x250   :  { %v1115_v11 = vld [vmem:[#allocation8 + $0x688] sm:$0xff] }
 0x251   :  { %2576 = vmatpush1.bf16.msra.mxu1 %v9305_v58  ;;  %2617 = vmatpush1.bf16.msra.mxu0 %v9433_v59  ;;  %v1135_v58 = vld [vmem:[#allocation8 + $0x728] sm:$0xff]  ;;  %v9377_v59 = vcombine.low %v1011_v46, %v1015_v48  ;;  %v956_v48 = vld [vmem:[#allocation8 + $0x190] sm:$0xff] }
 0x252   :  { %2577 = vmatprep.subr.bf16.mxu1 %v9298_v60  ;;  %2618 = vmatprep.subr.bf16.mxu0 %v9426_v61  ;;  %v9505_v60 = vcombine.low %v1139_v49, %v1143_v50  ;;  %v9370_v61 = vcombine.high %v1003_v55, %v1007_v56  ;;  %v9498_v62 = vcombine.high %v1131_v57, %v1135_v58  ;;  %v979_v17 = vld [vmem:[#allocation8 + $0x248] sm:$0xff]  ;;  %v960_v49 = vld [vmem:[#allocation8 + $0x1b0] sm:$0xff] }
 0x253   :  { %v983_v18 = vld [vmem:[#allocation8 + $0x268] sm:$0xff]  ;;  %v1084_v50 = vld [vmem:[#allocation8 + $0x590] sm:$0xff] }
 0x254   :  { %v1107_v19 = vld [vmem:[#allocation8 + $0x648] sm:$0xff] }
 0x255   :  { %2578 = vmatpush1.bf16.msra.mxu1 %v9297_v3  ;;  %2619 = vmatpush1.bf16.msra.mxu0 %v9425_v5  ;;  %v1127_v3 = vld [vmem:[#allocation8 + $0x6e8] sm:$0xff]  ;;  %v9369_v5 = vcombine.low %v1003_v55, %v1007_v56  ;;  %v948_v56 = vld [vmem:[#allocation8 + $0x150] sm:$0xff] }
 0x256   :  { %2579 = vmatprep.subr.bf16.mxu1 %v9290_v6  ;;  %2620 = vmatprep.subr.bf16.mxu0 %v9418_v7  ;;  %v9497_v6 = vcombine.low %v1131_v57, %v1135_v58  ;;  %v9362_v7 = vcombine.high %v995_v63, %v999_v0  ;;  %v9490_v8 = vcombine.high %v1123_v1, %v1127_v3  ;;  %v971_v25 = vld [vmem:[#allocation8 + $0x208] sm:$0xff]  ;;  %v952_v57 = vld [vmem:[#allocation8 + $0x170] sm:$0xff] }
 0x257   :  { %v975_v26 = vld [vmem:[#allocation8 + $0x228] sm:$0xff]  ;;  %v1076_v58 = vld [vmem:[#allocation8 + $0x550] sm:$0xff] }
 0x258   :  { %v1099_v27 = vld [vmem:[#allocation8 + $0x608] sm:$0xff] }
 0x259   :  { %2580 = vmatpush1.bf16.msra.mxu1 %v9289_v12  ;;  %2621 = vmatpush1.bf16.msra.mxu0 %v9417_v13  ;;  %v1119_v12 = vld [vmem:[#allocation8 + $0x6a8] sm:$0xff]  ;;  %v9361_v13 = vcombine.low %v995_v63, %v999_v0  ;;  %v940_v0 = vld [vmem:[#allocation8 + $0x110] sm:$0xff] }
 0x25a   :  { %2581 = vmatprep.subr.bf16.mxu1 %v9282_v14  ;;  %2622 = vmatprep.subr.bf16.mxu0 %v9410_v15  ;;  %v9489_v14 = vcombine.low %v1123_v1, %v1127_v3  ;;  %v9354_v15 = vcombine.high %v987_v9, %v991_v10  ;;  %v9482_v16 = vcombine.high %v1115_v11, %v1119_v12  ;;  %v944_v1 = vld [vmem:[#allocation8 + $0x130] sm:$0xff] }
 0x25b   :  { %v1068_v3 = vld [vmem:[#allocation8 + $0x510] sm:$0xff] }
 0x25d   :  { %2582 = vmatpush1.bf16.msra.mxu1 %v9281_v20  ;;  %2623 = vmatpush1.bf16.msra.mxu0 %v9409_v21  ;;  %v1111_v20 = vld [vmem:[#allocation8 + $0x668] sm:$0xff]  ;;  %v9353_v21 = vcombine.low %v987_v9, %v991_v10  ;;  %v932_v10 = vld [vmem:[#allocation8 + $0xd0] sm:$0xff] }
 0x25e   :  { %2583 = vmatprep.subr.bf16.mxu1 %v9274_v22  ;;  %2624 = vmatprep.subr.bf16.mxu0 %v9402_v23  ;;  %v9481_v22 = vcombine.low %v1115_v11, %v1119_v12  ;;  %v9346_v23 = vcombine.high %v979_v17, %v983_v18  ;;  %v9474_v24 = vcombine.high %v1107_v19, %v1111_v20  ;;  %v936_v11 = vld [vmem:[#allocation8 + $0xf0] sm:$0xff] }
 0x25f   :  { %v1060_v12 = vld [vmem:[#allocation8 + $0x4d0] sm:$0xff] }
 0x261   :  { %2584 = vmatpush1.bf16.msra.mxu1 %v9273_v28  ;;  %2625 = vmatpush1.bf16.msra.mxu0 %v9401_v33  ;;  %v1103_v28 = vld [vmem:[#allocation8 + $0x628] sm:$0xff]  ;;  %v9345_v33 = vcombine.low %v979_v17, %v983_v18  ;;  %v924_v18 = vld [vmem:[#allocation8 + $0x90] sm:$0xff] }
 0x262   :  { %2585 = vmatprep.subr.bf16.mxu1 %v9394_v34  ;;  %2626 = vmatprep.subr.bf16.mxu0 %v9522_v35  ;;  %v9473_v34 = vcombine.low %v1107_v19, %v1111_v20  ;;  %v9338_v35 = vcombine.high %v971_v25, %v975_v26  ;;  %v9466_v36 = vcombine.high %v1099_v27, %v1103_v28  ;;  %v928_v19 = vld [vmem:[#allocation8 + $0xb0] sm:$0xff] }
 0x263   :  { %v1052_v20 = vld [vmem:[#allocation8 + $0x490] sm:$0xff] }
 0x265   :  { %2586 = vmatpush2.bf16.msra.mxu1 %v9393_v40  ;;  %2627 = vmatpush2.bf16.msra.mxu0 %v9521_v41  ;;  %v1096_v40 = vld [vmem:[#allocation8 + $0x5f0] sm:$0xff]  ;;  %v9337_v41 = vcombine.low %v971_v25, %v975_v26 }
 0x266   :  { %2587 = vmatprep.subr.bf16.mxu1 %v9386_v42  ;;  %2628 = vmatprep.subr.bf16.mxu0 %v9514_v43  ;;  %v9465_v42 = vcombine.low %v1099_v27, %v1103_v28  ;;  %v9332_v43 = vcombine.high %v964_v37, %v968_v38  ;;  %v9460_v46 = vcombine.high %v1092_v39, %v1096_v40  ;;  %v916_v26 = vld [vmem:[#allocation8 + $0x50] sm:$0xff] }
 0x267   :  { %v920_v27 = vld [vmem:[#allocation8 + $0x70] sm:$0xff] }
 0x268   :  { %v1044_v28 = vld [vmem:[#allocation8 + $0x450] sm:$0xff] }
 0x269   :  { %2588 = vmatpush2.bf16.msra.mxu1 %v9385_v51  ;;  %2629 = vmatpush2.bf16.msra.mxu0 %v9513_v52  ;;  %v1088_v51 = vld [vmem:[#allocation8 + $0x5b0] sm:$0xff]  ;;  %v9331_v52 = vcombine.low %v964_v37, %v968_v38 }
 0x26a   :  { %2589 = vmatprep.subr.bf16.mxu1 %v9378_v53  ;;  %2630 = vmatprep.subr.bf16.mxu0 %v9506_v54  ;;  %v9459_v53 = vcombine.low %v1092_v39, %v1096_v40  ;;  %v9324_v54 = vcombine.high %v956_v48, %v960_v49  ;;  %v9452_v55 = vcombine.high %v1084_v50, %v1088_v51  ;;  %v908_v38 = vld [vmem:[#allocation8 + $0x10] sm:$0xff] }
 0x26b   :  { %v912_v39 = vld [vmem:[#allocation8 + $0x30] sm:$0xff] }
 0x26c   :  { %v1036_v40 = vld [vmem:[#allocation8 + $0x410] sm:$0xff] }
 0x26d   :  { %2590 = vmatpush2.bf16.msra.mxu1 %v9377_v59  ;;  %2631 = vmatpush2.bf16.msra.mxu0 %v9505_v60  ;;  %v1080_v59 = vld [vmem:[#allocation8 + $0x570] sm:$0xff]  ;;  %v9323_v60 = vcombine.low %v956_v48, %v960_v49 }
 0x26e   :  { %2591 = vmatprep.subr.bf16.mxu1 %v9370_v61  ;;  %2632 = vmatprep.subr.bf16.mxu0 %v9498_v62  ;;  %v9451_v61 = vcombine.low %v1084_v50, %v1088_v51  ;;  %v9316_v62 = vcombine.high %v948_v56, %v952_v57  ;;  %v9444_v63 = vcombine.high %v1076_v58, %v1080_v59  ;;  %v1028_v49 = vld [vmem:[#allocation8 + $0x3d0] sm:$0xff] }
 0x26f   :  { %v1032_v50 = vld [vmem:[#allocation8 + $0x3f0] sm:$0xff] }
 0x270   :  { %v1156_v51 = vld [vmem:[#allocation8 + $0x7d0] sm:$0xff] }
 0x271   :  { %2592 = vmatpush2.bf16.msra.mxu1 %v9369_v5  ;;  %2633 = vmatpush2.bf16.msra.mxu0 %v9497_v6  ;;  %v1072_v5 = vld [vmem:[#allocation8 + $0x530] sm:$0xff]  ;;  %v9315_v6 = vcombine.low %v948_v56, %v952_v57 }
 0x272   :  { %2593 = vmatprep.subr.bf16.mxu1 %v9362_v7  ;;  %2634 = vmatprep.subr.bf16.mxu0 %v9490_v8  ;;  %v9443_v7 = vcombine.low %v1076_v58, %v1080_v59  ;;  %v9308_v8 = vcombine.high %v940_v0, %v944_v1  ;;  %v9436_v9 = vcombine.high %v1068_v3, %v1072_v5  ;;  %v1020_v57 = vld [vmem:[#allocation8 + $0x390] sm:$0xff] }
 0x273   :  { %v1024_v58 = vld [vmem:[#allocation8 + $0x3b0] sm:$0xff] }
 0x274   :  { %v1148_v59 = vld [vmem:[#allocation8 + $0x790] sm:$0xff] }
 0x275   :  { %2594 = vmatpush2.bf16.msra.mxu1 %v9361_v13  ;;  %2635 = vmatpush2.bf16.msra.mxu0 %v9489_v14  ;;  %v1064_v13 = vld [vmem:[#allocation8 + $0x4f0] sm:$0xff]  ;;  %v9307_v14 = vcombine.low %v940_v0, %v944_v1 }
 0x276   :  { %2595 = vmatprep.subr.bf16.mxu1 %v9354_v15  ;;  %2636 = vmatprep.subr.bf16.mxu0 %v9482_v16  ;;  %v9435_v15 = vcombine.low %v1068_v3, %v1072_v5  ;;  %v9300_v16 = vcombine.high %v932_v10, %v936_v11  ;;  %v9428_v17 = vcombine.high %v1060_v12, %v1064_v13  ;;  %v1012_v1 = vld [vmem:[#allocation8 + $0x350] sm:$0xff] }
 0x277   :  { %v1016_v3 = vld [vmem:[#allocation8 + $0x370] sm:$0xff] }
 0x278   :  { %v1140_v5 = vld [vmem:[#allocation8 + $0x750] sm:$0xff] }
 0x279   :  { %2596 = vmatpush2.bf16.msra.mxu1 %v9353_v21  ;;  %2637 = vmatpush2.bf16.msra.mxu0 %v9481_v22  ;;  %v1056_v21 = vld [vmem:[#allocation8 + $0x4b0] sm:$0xff]  ;;  %v9299_v22 = vcombine.low %v932_v10, %v936_v11 }
 0x27a   :  { %2597 = vmatprep.subr.bf16.mxu1 %v9346_v23  ;;  %2638 = vmatprep.subr.bf16.mxu0 %v9474_v24  ;;  %v9427_v23 = vcombine.low %v1060_v12, %v1064_v13  ;;  %v9292_v24 = vcombine.high %v924_v18, %v928_v19  ;;  %v9420_v25 = vcombine.high %v1052_v20, %v1056_v21  ;;  %v1004_v11 = vld [vmem:[#allocation8 + $0x310] sm:$0xff] }
 0x27b   :  { %v1008_v12 = vld [vmem:[#allocation8 + $0x330] sm:$0xff] }
 0x27c   :  { %v1132_v13 = vld [vmem:[#allocation8 + $0x710] sm:$0xff] }
 0x27d   :  { %2598 = vmatpush2.bf16.msra.mxu1 %v9345_v33  ;;  %2639 = vmatpush2.bf16.msra.mxu0 %v9473_v34  ;;  %v1048_v33 = vld [vmem:[#allocation8 + $0x470] sm:$0xff]  ;;  %v9291_v34 = vcombine.low %v924_v18, %v928_v19 }
 0x27e   :  { %2599 = vmatprep.subr.bf16.mxu1 %v9338_v35  ;;  %2640 = vmatprep.subr.bf16.mxu0 %v9466_v36  ;;  %v9419_v35 = vcombine.low %v1052_v20, %v1056_v21  ;;  %v9284_v36 = vcombine.high %v916_v26, %v920_v27  ;;  %v9412_v37 = vcombine.high %v1044_v28, %v1048_v33  ;;  %v996_v19 = vld [vmem:[#allocation8 + $0x2d0] sm:$0xff] }
 0x27f   :  { %v1000_v20 = vld [vmem:[#allocation8 + $0x2f0] sm:$0xff] }
 0x280   :  { %v1124_v21 = vld [vmem:[#allocation8 + $0x6d0] sm:$0xff] }
 0x281   :  { %2600 = vmatpush2.bf16.msra.mxu1 %v9337_v41  ;;  %2641 = vmatpush2.bf16.msra.mxu0 %v9465_v42  ;;  %v1040_v41 = vld [vmem:[#allocation8 + $0x430] sm:$0xff]  ;;  %v9283_v42 = vcombine.low %v916_v26, %v920_v27 }
 0x282   :  { %2651 = vmatprep.subr.bf16.mxu1 %v9332_v43  ;;  %2692 = vmatprep.subr.bf16.mxu0 %v9460_v46  ;;  %v9411_v43 = vcombine.low %v1044_v28, %v1048_v33  ;;  %v9276_v46 = vcombine.high %v908_v38, %v912_v39  ;;  %v9404_v48 = vcombine.high %v1036_v40, %v1040_v41  ;;  %v988_v27 = vld [vmem:[#allocation8 + $0x290] sm:$0xff] }
 0x283   :  { %v992_v28 = vld [vmem:[#allocation8 + $0x2b0] sm:$0xff] }
 0x284   :  { %2602 = vmatmul.mubr.bf16.vlgmr.msra.gmra.mxu1 %v11412_v31  ;;  %2643 = vmatmul.mubr.bf16.vlgmr.msra.gmra.mxu0 %v11414_v32  ;;  %v1116_v33 = vld [vmem:[#allocation8 + $0x690] sm:$0xff] }
 0x285   :  { %2652 = vmatpush1.bf16.msra.mxu1 %v9331_v52  ;;  %2683 = vmatprep.mubr.bf16.mxu1 %v11408_v29  ;;  %v1160_v52 = vld [vmem:[#allocation8 + $0x7f0] sm:$0xff] }
 0x286   :  { %2693 = vmatpush1.bf16.msra.mxu0 %v9459_v53  ;;  %2724 = vmatprep.mubr.bf16.mxu0 %v11410_v30  ;;  %v9275_v53 = vcombine.low %v908_v38, %v912_v39  ;;  %v9524_v56 = vcombine.high %v1156_v51, %v1160_v52  ;;  %v980_v39 = vld [vmem:[#allocation8 + $0x250] sm:$0xff] }
 0x287   :  { %2653 = vmatprep.subr.bf16.mxu1 %v9324_v54  ;;  %2694 = vmatprep.subr.bf16.mxu0 %v9452_v55  ;;  %v9403_v54 = vcombine.low %v1036_v40, %v1040_v41  ;;  %v9396_v55 = vcombine.high %v1028_v49, %v1032_v50  ;;  %v984_v40 = vld [vmem:[#allocation8 + $0x270] sm:$0xff] }
 0x288   :  { %v1108_v41 = vld [vmem:[#allocation8 + $0x650] sm:$0xff] }
 0x289   :  { %2654 = vmatpush1.bf16.msra.mxu1 %v9323_v60  ;;  %v1152_v60 = vld [vmem:[#allocation8 + $0x7b0] sm:$0xff] }
 0x28a   :  { %2695 = vmatpush1.bf16.msra.mxu0 %v9451_v61  ;;  %2655 = vmatprep.subr.bf16.mxu1 %v9316_v62  ;;  %v9395_v61 = vcombine.low %v1028_v49, %v1032_v50  ;;  %v9523_v62 = vcombine.low %v1156_v51, %v1160_v52  ;;  %v9516_v0 = vcombine.high %v1148_v59, %v1152_v60  ;;  %v972_v50 = vld [vmem:[#allocation8 + $0x210] sm:$0xff] }
 0x28b   :  { %2696 = vmatprep.subr.bf16.mxu0 %v9444_v63  ;;  %v9388_v63 = vcombine.high %v1020_v57, %v1024_v58  ;;  %v976_v51 = vld [vmem:[#allocation8 + $0x230] sm:$0xff] }
 0x28c   :  { %v1100_v52 = vld [vmem:[#allocation8 + $0x610] sm:$0xff] }
 0x28d   :  { %2656 = vmatpush1.bf16.msra.mxu1 %v9315_v6  ;;  %v1144_v6 = vld [vmem:[#allocation8 + $0x770] sm:$0xff] }
 0x28e   :  { %2697 = vmatpush1.bf16.msra.mxu0 %v9443_v7  ;;  %2657 = vmatprep.subr.bf16.mxu1 %v9308_v8  ;;  %v9387_v7 = vcombine.low %v1020_v57, %v1024_v58  ;;  %v9515_v8 = vcombine.low %v1148_v59, %v1152_v60  ;;  %v9508_v10 = vcombine.high %v1140_v5, %v1144_v6  ;;  %v965_v58 = vld [vmem:[#allocation8 + $0x1d8] sm:$0xff] }
 0x28f   :  { %2698 = vmatprep.subr.bf16.mxu0 %v9436_v9  ;;  %v9380_v9 = vcombine.high %v1012_v1, %v1016_v3  ;;  %v969_v59 = vld [vmem:[#allocation8 + $0x1f8] sm:$0xff] }
 0x290   :  { %v1093_v60 = vld [vmem:[#allocation8 + $0x5d8] sm:$0xff] }
 0x291   :  { %2658 = vmatpush1.bf16.msra.mxu1 %v9307_v14  ;;  %v1136_v14 = vld [vmem:[#allocation8 + $0x730] sm:$0xff] }
 0x292   :  { %2699 = vmatpush1.bf16.msra.mxu0 %v9435_v15  ;;  %2659 = vmatprep.subr.bf16.mxu1 %v9300_v16  ;;  %v9379_v15 = vcombine.low %v1012_v1, %v1016_v3  ;;  %v9507_v16 = vcombine.low %v1140_v5, %v1144_v6  ;;  %v9500_v18 = vcombine.high %v1132_v13, %v1136_v14  ;;  %v957_v3 = vld [vmem:[#allocation8 + $0x198] sm:$0xff] }
 0x293   :  { %2700 = vmatprep.subr.bf16.mxu0 %v9428_v17  ;;  %v9372_v17 = vcombine.high %v1004_v11, %v1008_v12  ;;  %v961_v5 = vld [vmem:[#allocation8 + $0x1b8] sm:$0xff]  ;;  %v9333_v6 = vcombine.low %v965_v58, %v969_v59 }
 0x295   :  { %2660 = vmatpush1.bf16.msra.mxu1 %v9299_v22  ;;  %v1128_v22 = vld [vmem:[#allocation8 + $0x6f0] sm:$0xff] }
 0x296   :  { %2701 = vmatpush1.bf16.msra.mxu0 %v9427_v23  ;;  %2661 = vmatprep.subr.bf16.mxu1 %v9292_v24  ;;  %v9371_v23 = vcombine.low %v1004_v11, %v1008_v12  ;;  %v9499_v24 = vcombine.low %v1132_v13, %v1136_v14  ;;  %v9492_v26 = vcombine.high %v1124_v21, %v1128_v22  ;;  %v949_v11 = vld [vmem:[#allocation8 + $0x158] sm:$0xff] }
 0x297   :  { %2702 = vmatprep.subr.bf16.mxu0 %v9420_v25  ;;  %v9364_v25 = vcombine.high %v996_v19, %v1000_v20  ;;  %v953_v12 = vld [vmem:[#allocation8 + $0x178] sm:$0xff] }
 0x298   :  { %v1077_v14 = vld [vmem:[#allocation8 + $0x558] sm:$0xff] }
 0x299   :  { %2662 = vmatpush1.bf16.msra.mxu1 %v9291_v34  ;;  %v1120_v34 = vld [vmem:[#allocation8 + $0x6b0] sm:$0xff] }
 0x29a   :  { %2703 = vmatpush1.bf16.msra.mxu0 %v9419_v35  ;;  %2663 = vmatprep.subr.bf16.mxu1 %v9284_v36  ;;  %v9363_v35 = vcombine.low %v996_v19, %v1000_v20  ;;  %v9491_v36 = vcombine.low %v1124_v21, %v1128_v22  ;;  %v9484_v38 = vcombine.high %v1116_v33, %v1120_v34  ;;  %v941_v20 = vld [vmem:[#allocation8 + $0x118] sm:$0xff] }
 0x29b   :  { %2704 = vmatprep.subr.bf16.mxu0 %v9412_v37  ;;  %v9356_v37 = vcombine.high %v988_v27, %v992_v28  ;;  %v945_v21 = vld [vmem:[#allocation8 + $0x138] sm:$0xff] }
 0x29c   :  { %v1069_v22 = vld [vmem:[#allocation8 + $0x518] sm:$0xff] }
 0x29d   :  { %2664 = vmatpush1.bf16.msra.mxu1 %v9283_v42  ;;  %v1112_v42 = vld [vmem:[#allocation8 + $0x670] sm:$0xff] }
 0x29e   :  { %2705 = vmatpush1.bf16.msra.mxu0 %v9411_v43  ;;  %2665 = vmatprep.subr.bf16.mxu1 %v9276_v46  ;;  %v9355_v43 = vcombine.low %v988_v27, %v992_v28  ;;  %v9483_v46 = vcombine.low %v1116_v33, %v1120_v34  ;;  %v9476_v49 = vcombine.high %v1108_v41, %v1112_v42  ;;  %v933_v27 = vld [vmem:[#allocation8 + $0xd8] sm:$0xff] }
 0x29f   :  { %2706 = vmatprep.subr.bf16.mxu0 %v9404_v48  ;;  %v9348_v48 = vcombine.high %v980_v39, %v984_v40  ;;  %v937_v28 = vld [vmem:[#allocation8 + $0xf8] sm:$0xff] }
 0x2a0   :  { %v1061_v33 = vld [vmem:[#allocation8 + $0x4d8] sm:$0xff] }
 0x2a1   :  { %2666 = vmatpush1.bf16.msra.mxu1 %v9275_v53  ;;  %v1104_v53 = vld [vmem:[#allocation8 + $0x630] sm:$0xff]  ;;  %v1065_v34 = vld [vmem:[#allocation8 + $0x4f8] sm:$0xff] }
 0x2a2   :  { %2707 = vmatpush1.bf16.msra.mxu0 %v9403_v54  ;;  %2667 = vmatprep.subr.bf16.mxu1 %v9396_v55  ;;  %v9347_v54 = vcombine.low %v980_v39, %v984_v40  ;;  %v9475_v55 = vcombine.low %v1108_v41, %v1112_v42  ;;  %v9468_v57 = vcombine.high %v1100_v52, %v1104_v53  ;;  %v929_v39 = vld [vmem:[#allocation8 + $0xb8] sm:$0xff] }
 0x2a3   :  { %2708 = vmatprep.subr.bf16.mxu0 %v9524_v56  ;;  %v9340_v56 = vcombine.high %v972_v50, %v976_v51  ;;  %v1053_v40 = vld [vmem:[#allocation8 + $0x498] sm:$0xff]  ;;  %v9301_v42 = vcombine.low %v933_v27, %v937_v28 }
 0x2a4   :  { %v1057_v41 = vld [vmem:[#allocation8 + $0x4b8] sm:$0xff] }
 0x2a5   :  { %2668 = vmatpush2.bf16.msra.mxu1 %v9395_v61  ;;  %v1097_v61 = vld [vmem:[#allocation8 + $0x5f8] sm:$0xff] }
 0x2a6   :  { %2709 = vmatpush2.bf16.msra.mxu0 %v9523_v62  ;;  %2669 = vmatprep.subr.bf16.mxu1 %v9388_v63  ;;  %v9339_v62 = vcombine.low %v972_v50, %v976_v51  ;;  %v9467_v63 = vcombine.low %v1100_v52, %v1104_v53  ;;  %v9462_v1 = vcombine.high %v1093_v60, %v1097_v61  ;;  %v921_v50 = vld [vmem:[#allocation8 + $0x78] sm:$0xff] }
 0x2a7   :  { %2710 = vmatprep.subr.bf16.mxu0 %v9516_v0  ;;  %v9334_v0 = vcombine.high %v965_v58, %v969_v59  ;;  %v1045_v51 = vld [vmem:[#allocation8 + $0x458] sm:$0xff] }
 0x2a8   :  { %v1049_v52 = vld [vmem:[#allocation8 + $0x478] sm:$0xff] }
 0x2a9   :  { %2670 = vmatpush2.bf16.msra.mxu1 %v9387_v7  ;;  %v1085_v7 = vld [vmem:[#allocation8 + $0x598] sm:$0xff] }
 0x2aa   :  { %2711 = vmatpush2.bf16.msra.mxu0 %v9515_v8  ;;  %2671 = vmatprep.subr.bf16.mxu1 %v9380_v9  ;;  %v1089_v8 = vld [vmem:[#allocation8 + $0x5b8] sm:$0xff]  ;;  %v9461_v9 = vcombine.low %v1093_v60, %v1097_v61 }
 0x2ab   :  { %2712 = vmatprep.subr.bf16.mxu0 %v9508_v10  ;;  %v9326_v10 = vcombine.high %v957_v3, %v961_v5  ;;  %v9454_v13 = vcombine.high %v1085_v7, %v1089_v8  ;;  %v913_v58 = vld [vmem:[#allocation8 + $0x38] sm:$0xff] }
 0x2ac   :  { %v1037_v59 = vld [vmem:[#allocation8 + $0x418] sm:$0xff] }
 0x2ad   :  { %2672 = vmatpush2.bf16.msra.mxu1 %v9379_v15  ;;  %v1081_v15 = vld [vmem:[#allocation8 + $0x578] sm:$0xff] }
 0x2ae   :  { %2713 = vmatpush2.bf16.msra.mxu0 %v9507_v16  ;;  %2673 = vmatprep.subr.bf16.mxu1 %v9372_v17  ;;  %v9325_v16 = vcombine.low %v957_v3, %v961_v5  ;;  %v9453_v17 = vcombine.low %v1085_v7, %v1089_v8  ;;  %v9446_v19 = vcombine.high %v1077_v14, %v1081_v15  ;;  %v1041_v60 = vld [vmem:[#allocation8 + $0x438] sm:$0xff] }
 0x2af   :  { %2714 = vmatprep.subr.bf16.mxu0 %v9500_v18  ;;  %v9318_v18 = vcombine.high %v949_v11, %v953_v12  ;;  %v1033_v3 = vld [vmem:[#allocation8 + $0x3f8] sm:$0xff]  ;;  %v9405_v8 = vcombine.low %v1037_v59, %v1041_v60 }
 0x2b0   :  { %v1157_v5 = vld [vmem:[#allocation8 + $0x7d8] sm:$0xff] }
 0x2b1   :  { %2674 = vmatpush2.bf16.msra.mxu1 %v9371_v23  ;;  %v1073_v23 = vld [vmem:[#allocation8 + $0x538] sm:$0xff] }
 0x2b2   :  { %2715 = vmatpush2.bf16.msra.mxu0 %v9499_v24  ;;  %2675 = vmatprep.subr.bf16.mxu1 %v9364_v25  ;;  %v9317_v24 = vcombine.low %v949_v11, %v953_v12  ;;  %v9445_v25 = vcombine.low %v1077_v14, %v1081_v15  ;;  %v1021_v11 = vld [vmem:[#allocation8 + $0x398] sm:$0xff] }
 0x2b3   :  { %2716 = vmatprep.subr.bf16.mxu0 %v9492_v26  ;;  %v9310_v26 = vcombine.high %v941_v20, %v945_v21  ;;  %v1025_v12 = vld [vmem:[#allocation8 + $0x3b8] sm:$0xff] }
 0x2b4   :  { %v1153_v14 = vld [vmem:[#allocation8 + $0x7b8] sm:$0xff] }
 0x2b5   :  { %2676 = vmatpush2.bf16.msra.mxu1 %v9363_v35  ;;  %v9437_v35 = vcombine.low %v1069_v22, %v1073_v23 }
 0x2b6   :  { %2717 = vmatpush2.bf16.msra.mxu0 %v9491_v36  ;;  %2677 = vmatprep.subr.bf16.mxu1 %v9356_v37  ;;  %v9302_v36 = vcombine.high %v933_v27, %v937_v28  ;;  %v9430_v37 = vcombine.high %v1061_v33, %v1065_v34  ;;  %v1009_v27 = vld [vmem:[#allocation8 + $0x338] sm:$0xff] }
 0x2b7   :  { %2718 = vmatprep.subr.bf16.mxu0 %v9484_v38  ;;  %v925_v38 = vld [vmem:[#allocation8 + $0x98] sm:$0xff] }
 0x2b8   :  { %v9293_v53 = vcombine.low %v925_v38, %v929_v39  ;;  %v1133_v28 = vld [vmem:[#allocation8 + $0x718] sm:$0xff] }
 0x2b9   :  { %2678 = vmatpush2.bf16.msra.mxu1 %v9355_v43  ;;  %v9429_v43 = vcombine.low %v1061_v33, %v1065_v34  ;;  %v1137_v33 = vld [vmem:[#allocation8 + $0x738] sm:$0xff] }
 0x2ba   :  { %2719 = vmatpush2.bf16.msra.mxu0 %v9483_v46  ;;  %2679 = vmatprep.subr.bf16.mxu1 %v9348_v48  ;;  %v9294_v46 = vcombine.high %v925_v38, %v929_v39  ;;  %v9422_v48 = vcombine.high %v1053_v40, %v1057_v41  ;;  %v1001_v38 = vld [vmem:[#allocation8 + $0x2f8] sm:$0xff] }
 0x2bb   :  { %2720 = vmatprep.subr.bf16.mxu0 %v9476_v49  ;;  %v917_v49 = vld [vmem:[#allocation8 + $0x58] sm:$0xff] }
 0x2bc   :  { %v9285_v61 = vcombine.low %v917_v49, %v921_v50  ;;  %v1125_v39 = vld [vmem:[#allocation8 + $0x6d8] sm:$0xff] }
 0x2bd   :  { %2680 = vmatpush2.bf16.msra.mxu1 %v9347_v54  ;;  %v9421_v54 = vcombine.low %v1053_v40, %v1057_v41  ;;  %v1129_v40 = vld [vmem:[#allocation8 + $0x6f8] sm:$0xff] }
 0x2be   :  { %2721 = vmatpush2.bf16.msra.mxu0 %v9475_v55  ;;  %2681 = vmatprep.subr.bf16.mxu1 %v9340_v56  ;;  %v9286_v55 = vcombine.high %v917_v49, %v921_v50  ;;  %v9414_v56 = vcombine.high %v1045_v51, %v1049_v52  ;;  %v993_v49 = vld [vmem:[#allocation8 + $0x2b8] sm:$0xff] }
 0x2bf   :  { %2722 = vmatprep.subr.bf16.mxu0 %v9468_v57  ;;  %v909_v57 = vld [vmem:[#allocation8 + $0x18] sm:$0xff] }
 0x2c0   :  { %v9277_v7 = vcombine.low %v909_v57, %v913_v58  ;;  %v1117_v50 = vld [vmem:[#allocation8 + $0x698] sm:$0xff] }
 0x2c1   :  { %2682 = vmatpush2.bf16.msra.mxu1 %v9339_v62  ;;  %v9413_v62 = vcombine.low %v1045_v51, %v1049_v52  ;;  %v1121_v51 = vld [vmem:[#allocation8 + $0x6b8] sm:$0xff] }
 0x2c2   :  { %2723 = vmatpush2.bf16.msra.mxu0 %v9467_v63  ;;  %2733 = vmatprep.subr.bf16.mxu1 %v9334_v0  ;;  %v9278_v63 = vcombine.high %v909_v57, %v913_v58  ;;  %v9406_v0 = vcombine.high %v1037_v59, %v1041_v60  ;;  %v985_v57 = vld [vmem:[#allocation8 + $0x278] sm:$0xff] }
 0x2c3   :  { %2774 = vmatprep.subr.bf16.mxu0 %v9462_v1  ;;  %v1029_v1 = vld [vmem:[#allocation8 + $0x3d8] sm:$0xff] }
 0x2c4   :  { %2684 = vmatmul.mubr.bf16.vlgmr.msra.gmra.mxu1 %v11412_v31  ;;  %v9397_v15 = vcombine.low %v1029_v1, %v1033_v3  ;;  %v1109_v58 = vld [vmem:[#allocation8 + $0x658] sm:$0xff] }
 0x2c5   :  { %2725 = vmatmul.mubr.bf16.vlgmr.msra.gmra.mxu0 %v11414_v32  ;;  %2734 = vmatpush1.bf16.msra.mxu1 %v9333_v6  ;;  %v1161_v6 = vld [vmem:[#allocation8 + $0x7f8] sm:$0xff] }
 0x2c6   :  { %2765 = vmatprep.mubr.bf16.mxu1 %v11408_v29  ;;  %2775 = vmatpush1.bf16.msra.mxu0 %v9461_v9  ;;  %v9438_v29 = vcombine.high %v1069_v22, %v1073_v23  ;;  %v9398_v9 = vcombine.high %v1029_v1, %v1033_v3  ;;  %v1145_v22 = vld [vmem:[#allocation8 + $0x778] sm:$0xff]  ;;  %v9389_v23 = vcombine.low %v1021_v11, %v1025_v12 }
 0x2c7   :  { %2806 = vmatprep.mubr.bf16.mxu0 %v11410_v30  ;;  %2735 = vmatprep.subr.bf16.mxu1 %v9326_v10  ;;  %v9309_v30 = vcombine.low %v941_v20, %v945_v21  ;;  %v9526_v10 = vcombine.high %v1157_v5, %v1161_v6  ;;  %v1017_v20 = vld [vmem:[#allocation8 + $0x378] sm:$0xff] }
 0x2c8   :  { %2776 = vmatprep.subr.bf16.mxu0 %v9454_v13  ;;  %v1149_v13 = vld [vmem:[#allocation8 + $0x798] sm:$0xff] }
 0x2c9   :  { %2736 = vmatpush1.bf16.msra.mxu1 %v9325_v16  ;;  %v9525_v16 = vcombine.low %v1157_v5, %v1161_v6  ;;  %v1141_v21 = vld [vmem:[#allocation8 + $0x758] sm:$0xff] }
 0x2ca   :  { %2777 = vmatpush1.bf16.msra.mxu0 %v9453_v17  ;;  %2737 = vmatprep.subr.bf16.mxu1 %v9318_v18  ;;  %v9390_v17 = vcombine.high %v1021_v11, %v1025_v12  ;;  %v9518_v18 = vcombine.high %v1149_v13, %v1153_v14  ;;  %v1113_v59 = vld [vmem:[#allocation8 + $0x678] sm:$0xff]  ;;  %v2891_v11 = vld [vmem:[#allocation10 + $0x1e0] sm:$0xff] }
 0x2cb   :  { %2778 = vmatprep.subr.bf16.mxu0 %v9446_v19  ;;  %v1013_v19 = vld [vmem:[#allocation8 + $0x358] sm:$0xff]  ;;  %v3015_v12 = vld [vmem:[#allocation10 + $0x5c0] sm:$0xff] }
 0x2cc   :  { %v9381_v34 = vcombine.low %v1013_v19, %v1017_v20  ;;  %v977_v1 = vld [vmem:[#allocation8 + $0x238] sm:$0xff] }
 0x2cd   :  { %2738 = vmatpush1.bf16.msra.mxu1 %v9317_v24  ;;  %v9517_v24 = vcombine.low %v1149_v13, %v1153_v14  ;;  %v1101_v3 = vld [vmem:[#allocation8 + $0x618] sm:$0xff]  ;;  %v3019_v13 = vld [vmem:[#allocation10 + $0x5e0] sm:$0xff] }
 0x2ce   :  { %2779 = vmatpush1.bf16.msra.mxu0 %v9445_v25  ;;  %2739 = vmatprep.subr.bf16.mxu1 %v9310_v26  ;;  %v9382_v25 = vcombine.high %v1013_v19, %v1017_v20  ;;  %v9510_v26 = vcombine.high %v1141_v21, %v1145_v22  ;;  %v1105_v5 = vld [vmem:[#allocation8 + $0x638] sm:$0xff]  ;;  %v2879_v19 = vld [vmem:[#allocation10 + $0x180] sm:$0xff] }
 0x2cf   :  { %2780 = vmatprep.subr.bf16.mxu0 %v9438_v29  ;;  %v1005_v29 = vld [vmem:[#allocation8 + $0x318] sm:$0xff]  ;;  %v2883_v20 = vld [vmem:[#allocation10 + $0x1a0] sm:$0xff] }
 0x2d0   :  { %v9373_v41 = vcombine.low %v1005_v29, %v1009_v27 }
 0x2d1   :  { %2740 = vmatpush1.bf16.msra.mxu1 %v9309_v30  ;;  %v9509_v30 = vcombine.low %v1141_v21, %v1145_v22  ;;  %v9712_v21 = vcombine.high %v3015_v12, %v3019_v13  ;;  %v3007_v22 = vld [vmem:[#allocation10 + $0x580] sm:$0xff] }
 0x2d2   :  { %2781 = vmatpush1.bf16.msra.mxu0 %v9437_v35  ;;  %2741 = vmatprep.subr.bf16.mxu1 %v9302_v36  ;;  %v9374_v35 = vcombine.high %v1005_v29, %v1009_v27  ;;  %v9502_v36 = vcombine.high %v1133_v28, %v1137_v33  ;;  %v9711_v29 = vcombine.low %v3015_v12, %v3019_v13 }
 0x2d3   :  { %2782 = vmatprep.subr.bf16.mxu0 %v9430_v37  ;;  %v997_v37 = vld [vmem:[#allocation8 + $0x2d8] sm:$0xff] }
 0x2d4   :  { %v9365_v52 = vcombine.low %v997_v37, %v1001_v38 }
 0x2d5   :  { %2742 = vmatpush1.bf16.msra.mxu1 %v9301_v42  ;;  %v9501_v42 = vcombine.low %v1133_v28, %v1137_v33  ;;  %v2871_v28 = vld [vmem:[#allocation10 + $0x140] sm:$0xff] }
 0x2d6   :  { %2783 = vmatpush1.bf16.msra.mxu0 %v9429_v43  ;;  %2743 = vmatprep.subr.bf16.mxu1 %v9294_v46  ;;  %v9366_v43 = vcombine.high %v997_v37, %v1001_v38  ;;  %v9494_v46 = vcombine.high %v1125_v39, %v1129_v40  ;;  %v2875_v33 = vld [vmem:[#allocation10 + $0x160] sm:$0xff]  ;;  %v9575_v38 = vcombine.low %v2879_v19, %v2883_v20 }
 0x2d7   :  { %2784 = vmatprep.subr.bf16.mxu0 %v9422_v48  ;;  %v989_v48 = vld [vmem:[#allocation8 + $0x298] sm:$0xff]  ;;  %v3003_v37 = vld [vmem:[#allocation10 + $0x560] sm:$0xff] }
 0x2d8   :  { %v9357_v60 = vcombine.low %v989_v48, %v993_v49 }
 0x2d9   :  { %2744 = vmatpush1.bf16.msra.mxu1 %v9293_v53  ;;  %v9493_v53 = vcombine.low %v1125_v39, %v1129_v40 }
 0x2da   :  { %2785 = vmatpush1.bf16.msra.mxu0 %v9421_v54  ;;  %2745 = vmatprep.subr.bf16.mxu1 %v9286_v55  ;;  %v9358_v54 = vcombine.high %v989_v48, %v993_v49  ;;  %v9486_v55 = vcombine.high %v1117_v50, %v1121_v51  ;;  %v2867_v48 = vld [vmem:[#allocation10 + $0x120] sm:$0xff] }
 0x2db   :  { %2786 = vmatprep.subr.bf16.mxu0 %v9414_v56  ;;  %v981_v56 = vld [vmem:[#allocation8 + $0x258] sm:$0xff] }
 0x2dc   :  { %v9349_v6 = vcombine.low %v981_v56, %v985_v57 }
 0x2dd   :  { %2746 = vmatpush1.bf16.msra.mxu1 %v9285_v61  ;;  %v9485_v61 = vcombine.low %v1117_v50, %v1121_v51  ;;  %v2991_v51 = vld [vmem:[#allocation10 + $0x500] sm:$0xff] }
 0x2de   :  { %2787 = vmatpush1.bf16.msra.mxu0 %v9413_v62  ;;  %2747 = vmatprep.subr.bf16.mxu1 %v9278_v63  ;;  %v9350_v62 = vcombine.high %v981_v56, %v985_v57  ;;  %v9478_v63 = vcombine.high %v1109_v58, %v1113_v59 }
 0x2df   :  { %2788 = vmatprep.subr.bf16.mxu0 %v9406_v0  ;;  %v973_v0 = vld [vmem:[#allocation8 + $0x218] sm:$0xff] }
 0x2e0   :  { %v9341_v14 = vcombine.low %v973_v0, %v977_v1 }
 0x2e1   :  { %2748 = vmatpush1.bf16.msra.mxu1 %v9277_v7  ;;  %v9477_v7 = vcombine.low %v1109_v58, %v1113_v59  ;;  %v2855_v59 = vld [vmem:[#allocation10 + $0xc0] sm:$0xff] }
 0x2e2   :  { %2789 = vmatpush1.bf16.msra.mxu0 %v9405_v8  ;;  %2749 = vmatprep.subr.bf16.mxu1 %v9398_v9  ;;  %v9342_v8 = vcombine.high %v973_v0, %v977_v1  ;;  %v9470_v9 = vcombine.high %v1101_v3, %v1105_v5 }
 0x2e3   :  { %2790 = vmatprep.subr.bf16.mxu0 %v9526_v10  ;;  %v2887_v10 = vld [vmem:[#allocation10 + $0x1c0] sm:$0xff] }
 0x2e5   :  { %2750 = vmatpush2.bf16.msra.mxu1 %v9397_v15  ;;  %v9469_v15 = vcombine.low %v1101_v3, %v1105_v5 }
 0x2e6   :  { %2791 = vmatpush2.bf16.msra.mxu0 %v9525_v16  ;;  %2751 = vmatprep.subr.bf16.mxu1 %v9390_v17  ;;  %v9584_v16 = vcombine.high %v2887_v10, %v2891_v11  ;;  %v1163_v17 = vld [vmem:[#allocation16 + $0x2] ss:$8 sm:$0xf] }
 0x2e7   :  { %2792 = vmatprep.subr.bf16.mxu0 %v9518_v18  ;;  %v1164_v18 = vld [vmem:[#allocation16 + $0x2] ss:$8 sm:$0xf0] }
 0x2e9   :  { %2752 = vmatpush2.bf16.msra.mxu1 %v9389_v23  ;;  %v3011_v23 = vld [vmem:[#allocation10 + $0x5a0] sm:$0xff] }
 0x2ea   :  { %2793 = vmatpush2.bf16.msra.mxu0 %v9517_v24  ;;  %2753 = vmatprep.subr.bf16.mxu1 %v9382_v25  ;;  %v9583_v24 = vcombine.low %v2887_v10, %v2891_v11  ;;  %v11430_v25 = vor.u32 %v1164_v18, %v1163_v17  ;;  %v2979_v10 = vld [vmem:[#allocation10 + $0x4a0] sm:$0xff] }
 0x2eb   :  { %2794 = vmatprep.subr.bf16.mxu0 %v9510_v26  ;;  %v9576_v26 = vcombine.high %v2879_v19, %v2883_v20  ;;  %v2967_v17 = vld [vmem:[#allocation10 + $0x440] sm:$0xff] }
 0x2ec   :  { %v1174_v27 = vrot.slane %v11430_v25, %v11394_v47  ;;  %v2971_v18 = vld [vmem:[#allocation10 + $0x460] sm:$0xff] }
 0x2ed   :  { %2754 = vmatpush2.bf16.msra.mxu1 %v9381_v34  ;;  %v9704_v34 = vcombine.high %v3007_v22, %v3011_v23 }
 0x2ee   :  { %2795 = vmatpush2.bf16.msra.mxu0 %v9509_v30  ;;  %2755 = vmatprep.subr.bf16.mxu1 %v9374_v35 }
 0x2ef   :  { %2796 = vmatprep.subr.bf16.mxu0 %v9502_v36  ;;  %v2999_v36 = vld [vmem:[#allocation10 + $0x540] sm:$0xff] }
 0x2f0   :  { %v9695_v57 = vcombine.low %v2999_v36, %v3003_v37 }
 0x2f1   :  { %2756 = vmatpush2.bf16.msra.mxu1 %v9373_v41  ;;  %v9568_v41 = vcombine.high %v2871_v28, %v2875_v33 }
 0x2f2   :  { %2797 = vmatpush2.bf16.msra.mxu0 %v9501_v42  ;;  %2757 = vmatprep.subr.bf16.mxu1 %v9366_v43  ;;  %v9703_v42 = vcombine.low %v3007_v22, %v3011_v23  ;;  %v2831_v22 = vld [vmem:[#allocation10] sm:$0xff] }
 0x2f3   :  { %2798 = vmatprep.subr.bf16.mxu0 %v9494_v46  ;;  %v2863_v46 = vld [vmem:[#allocation10 + $0x100] sm:$0xff] }
 0x2f4   :  { %v9560_v56 = vcombine.high %v2863_v46, %v2867_v48  ;;  %v9559_v1 = vcombine.low %v2863_v46, %v2867_v48  ;;  %v2835_v23 = vld [vmem:[#allocation10 + $0x20] sm:$0xff] }
 0x2f5   :  { %2758 = vmatpush2.bf16.msra.mxu1 %v9365_v52  ;;  %v2995_v52 = vld [vmem:[#allocation10 + $0x520] sm:$0xff] }
 0x2f6   :  { %2799 = vmatpush2.bf16.msra.mxu0 %v9493_v53  ;;  %2759 = vmatprep.subr.bf16.mxu1 %v9358_v54  ;;  %v9687_v5 = vcombine.low %v2991_v51, %v2995_v52  ;;  %v2947_v46 = vld [vmem:[#allocation10 + $0x3a0] sm:$0xff] }
 0x2f7   :  { %2800 = vmatprep.subr.bf16.mxu0 %v9486_v55 }
 0x2f9   :  { %2760 = vmatpush2.bf16.msra.mxu1 %v9357_v60  ;;  %v2859_v60 = vld [vmem:[#allocation10 + $0xe0] sm:$0xff] }
 0x2fa   :  { %2801 = vmatpush2.bf16.msra.mxu0 %v9485_v61  ;;  %2761 = vmatprep.subr.bf16.mxu1 %v9350_v62  ;;  %v9688_v61 = vcombine.high %v2991_v51, %v2995_v52  ;;  %v2983_v62 = vld [vmem:[#allocation10 + $0x4c0] sm:$0xff]  ;;  %v9552_v3 = vcombine.high %v2855_v59, %v2859_v60  ;;  %v9551_v11 = vcombine.low %v2855_v59, %v2859_v60 }
 0x2fb   :  { %2802 = vmatprep.subr.bf16.mxu0 %v9478_v63  ;;  %v2987_v63 = vld [vmem:[#allocation10 + $0x4e0] sm:$0xff] }
 0x2fc   :  { %v9679_v13 = vcombine.low %v2983_v62, %v2987_v63  ;;  %v2927_v60 = vld [vmem:[#allocation10 + $0x300] sm:$0xff] }
 0x2fd   :  { %2762 = vmatpush2.bf16.msra.mxu1 %v9349_v6  ;;  %v2847_v6 = vld [vmem:[#allocation10 + $0x80] sm:$0xff] }
 0x2fe   :  { %2803 = vmatpush2.bf16.msra.mxu0 %v9477_v7  ;;  %2763 = vmatprep.subr.bf16.mxu1 %v9342_v8  ;;  %v2851_v7 = vld [vmem:[#allocation10 + $0xa0] sm:$0xff]  ;;  %v9680_v8 = vcombine.high %v2983_v62, %v2987_v63 }
 0x2ff   :  { %2804 = vmatprep.subr.bf16.mxu0 %v9470_v9  ;;  %v2975_v9 = vld [vmem:[#allocation10 + $0x480] sm:$0xff]  ;;  %v9544_v12 = vcombine.high %v2847_v6, %v2851_v7  ;;  %v9543_v19 = vcombine.low %v2847_v6, %v2851_v7 }
 0x300   :  { %v3055_v63 = vld [vmem:[#allocation10 + $0x700] sm:$0xff] }
 0x301   :  { %2764 = vmatpush2.bf16.msra.mxu1 %v9341_v14  ;;  %v2839_v14 = vld [vmem:[#allocation10 + $0x40] sm:$0xff] }
 0x302   :  { %2805 = vmatpush2.bf16.msra.mxu0 %v9469_v15  ;;  %5948 = vmatprep.subr.bf16.mxu1 %v9584_v16  ;;  %v2843_v15 = vld [vmem:[#allocation10 + $0x60] sm:$0xff]  ;;  %v9672_v16 = vcombine.high %v2975_v9, %v2979_v10 }
 0x303   :  { %5989 = vmatprep.subr.bf16.mxu0 %v9712_v21  ;;  %v9536_v20 = vcombine.high %v2839_v14, %v2843_v15  ;;  %v9671_v21 = vcombine.low %v2975_v9, %v2979_v10  ;;  %v2919_v7 = vld [vmem:[#allocation10 + $0x2c0] sm:$0xff] }
 0x304   :  { %2766 = vmatmul.mubr.bf16.vlgmr.msra.gmra.mxu1 %v11412_v31  ;;  %v11435_v30 = vpop.f32.mrf.mxu1  ;;  %v11437_v35 = vpop.f32.mrf.mxu0  ;;  %v9696_v31 = vcombine.high %v2999_v36, %v3003_v37  ;;  %v2955_v36 = vld [vmem:[#allocation10 + $0x3e0] sm:$0xff] }
 0x305   :  { %2807 = vmatmul.mubr.bf16.vlgmr.msra.gmra.mxu0 %v11414_v32  ;;  %5949 = vmatpush1.bf16.msra.mxu1 %v9583_v24  ;;  %v9567_v32 = vcombine.low %v2871_v28, %v2875_v33  ;;  %v9664_v24 = vcombine.high %v2967_v17, %v2971_v18  ;;  %v9528_v28 = vcombine.high %v2831_v22, %v2835_v23  ;;  %v3047_v10 = vld [vmem:[#allocation10 + $0x6c0] sm:$0xff] }
 0x306   :  { %v2523_v39 = vpop.f32.mrf.mxu1  ;;  %v2564_v40 = vpop.f32.mrf.mxu0  ;;  %5950 = vmatprep.subr.bf16.mxu1 %v9576_v26  ;;  %5990 = vmatpush1.bf16.msra.mxu0 %v9711_v29  ;;  %v2959_v26 = vld [vmem:[#allocation10 + $0x400] sm:$0xff]  ;;  %v9663_v33 = vcombine.low %v2967_v17, %v2971_v18 }
 0x307   :  { %v2524_v43 = vadd.f32 %v2523_v39, %v1174_v27  ;;  %5991 = vmatprep.subr.bf16.mxu0 %v9704_v34  ;;  %v2963_v29 = vld [vmem:[#allocation10 + $0x420] sm:$0xff]  ;;  %v9535_v27 = vcombine.low %v2839_v14, %v2843_v15 }
 0x308   :  { %v2525_v49 = vpop.f32.mrf.mxu1  ;;  %v2566_v50 = vpop.f32.mrf.mxu0  ;;  %v2951_v34 = vld [vmem:[#allocation10 + $0x3c0] sm:$0xff]  ;;  %v9656_v37 = vcombine.high %v2959_v26, %v2963_v29 }
 0x309   :  { %v2565_v53 = vadd.f32 %v2564_v40, %v2524_v43  ;;  %5951 = vmatpush1.bf16.msra.mxu1 %v9575_v38  ;;  %v3079_v38 = vld [vmem:[#allocation10 + $0x7c0] sm:$0xff]  ;;  %v9527_v40 = vcombine.low %v2831_v22, %v2835_v23  ;;  %v9647_v50 = vcombine.low %v2951_v34, %v2955_v36 }
 0x30a   :  { %v2526_v54 = vpop.f32.mrf.mxu1  ;;  %v2567_v55 = vpop.f32.mrf.mxu0  ;;  %5952 = vmatprep.subr.bf16.mxu1 %v9568_v41  ;;  %5992 = vmatpush1.bf16.msra.mxu0 %v9703_v42  ;;  %v3083_v39 = vld [vmem:[#allocation10 + $0x7e0] sm:$0xff]  ;;  %v9648_v41 = vcombine.high %v2951_v34, %v2955_v36  ;;  %v9655_v42 = vcombine.low %v2959_v26, %v2963_v29 }
 0x30b   :  { %v2816_v58 = vmax.f32 %v2565_v53, 0.0  ;;  %5993 = vmatprep.subr.bf16.mxu0 %v9696_v31  ;;  %v2943_v43 = vld [vmem:[#allocation10 + $0x380] sm:$0xff]  ;;  %v9776_v48 = vcombine.high %v3079_v38, %v3083_v39  ;;  %v9775_v52 = vcombine.low %v3079_v38, %v3083_v39 }
 0x30c   :  { %v3071_v31 = vld [vmem:[#allocation10 + $0x780] sm:$0xff]  ;;  %v9640_v51 = vcombine.high %v2943_v43, %v2947_v46 }
 0x30d   :  { %v11440_v0 = vpack.c.bf16 %v2816_v58, %v2816_v58  ;;  %5953 = vmatpush1.bf16.msra.mxu1 %v9567_v32  ;;  %v3075_v49 = vld [vmem:[#allocation10 + $0x7a0] sm:$0xff] }
 0x30e   :  { %5954 = vmatprep.subr.bf16.mxu1 %v9560_v56  ;;  %5994 = vmatpush1.bf16.msra.mxu0 %v9695_v57  ;;  %v2935_v53 = vld [vmem:[#allocation10 + $0x340] sm:$0xff]  ;;  %v9768_v54 = vcombine.high %v3071_v31, %v3075_v49  ;;  %v9639_v57 = vcombine.low %v2943_v43, %v2947_v46  ;;  %v9767_v59 = vcombine.low %v3071_v31, %v3075_v49 }
 0x30f   :  { %5980 = vmatprep.mubr.bf16.mxu1 %v11440_v0  ;;  %5995 = vmatprep.subr.bf16.mxu0 %v9688_v61  ;;  %v2939_v32 = vld [vmem:[#allocation10 + $0x360] sm:$0xff] }
 0x310   :  { %v3063_v55 = vld [vmem:[#allocation10 + $0x740] sm:$0xff]  ;;  %v9632_v58 = vcombine.high %v2935_v53, %v2939_v32 }
 0x311   :  { %5955 = vmatpush1.bf16.msra.mxu1 %v9559_v1  ;;  %v3067_v56 = vld [vmem:[#allocation10 + $0x760] sm:$0xff] }
 0x312   :  { %5956 = vmatprep.subr.bf16.mxu1 %v9552_v3  ;;  %5996 = vmatpush1.bf16.msra.mxu0 %v9687_v5  ;;  %v2931_v61 = vld [vmem:[#allocation10 + $0x320] sm:$0xff]  ;;  %v9760_v62 = vcombine.high %v3063_v55, %v3067_v56  ;;  %v9631_v3 = vcombine.low %v2935_v53, %v2939_v32  ;;  %v9759_v6 = vcombine.low %v3063_v55, %v3067_v56 }
 0x313   :  { %5997 = vmatprep.subr.bf16.mxu0 %v9680_v8  ;;  %v3059_v1 = vld [vmem:[#allocation10 + $0x720] sm:$0xff]  ;;  %v9624_v5 = vcombine.high %v2927_v60, %v2931_v61 }
 0x314   :  { %v2923_v8 = vld [vmem:[#allocation10 + $0x2e0] sm:$0xff]  ;;  %v9752_v9 = vcombine.high %v3055_v63, %v3059_v1  ;;  %v9751_v14 = vcombine.low %v3055_v63, %v3059_v1 }
 0x315   :  { %5957 = vmatpush1.bf16.msra.mxu1 %v9551_v11  ;;  %v3051_v11 = vld [vmem:[#allocation10 + $0x6e0] sm:$0xff] }
 0x316   :  { %5958 = vmatprep.subr.bf16.mxu1 %v9544_v12  ;;  %5998 = vmatpush1.bf16.msra.mxu0 %v9679_v13  ;;  %v9623_v12 = vcombine.low %v2927_v60, %v2931_v61  ;;  %v9616_v13 = vcombine.high %v2919_v7, %v2923_v8  ;;  %v2911_v15 = vld [vmem:[#allocation10 + $0x280] sm:$0xff]  ;;  %v9744_v17 = vcombine.high %v3047_v10, %v3051_v11 }
 0x317   :  { %5999 = vmatprep.subr.bf16.mxu0 %v9672_v16  ;;  %v2915_v16 = vld [vmem:[#allocation10 + $0x2a0] sm:$0xff]  ;;  %v9743_v23 = vcombine.low %v3047_v10, %v3051_v11 }
 0x318   :  { %v3039_v18 = vld [vmem:[#allocation10 + $0x680] sm:$0xff]  ;;  %v9608_v22 = vcombine.high %v2911_v15, %v2915_v16 }
 0x319   :  { %5959 = vmatpush1.bf16.msra.mxu1 %v9543_v19  ;;  %v3043_v19 = vld [vmem:[#allocation10 + $0x6a0] sm:$0xff] }
 0x31a   :  { %5960 = vmatprep.subr.bf16.mxu1 %v9536_v20  ;;  %6000 = vmatpush1.bf16.msra.mxu0 %v9671_v21  ;;  %v9615_v20 = vcombine.low %v2919_v7, %v2923_v8  ;;  %v1170_v21 = vrot.slane %v11430_v25, %v11391_v45  ;;  %v2907_v26 = vld [vmem:[#allocation10 + $0x260] sm:$0xff]  ;;  %v9736_v29 = vcombine.high %v3039_v18, %v3043_v19 }
 0x31b   :  { %6001 = vmatprep.subr.bf16.mxu0 %v9664_v24  ;;  %v2903_v24 = vld [vmem:[#allocation10 + $0x240] sm:$0xff] }
 0x31c   :  { %v2522_v34 = vadd.f32 %v11435_v30, %v1170_v21  ;;  %v9600_v36 = vcombine.high %v2903_v24, %v2907_v26  ;;  %v2895_v38 = vld [vmem:[#allocation10 + $0x200] sm:$0xff]  ;;  %v9599_v43 = vcombine.low %v2903_v24, %v2907_v26 }
 0x31d   :  { %5961 = vmatpush1.bf16.msra.mxu1 %v9535_v27  ;;  %v3031_v27 = vld [vmem:[#allocation10 + $0x640] sm:$0xff] }
 0x31e   :  { %5962 = vmatprep.subr.bf16.mxu1 %v9528_v28  ;;  %6002 = vmatpush1.bf16.msra.mxu0 %v9663_v33  ;;  %v3035_v28 = vld [vmem:[#allocation10 + $0x660] sm:$0xff]  ;;  %v9607_v33 = vcombine.low %v2911_v15, %v2915_v16  ;;  %v2563_v46 = vadd.f32 %v11437_v35, %v2522_v34 }
 0x31f   :  { %6003 = vmatprep.subr.bf16.mxu0 %v9656_v37  ;;  %v9735_v37 = vcombine.low %v3039_v18, %v3043_v19  ;;  %v2899_v39 = vld [vmem:[#allocation10 + $0x220] sm:$0xff]  ;;  %v9727_v31 = vcombine.low %v3031_v27, %v3035_v28 }
 0x320   :  { %v3143_v49 = vld [vmem:[#allocation10 + $0x9c0] sm:$0xff]  ;;  %v9591_v53 = vcombine.low %v2895_v38, %v2899_v39  ;;  %v2815_v32 = vmax.f32 %v2563_v46, 0.0 }
 0x321   :  { %5963 = vmatpush1.bf16.msra.mxu1 %v9527_v40  ;;  %v9728_v40 = vcombine.high %v3031_v27, %v3035_v28  ;;  %v3135_v35 = vld [vmem:[#allocation10 + $0x980] sm:$0xff] }
 0x322   :  { %5964 = vmatprep.subr.bf16.mxu1 %v9648_v41  ;;  %6004 = vmatpush1.bf16.msra.mxu0 %v9655_v42  ;;  %v3023_v41 = vld [vmem:[#allocation10 + $0x600] sm:$0xff]  ;;  %v11455_v60 = vpack.c.bf16 %v2815_v32, %v2815_v32 }
 0x323   :  { %6005 = vmatprep.subr.bf16.mxu0 %v9776_v48  ;;  %v3027_v42 = vld [vmem:[#allocation10 + $0x620] sm:$0xff]  ;;  %v9592_v48 = vcombine.high %v2895_v38, %v2899_v39 }
 0x324   :  { %v9720_v30 = vcombine.high %v3023_v41, %v3027_v42  ;;  %v3139_v56 = vld [vmem:[#allocation10 + $0x9a0] sm:$0xff] }
 0x325   :  { %5965 = vmatpush2.bf16.msra.mxu1 %v9647_v50  ;;  %v3147_v50 = vld [vmem:[#allocation10 + $0x9e0] sm:$0xff]  ;;  %v9832_v61 = vcombine.high %v3135_v35, %v3139_v56  ;;  %v9831_v7 = vcombine.low %v3135_v35, %v3139_v56 }
 0x326   :  { %5966 = vmatprep.subr.bf16.mxu1 %v9640_v51  ;;  %6006 = vmatpush2.bf16.msra.mxu0 %v9775_v52  ;;  %v11447_v51 = vld [vmem:[#allocation10 + $0xdc0] sm:$0xff]  ;;  %v9840_v55 = vcombine.high %v3143_v49, %v3147_v50 }
 0x327   :  { %6007 = vmatprep.subr.bf16.mxu0 %v9768_v54  ;;  %v11449_v52 = vld [vmem:[#allocation10 + $0xde0] sm:$0xff]  ;;  %v9719_v54 = vcombine.low %v3023_v41, %v3027_v42  ;;  %v11468_v41 = vld [vmem:[#allocation10 + $0x5e8] sm:$0xff] }
 0x328   :  { %v3127_v63 = vld [vmem:[#allocation10 + $0x940] sm:$0xff]  ;;  %v9967_v34 = vcombine.low %v11447_v51, %v11449_v52 }
 0x329   :  { %5967 = vmatpush2.bf16.msra.mxu1 %v9639_v57  ;;  %v9968_v57 = vcombine.high %v11447_v51, %v11449_v52  ;;  %v3131_v1 = vld [vmem:[#allocation10 + $0x960] sm:$0xff] }
 0x32a   :  { %5968 = vmatprep.subr.bf16.mxu1 %v9632_v58  ;;  %6008 = vmatpush2.bf16.msra.mxu0 %v9767_v59  ;;  %v1178_v58 = vrot.slane %v11430_v25, %v11399_v2  ;;  %v9839_v59 = vcombine.low %v3143_v49, %v3147_v50  ;;  %v9824_v10 = vcombine.high %v3127_v63, %v3131_v1  ;;  %v3115_v26 = vld [vmem:[#allocation10 + $0x8e0] sm:$0xff] }
 0x32b   :  { %6009 = vmatprep.subr.bf16.mxu0 %v9760_v62  ;;  %v1182_v62 = vrot.slane %v11430_v25, %v11402_v4  ;;  %v9823_v18 = vcombine.low %v3127_v63, %v3131_v1  ;;  %v3267_v27 = vld [vmem:[#allocation10 + $0xda0] sm:$0xff] }
 0x32c   :  { %v3103_v38 = vld [vmem:[#allocation10 + $0x880] sm:$0xff] }
 0x32d   :  { %5969 = vmatpush2.bf16.msra.mxu1 %v9631_v3  ;;  %v3107_v42 = vld [vmem:[#allocation10 + $0x8a0] sm:$0xff] }
 0x32e   :  { %5970 = vmatprep.subr.bf16.mxu1 %v9624_v5  ;;  %6010 = vmatpush2.bf16.msra.mxu0 %v9759_v6  ;;  %v3259_v46 = vld [vmem:[#allocation10 + $0xd60] sm:$0xff]  ;;  %v9800_v49 = vcombine.high %v3103_v38, %v3107_v42 }
 0x32f   :  { %6011 = vmatprep.subr.bf16.mxu0 %v9752_v9  ;;  %v3095_v50 = vld [vmem:[#allocation10 + $0x840] sm:$0xff] }
 0x330   :  { %v3099_v52 = vld [vmem:[#allocation10 + $0x860] sm:$0xff] }
 0x331   :  { %5971 = vmatpush2.bf16.msra.mxu1 %v9623_v12  ;;  %v3251_v32 = vld [vmem:[#allocation10 + $0xd20] sm:$0xff]  ;;  %v9792_v35 = vcombine.high %v3095_v50, %v3099_v52 }
 0x332   :  { %5972 = vmatprep.subr.bf16.mxu1 %v9616_v13  ;;  %6012 = vmatpush2.bf16.msra.mxu0 %v9751_v14  ;;  %v3119_v13 = vld [vmem:[#allocation10 + $0x900] sm:$0xff] }
 0x333   :  { %6013 = vmatprep.subr.bf16.mxu0 %v9744_v17  ;;  %v3123_v14 = vld [vmem:[#allocation10 + $0x920] sm:$0xff] }
 0x334   :  { %v3087_v56 = vld [vmem:[#allocation10 + $0x800] sm:$0xff] }
 0x335   :  { %5973 = vmatpush2.bf16.msra.mxu1 %v9615_v20 }
 0x336   :  { %5974 = vmatprep.subr.bf16.mxu1 %v9608_v22  ;;  %6014 = vmatpush2.bf16.msra.mxu0 %v9743_v23  ;;  %v9816_v22 = vcombine.high %v3119_v13, %v3123_v14  ;;  %v3111_v23 = vld [vmem:[#allocation10 + $0x8c0] sm:$0xff] }
 0x337   :  { %6015 = vmatprep.subr.bf16.mxu0 %v9736_v29  ;;  %v3263_v29 = vld [vmem:[#allocation10 + $0xd80] sm:$0xff] }
 0x338   :  { %v9960_v39 = vcombine.high %v3263_v29, %v3267_v27 }
 0x339   :  { %5975 = vmatpush2.bf16.msra.mxu1 %v9607_v33  ;;  %v9815_v33 = vcombine.low %v3119_v13, %v3123_v14  ;;  %v3203_v14 = vld [vmem:[#allocation10 + $0xba0] sm:$0xff] }
 0x33a   :  { %5976 = vmatprep.subr.bf16.mxu1 %v9600_v36  ;;  %6016 = vmatpush2.bf16.msra.mxu0 %v9735_v37  ;;  %v9808_v37 = vcombine.high %v3111_v23, %v3115_v26 }
 0x33b   :  { %6017 = vmatprep.subr.bf16.mxu0 %v9728_v40  ;;  %v11466_v40 = vld [vmem:[#allocation10 + $0x5c8] sm:$0xff] }
 0x33d   :  { %5977 = vmatpush2.bf16.msra.mxu1 %v9599_v43  ;;  %v3255_v43 = vld [vmem:[#allocation10 + $0xd40] sm:$0xff] }
 0x33e   :  { %5978 = vmatprep.subr.bf16.mxu1 %v9592_v48  ;;  %6018 = vmatpush2.bf16.msra.mxu0 %v9727_v31  ;;  %v9713_v48 = vcombine.low %v11466_v40, %v11468_v41  ;;  %v9807_v31 = vcombine.low %v3111_v23, %v3115_v26  ;;  %v9952_v51 = vcombine.high %v3255_v43, %v3259_v46  ;;  %v3215_v23 = vld [vmem:[#allocation10 + $0xc00] sm:$0xff] }
 0x33f   :  { %6019 = vmatprep.subr.bf16.mxu0 %v9720_v30  ;;  %v9959_v30 = vcombine.low %v3263_v29, %v3267_v27 }
 0x341   :  { %5979 = vmatpush2.bf16.msra.mxu1 %v9591_v53  ;;  %v3247_v53 = vld [vmem:[#allocation10 + $0xd00] sm:$0xff] }
 0x342   :  { %6020 = vmatpush2.bf16.msra.mxu0 %v9719_v54  ;;  %6030 = vmatprep.subr.bf16.mxu1 %v9840_v55  ;;  %v9799_v54 = vcombine.low %v3103_v38, %v3107_v42  ;;  %v9951_v55 = vcombine.low %v3255_v43, %v3259_v46  ;;  %v9943_v63 = vcombine.low %v3247_v53, %v3251_v32  ;;  %v3335_v38 = vld [vmem:[#allocation10 + $0xfc0] sm:$0xff] }
 0x343   :  { %6071 = vmatprep.subr.bf16.mxu0 %v9968_v57  ;;  %v9944_v57 = vcombine.high %v3247_v53, %v3251_v32 }
 0x344   :  { %v2603_v3 = vpop.f32.mrf.mxu1  ;;  %v2644_v5 = vpop.f32.mrf.mxu0  ;;  %5981 = vmatmul.mubr.bf16.vlgmr.msra.gmra.mxu1 %v11455_v60 }
 0x345   :  { %v2604_v6 = vadd.f32 %v2603_v3, %v1178_v58  ;;  %6031 = vmatpush1.bf16.msra.mxu1 %v9839_v59  ;;  %v3091_v58 = vld [vmem:[#allocation10 + $0x820] sm:$0xff] }
 0x346   :  { %v2605_v8 = vpop.f32.mrf.mxu1  ;;  %v2646_v9 = vpop.f32.mrf.mxu0  ;;  %6032 = vmatprep.subr.bf16.mxu1 %v9832_v61  ;;  %v3239_v59 = vld [vmem:[#allocation10 + $0xcc0] sm:$0xff]  ;;  %v9784_v1 = vcombine.high %v3087_v56, %v3091_v58 }
 0x347   :  { %v2645_v11 = vadd.f32 %v2644_v5, %v2604_v6  ;;  %v2606_v12 = vadd.f32 %v2605_v8, %v1182_v62  ;;  %v3243_v61 = vld [vmem:[#allocation10 + $0xce0] sm:$0xff]  ;;  %v9791_v62 = vcombine.low %v3095_v50, %v3099_v52 }
 0x348   :  { %v2607_v15 = vpop.f32.mrf.mxu1  ;;  %v2648_v16 = vpop.f32.mrf.mxu0  ;;  %v3207_v3 = vld [vmem:[#allocation10 + $0xbc0] sm:$0xff]  ;;  %v9936_v5 = vcombine.high %v3239_v59, %v3243_v61 }
 0x349   :  { %v2647_v17 = vadd.f32 %v2646_v9, %v2606_v12  ;;  %6033 = vmatpush1.bf16.msra.mxu1 %v9831_v7  ;;  %v2817_v19 = vmax.f32 %v2645_v11, 0.0  ;;  %v3211_v6 = vld [vmem:[#allocation10 + $0xbe0] sm:$0xff]  ;;  %v9783_v9 = vcombine.low %v3087_v56, %v3091_v58 }
 0x34a   :  { %v2608_v20 = vpop.f32.mrf.mxu1  ;;  %v2649_v21 = vpop.f32.mrf.mxu0  ;;  %6034 = vmatprep.subr.bf16.mxu1 %v9824_v10  ;;  %v3231_v7 = vld [vmem:[#allocation10 + $0xc80] sm:$0xff]  ;;  %v9935_v10 = vcombine.low %v3239_v59, %v3243_v61  ;;  %v9904_v11 = vcombine.high %v3207_v3, %v3211_v6 }
 0x34b   :  { %v2818_v24 = vmax.f32 %v2647_v17, 0.0  ;;  %v11464_v36 = vpack.c.bf16 %v2817_v19, %v2817_v19  ;;  %v3235_v8 = vld [vmem:[#allocation10 + $0xca0] sm:$0xff]  ;;  %v9903_v17 = vcombine.low %v3207_v3, %v3211_v6 }
 0x34c   :  { %v3199_v12 = vld [vmem:[#allocation10 + $0xb80] sm:$0xff]  ;;  %v9928_v13 = vcombine.high %v3231_v7, %v3235_v8 }
 0x34d   :  { %v11460_v28 = vpack.c.bf16 %v2818_v24, %v2818_v24  ;;  %6035 = vmatpush1.bf16.msra.mxu1 %v9823_v18  ;;  %v3223_v15 = vld [vmem:[#allocation10 + $0xc40] sm:$0xff]  ;;  %v9927_v18 = vcombine.low %v3231_v7, %v3235_v8  ;;  %v9896_v19 = vcombine.high %v3199_v12, %v3203_v14  ;;  %v9895_v26 = vcombine.low %v3199_v12, %v3203_v14 }
 0x34e   :  { %6036 = vmatprep.subr.bf16.mxu1 %v9816_v22  ;;  %v3227_v16 = vld [vmem:[#allocation10 + $0xc60] sm:$0xff] }
 0x34f   :  { %6021 = vmatprep.mubr.bf16.mxu0 %v11460_v28  ;;  %v3191_v20 = vld [vmem:[#allocation10 + $0xb40] sm:$0xff]  ;;  %v9920_v21 = vcombine.high %v3223_v15, %v3227_v16  ;;  %v9919_v29 = vcombine.low %v3223_v15, %v3227_v16 }
 0x350   :  { %6022 = vmatmul.mubr.bf16.vlgmr.msra.gmra.mxu0 %v11464_v36  ;;  %v3195_v22 = vld [vmem:[#allocation10 + $0xb60] sm:$0xff] }
 0x351   :  { %6037 = vmatpush1.bf16.msra.mxu1 %v9815_v33  ;;  %6072 = vmatpush1.bf16.msra.mxu0 %v9967_v34  ;;  %v3219_v24 = vld [vmem:[#allocation10 + $0xc20] sm:$0xff]  ;;  %v9888_v27 = vcombine.high %v3191_v20, %v3195_v22  ;;  %v9887_v42 = vcombine.low %v3191_v20, %v3195_v22  ;;  %v1185_v22 = vsub.s32 4, %v11388_v44 }
 0x352   :  { %6038 = vmatprep.subr.bf16.mxu1 %v9808_v37  ;;  %6073 = vmatprep.subr.bf16.mxu0 %v9960_v39  ;;  %v3183_v33 = vld [vmem:[#allocation10 + $0xb00] sm:$0xff]  ;;  %v9912_v34 = vcombine.high %v3215_v23, %v3219_v24  ;;  %v9911_v43 = vcombine.low %v3215_v23, %v3219_v24 }
 0x353   :  { %v3187_v37 = vld [vmem:[#allocation10 + $0xb20] sm:$0xff] }
 0x354   :  { %v3339_v39 = vld [vmem:[#allocation10 + $0xfe0] sm:$0xff]  ;;  %v9880_v46 = vcombine.high %v3183_v33, %v3187_v37  ;;  %v9879_v52 = vcombine.low %v3183_v33, %v3187_v37  ;;  %v1186_v37 = vrot.slane %v11430_v25, %v1185_v22 }
 0x355   :  { %6039 = vmatpush1.bf16.msra.mxu1 %v9807_v31  ;;  %6074 = vmatpush1.bf16.msra.mxu0 %v9959_v30  ;;  %v3175_v31 = vld [vmem:[#allocation10 + $0xac0] sm:$0xff]  ;;  %v10032_v30 = vcombine.high %v3335_v38, %v3339_v39  ;;  %v10031_v53 = vcombine.low %v3335_v38, %v3339_v39 }
 0x356   :  { %6040 = vmatprep.subr.bf16.mxu1 %v9800_v49  ;;  %6075 = vmatprep.subr.bf16.mxu0 %v9952_v51  ;;  %v3179_v49 = vld [vmem:[#allocation10 + $0xae0] sm:$0xff] }
 0x357   :  { %v3327_v50 = vld [vmem:[#allocation10 + $0xf80] sm:$0xff]  ;;  %v9872_v32 = vcombine.high %v3175_v31, %v3179_v49  ;;  %v9871_v58 = vcombine.low %v3175_v31, %v3179_v49 }
 0x358   :  { %v3331_v51 = vld [vmem:[#allocation10 + $0xfa0] sm:$0xff] }
 0x359   :  { %6041 = vmatpush1.bf16.msra.mxu1 %v9799_v54  ;;  %6076 = vmatpush1.bf16.msra.mxu0 %v9951_v55  ;;  %v3167_v54 = vld [vmem:[#allocation10 + $0xa80] sm:$0xff]  ;;  %v10024_v55 = vcombine.high %v3327_v50, %v3331_v51  ;;  %v10023_v59 = vcombine.low %v3327_v50, %v3331_v51 }
 0x35a   :  { %6042 = vmatprep.subr.bf16.mxu1 %v9792_v35  ;;  %6077 = vmatprep.subr.bf16.mxu0 %v9944_v57  ;;  %v3171_v35 = vld [vmem:[#allocation10 + $0xaa0] sm:$0xff] }
 0x35b   :  { %v3319_v56 = vld [vmem:[#allocation10 + $0xf40] sm:$0xff]  ;;  %v9864_v61 = vcombine.high %v3167_v54, %v3171_v35  ;;  %v9863_v6 = vcombine.low %v3167_v54, %v3171_v35 }
 0x35c   :  { %v3323_v57 = vld [vmem:[#allocation10 + $0xf60] sm:$0xff] }
 0x35d   :  { %6043 = vmatpush1.bf16.msra.mxu1 %v9791_v62  ;;  %6078 = vmatpush1.bf16.msra.mxu0 %v9943_v63  ;;  %v3159_v62 = vld [vmem:[#allocation10 + $0xa40] sm:$0xff]  ;;  %v10016_v63 = vcombine.high %v3319_v56, %v3323_v57  ;;  %v10015_v7 = vcombine.low %v3319_v56, %v3323_v57 }
 0x35e   :  { %6044 = vmatprep.subr.bf16.mxu1 %v9784_v1  ;;  %6079 = vmatprep.subr.bf16.mxu0 %v9936_v5  ;;  %v3163_v1 = vld [vmem:[#allocation10 + $0xa60] sm:$0xff] }
 0x35f   :  { %v3311_v3 = vld [vmem:[#allocation10 + $0xf00] sm:$0xff]  ;;  %v9856_v8 = vcombine.high %v3159_v62, %v3163_v1  ;;  %v9855_v14 = vcombine.low %v3159_v62, %v3163_v1  ;;  %v2880_v1 = vld [vmem:[#allocation10 + $0x188] sm:$0xff] }
 0x360   :  { %v3315_v5 = vld [vmem:[#allocation10 + $0xf20] sm:$0xff] }
 0x361   :  { %6045 = vmatpush1.bf16.msra.mxu1 %v9783_v9  ;;  %6080 = vmatpush1.bf16.msra.mxu0 %v9935_v10  ;;  %v3151_v9 = vld [vmem:[#allocation10 + $0xa00] sm:$0xff]  ;;  %v10008_v10 = vcombine.high %v3311_v3, %v3315_v5  ;;  %v10007_v15 = vcombine.low %v3311_v3, %v3315_v5  ;;  %v2884_v3 = vld [vmem:[#allocation10 + $0x1a8] sm:$0xff] }
 0x362   :  { %6046 = vmatprep.subr.bf16.mxu1 %v9904_v11  ;;  %6081 = vmatprep.subr.bf16.mxu0 %v9928_v13  ;;  %v3155_v11 = vld [vmem:[#allocation10 + $0xa20] sm:$0xff] }
 0x363   :  { %v3303_v12 = vld [vmem:[#allocation10 + $0xec0] sm:$0xff]  ;;  %v9848_v16 = vcombine.high %v3151_v9, %v3155_v11  ;;  %v9847_v23 = vcombine.low %v3151_v9, %v3155_v11  ;;  %v2872_v9 = vld [vmem:[#allocation10 + $0x148] sm:$0xff]  ;;  %v9577_v11 = vcombine.low %v2880_v1, %v2884_v3 }
 0x364   :  { %v3307_v13 = vld [vmem:[#allocation10 + $0xee0] sm:$0xff] }
 0x365   :  { %6047 = vmatpush2.bf16.msra.mxu1 %v9903_v17  ;;  %6082 = vmatpush1.bf16.msra.mxu0 %v9927_v18  ;;  %v2888_v17 = vld [vmem:[#allocation10 + $0x1c8] sm:$0xff]  ;;  %v10000_v18 = vcombine.high %v3303_v12, %v3307_v13  ;;  %v3295_v20 = vld [vmem:[#allocation10 + $0xe80] sm:$0xff]  ;;  %v9999_v24 = vcombine.low %v3303_v12, %v3307_v13 }
 0x366   :  { %6048 = vmatprep.subr.bf16.mxu1 %v9896_v19  ;;  %6083 = vmatprep.subr.bf16.mxu0 %v9920_v21  ;;  %v2892_v19 = vld [vmem:[#allocation10 + $0x1e8] sm:$0xff]  ;;  %v3299_v21 = vld [vmem:[#allocation10 + $0xea0] sm:$0xff] }
 0x367   :  { %v3287_v33 = vld [vmem:[#allocation10 + $0xe40] sm:$0xff]  ;;  %v9991_v38 = vcombine.low %v3295_v20, %v3299_v21  ;;  %v2864_v13 = vld [vmem:[#allocation10 + $0x108] sm:$0xff] }
 0x369   :  { %6049 = vmatpush2.bf16.msra.mxu1 %v9895_v26  ;;  %6084 = vmatpush1.bf16.msra.mxu0 %v9919_v29  ;;  %v9586_v26 = vcombine.high %v2888_v17, %v2892_v19  ;;  %v9992_v29 = vcombine.high %v3295_v20, %v3299_v21  ;;  %v2848_v21 = vld [vmem:[#allocation10 + $0x88] sm:$0xff] }
 0x36a   :  { %6050 = vmatprep.subr.bf16.mxu1 %v9888_v27  ;;  %6085 = vmatprep.subr.bf16.mxu0 %v9912_v34  ;;  %v1189_v27 = vsub.s32 5, %v11388_v44  ;;  %v3291_v34 = vld [vmem:[#allocation10 + $0xe60] sm:$0xff] }
 0x36b   :  { %v9984_v39 = vcombine.high %v3287_v33, %v3291_v34  ;;  %v9983_v50 = vcombine.low %v3287_v33, %v3291_v34  ;;  %v2844_v33 = vld [vmem:[#allocation10 + $0x68] sm:$0xff] }
 0x36d   :  { %6051 = vmatpush2.bf16.msra.mxu1 %v9887_v42  ;;  %6086 = vmatpush1.bf16.msra.mxu0 %v9911_v43  ;;  %v1190_v42 = vrot.slane %v11430_v25, %v1189_v27  ;;  %v3279_v43 = vld [vmem:[#allocation10 + $0xe00] sm:$0xff] }
 0x36e   :  { %6052 = vmatprep.subr.bf16.mxu1 %v9880_v46  ;;  %6087 = vmatprep.subr.bf16.mxu0 %v10032_v30  ;;  %v3283_v46 = vld [vmem:[#allocation10 + $0xe20] sm:$0xff] }
 0x36f   :  { %v9975_v57 = vcombine.low %v3279_v43, %v3283_v46 }
 0x371   :  { %6053 = vmatpush2.bf16.msra.mxu1 %v9879_v52  ;;  %6088 = vmatpush2.bf16.msra.mxu0 %v10031_v53  ;;  %v9976_v52 = vcombine.high %v3279_v43, %v3283_v46  ;;  %v2952_v46 = vld [vmem:[#allocation10 + $0x3c8] sm:$0xff] }
 0x372   :  { %6054 = vmatprep.subr.bf16.mxu1 %v9872_v32  ;;  %6089 = vmatprep.subr.bf16.mxu0 %v10024_v55 }
 0x375   :  { %6055 = vmatpush2.bf16.msra.mxu1 %v9871_v58  ;;  %6090 = vmatpush2.bf16.msra.mxu0 %v10023_v59 }
 0x376   :  { %6056 = vmatprep.subr.bf16.mxu1 %v9864_v61  ;;  %6091 = vmatprep.subr.bf16.mxu0 %v10016_v63  ;;  %v9714_v61 = vcombine.high %v11466_v40, %v11468_v41 }
 0x379   :  { %6057 = vmatpush2.bf16.msra.mxu1 %v9863_v6  ;;  %6092 = vmatpush2.bf16.msra.mxu0 %v10015_v7  ;;  %v9585_v6 = vcombine.low %v2888_v17, %v2892_v19  ;;  %v2856_v17 = vld [vmem:[#allocation10 + $0xc8] sm:$0xff] }
 0x37a   :  { %6058 = vmatprep.subr.bf16.mxu1 %v9856_v8  ;;  %6093 = vmatprep.subr.bf16.mxu0 %v10008_v10  ;;  %v9578_v8 = vcombine.high %v2880_v1, %v2884_v3  ;;  %v2876_v10 = vld [vmem:[#allocation10 + $0x168] sm:$0xff] }
 0x37b   :  { %v9570_v12 = vcombine.high %v2872_v9, %v2876_v10  ;;  %v2912_v3 = vld [vmem:[#allocation10 + $0x288] sm:$0xff] }
 0x37d   :  { %6059 = vmatpush2.bf16.msra.mxu1 %v9855_v14  ;;  %6094 = vmatpush2.bf16.msra.mxu0 %v10007_v15  ;;  %v2868_v14 = vld [vmem:[#allocation10 + $0x128] sm:$0xff]  ;;  %v9569_v15 = vcombine.low %v2872_v9, %v2876_v10  ;;  %v1193_v9 = vsub.s32 6, %v11388_v44 }
 0x37e   :  { %6060 = vmatprep.subr.bf16.mxu1 %v9848_v16  ;;  %6095 = vmatprep.subr.bf16.mxu0 %v10000_v18  ;;  %v9562_v16 = vcombine.high %v2864_v13, %v2868_v14  ;;  %v2860_v18 = vld [vmem:[#allocation10 + $0xe8] sm:$0xff]  ;;  %v9561_v19 = vcombine.low %v2864_v13, %v2868_v14 }
 0x37f   :  { %v9554_v20 = vcombine.high %v2856_v17, %v2860_v18  ;;  %v2908_v13 = vld [vmem:[#allocation10 + $0x268] sm:$0xff] }
 0x381   :  { %6061 = vmatpush2.bf16.msra.mxu1 %v9847_v23  ;;  %6096 = vmatpush2.bf16.msra.mxu0 %v9999_v24  ;;  %v2852_v23 = vld [vmem:[#allocation10 + $0xa8] sm:$0xff]  ;;  %v9553_v24 = vcombine.low %v2856_v17, %v2860_v18 }
 0x382   :  { %6112 = vmatprep.subr.bf16.mxu1 %v9586_v26  ;;  %6097 = vmatprep.subr.bf16.mxu0 %v9992_v29  ;;  %v9546_v26 = vcombine.high %v2848_v21, %v2852_v23  ;;  %v2840_v29 = vld [vmem:[#allocation10 + $0x48] sm:$0xff]  ;;  %v9545_v34 = vcombine.low %v2848_v21, %v2852_v23 }
 0x383   :  { %v2896_v18 = vld [vmem:[#allocation10 + $0x208] sm:$0xff] }
 0x384   :  { %v2685_v31 = vpop.f32.mrf.mxu1 }
 0x385   :  { %v2686_v30 = vadd.f32 %v2685_v31, %v1186_v37  ;;  %v2726_v49 = vpop.f32.mrf.mxu0  ;;  %6098 = vmatpush2.bf16.msra.mxu0 %v9991_v38  ;;  %v9538_v37 = vcombine.high %v2840_v29, %v2844_v33  ;;  %v2832_v38 = vld [vmem:[#allocation10 + $0x8] sm:$0xff] }
 0x386   :  { %v2687_v51 = vpop.f32.mrf.mxu1  ;;  %6099 = vmatprep.subr.bf16.mxu0 %v9984_v39  ;;  %v2836_v39 = vld [vmem:[#allocation10 + $0x28] sm:$0xff] }
 0x387   :  { %v2727_v53 = vadd.f32 %v2726_v49, %v2686_v30  ;;  %v2688_v32 = vadd.f32 %v2687_v51, %v1190_v42  ;;  %v2728_v54 = vpop.f32.mrf.mxu0  ;;  %v9537_v42 = vcombine.low %v2840_v29, %v2844_v33  ;;  %v9530_v43 = vcombine.high %v2832_v38, %v2836_v39  ;;  %v2956_v31 = vld [vmem:[#allocation10 + $0x3e8] sm:$0xff] }
 0x388   :  { %v2689_v55 = vpop.f32.mrf.mxu1  ;;  %v9529_v30 = vcombine.low %v2832_v38, %v2836_v39  ;;  %v9650_v49 = vcombine.high %v2952_v46, %v2956_v31  ;;  %v2948_v51 = vld [vmem:[#allocation10 + $0x3a8] sm:$0xff] }
 0x389   :  { %v2729_v35 = vadd.f32 %v2728_v54, %v2688_v32  ;;  %v2730_v56 = vpop.f32.mrf.mxu0  ;;  %6100 = vmatpush2.bf16.msra.mxu0 %v9983_v50  ;;  %v2819_v58 = vmax.f32 %v2727_v53, 0.0  ;;  %v2944_v50 = vld [vmem:[#allocation10 + $0x388] sm:$0xff] }
 0x38a   :  { %v2690_v59 = vpop.f32.mrf.mxu1  ;;  %6101 = vmatprep.subr.bf16.mxu0 %v9976_v52  ;;  %v9649_v52 = vcombine.low %v2952_v46, %v2956_v31  ;;  %v9642_v53 = vcombine.high %v2944_v50, %v2948_v51  ;;  %v2936_v32 = vld [vmem:[#allocation10 + $0x348] sm:$0xff]  ;;  %v9641_v55 = vcombine.low %v2944_v50, %v2948_v51 }
 0x38b   :  { %v2820_v62 = vmax.f32 %v2729_v35, 0.0  ;;  %v2731_v63 = vpop.f32.mrf.mxu0  ;;  %v11486_v7 = vpack.c.bf16 %v2819_v58, %v2819_v58  ;;  %v2940_v54 = vld [vmem:[#allocation10 + $0x368] sm:$0xff] }
 0x38c   :  { %v9634_v35 = vcombine.high %v2936_v32, %v2940_v54  ;;  %v2928_v56 = vld [vmem:[#allocation10 + $0x308] sm:$0xff]  ;;  %v9633_v58 = vcombine.low %v2936_v32, %v2940_v54 }
 0x38d   :  { %v11484_v5 = vpack.c.bf16 %v2820_v62, %v2820_v62  ;;  %6102 = vmatpush2.bf16.msra.mxu0 %v9975_v57  ;;  %v2932_v57 = vld [vmem:[#allocation10 + $0x328] sm:$0xff] }
 0x38e   :  { %6153 = vmatprep.subr.bf16.mxu0 %v9714_v61  ;;  %v9626_v59 = vcombine.high %v2928_v56, %v2932_v57  ;;  %v2920_v61 = vld [vmem:[#allocation10 + $0x2c8] sm:$0xff]  ;;  %v9625_v63 = vcombine.low %v2928_v56, %v2932_v57 }
 0x38f   :  { %6062 = vmatprep.mubr.bf16.mxu1 %v11484_v5  ;;  %v2924_v62 = vld [vmem:[#allocation10 + $0x2e8] sm:$0xff] }
 0x390   :  { %6063 = vmatmul.mubr.bf16.vlgmr.msra.gmra.mxu1 %v11486_v7  ;;  %v9618_v1 = vcombine.high %v2920_v61, %v2924_v62  ;;  %v3144_v38 = vld [vmem:[#allocation10 + $0x9c8] sm:$0xff] }
 0x391   :  { %6113 = vmatpush1.bf16.msra.mxu1 %v9585_v6  ;;  %6144 = vmatprep.mubr.bf16.mxu1 %v11440_v0  ;;  %v2916_v6 = vld [vmem:[#allocation10 + $0x2a8] sm:$0xff] }
 0x392   :  { %6114 = vmatprep.subr.bf16.mxu1 %v9578_v8  ;;  %v9617_v8 = vcombine.low %v2920_v61, %v2924_v62  ;;  %v9610_v10 = vcombine.high %v2912_v3, %v2916_v6  ;;  %v9609_v14 = vcombine.low %v2912_v3, %v2916_v6  ;;  %v3148_v39 = vld [vmem:[#allocation10 + $0x9e8] sm:$0xff] }
 0x393   :  { %v3136_v32 = vld [vmem:[#allocation10 + $0x988] sm:$0xff] }
 0x394   :  { %v3140_v54 = vld [vmem:[#allocation10 + $0x9a8] sm:$0xff] }
 0x395   :  { %6115 = vmatpush1.bf16.msra.mxu1 %v9577_v11  ;;  %v1197_v11 = vsub.s32 7, %v11388_v44  ;;  %v3000_v57 = vld [vmem:[#allocation10 + $0x548] sm:$0xff]  ;;  %v9833_v3 = vcombine.low %v3136_v32, %v3140_v54 }
 0x396   :  { %6116 = vmatprep.subr.bf16.mxu1 %v9570_v12  ;;  %v2904_v12 = vld [vmem:[#allocation10 + $0x248] sm:$0xff] }
 0x397   :  { %v1198_v17 = vrot.slane %v11430_v25, %v1197_v11  ;;  %v3004_v61 = vld [vmem:[#allocation10 + $0x568] sm:$0xff] }
 0x398   :  { %v3128_v62 = vld [vmem:[#allocation10 + $0x948] sm:$0xff]  ;;  %v9698_v6 = vcombine.high %v3000_v57, %v3004_v61 }
 0x399   :  { %6117 = vmatpush1.bf16.msra.mxu1 %v9569_v15  ;;  %v1194_v15 = vrot.slane %v11430_v25, %v1193_v9  ;;  %v10846_v44 = vld [vmem:[#allocation11 + $0x508] ss:$16 sps:$4 sm:$0xff]  }
 0x39a   :  { %6118 = vmatprep.subr.bf16.mxu1 %v9562_v16  ;;  %v9602_v16 = vcombine.high %v2904_v12, %v2908_v13 }
 0x39d   :  { %6119 = vmatpush1.bf16.msra.mxu1 %v9561_v19  ;;  %v2900_v19 = vld [vmem:[#allocation10 + $0x228] sm:$0xff] }
 0x39e   :  { %6120 = vmatprep.subr.bf16.mxu1 %v9554_v20  ;;  %v9594_v29 = vcombine.high %v2896_v18, %v2900_v19  ;;  %v9593_v25 = vcombine.low %v2896_v18, %v2900_v19  ;;  %v3112_v18 = vld [vmem:[#allocation10 + $0x8c8] sm:$0xff] }
 0x39f   :  { %v3116_v19 = vld [vmem:[#allocation10 + $0x8e8] sm:$0xff] }
 0x3a1   :  { %6121 = vmatpush1.bf16.msra.mxu1 %v9553_v24  ;;  %v9601_v24 = vcombine.low %v2904_v12, %v2908_v13  ;;  %v2996_v12 = vld [vmem:[#allocation10 + $0x528] sm:$0xff] }
 0x3a2   :  { %6122 = vmatprep.subr.bf16.mxu1 %v9546_v26  ;;  %v3120_v13 = vld [vmem:[#allocation10 + $0x908] sm:$0xff] }
 0x3a5   :  { %6123 = vmatpush1.bf16.msra.mxu1 %v9545_v34 }
 0x3a6   :  { %6124 = vmatprep.subr.bf16.mxu1 %v9538_v37 }
 0x3a9   :  { %6125 = vmatpush1.bf16.msra.mxu1 %v9537_v42 }
 0x3aa   :  { %6126 = vmatprep.subr.bf16.mxu1 %v9530_v43 }
 0x3ad   :  { %6127 = vmatpush1.bf16.msra.mxu1 %v9529_v30 }
 0x3ae   :  { %6128 = vmatprep.subr.bf16.mxu1 %v9650_v49  ;;  %v9842_v49 = vcombine.high %v3144_v38, %v3148_v39 }
 0x3b1   :  { %6129 = vmatpush2.bf16.msra.mxu1 %v9649_v52  ;;  %v3008_v52 = vld [vmem:[#allocation10 + $0x588] sm:$0xff] }
 0x3b2   :  { %6130 = vmatprep.subr.bf16.mxu1 %v9642_v53  ;;  %v3012_v53 = vld [vmem:[#allocation10 + $0x5a8] sm:$0xff] }
 0x3b5   :  { %6131 = vmatpush2.bf16.msra.mxu1 %v9641_v55 }
 0x3b6   :  { %6132 = vmatprep.subr.bf16.mxu1 %v9634_v35  ;;  %v9841_v35 = vcombine.low %v3144_v38, %v3148_v39  ;;  %v9809_v38 = vcombine.low %v3112_v18, %v3116_v19 }
 0x3b9   :  { %6133 = vmatpush2.bf16.msra.mxu1 %v9633_v58  ;;  %v9706_v58 = vcombine.high %v3008_v52, %v3012_v53 }
 0x3ba   :  { %6134 = vmatprep.subr.bf16.mxu1 %v9626_v59  ;;  %v9834_v59 = vcombine.high %v3136_v32, %v3140_v54  ;;  %v3088_v32 = vld [vmem:[#allocation10 + $0x808] sm:$0xff] }
 0x3bb   :  { %v3092_v54 = vld [vmem:[#allocation10 + $0x828] sm:$0xff] }
 0x3bd   :  { %6135 = vmatpush2.bf16.msra.mxu1 %v9625_v63  ;;  %v3132_v63 = vld [vmem:[#allocation10 + $0x968] sm:$0xff] }
 0x3be   :  { %6136 = vmatprep.subr.bf16.mxu1 %v9618_v1  ;;  %v9705_v1 = vcombine.low %v3008_v52, %v3012_v53  ;;  %v9825_v40 = vcombine.low %v3128_v62, %v3132_v63  ;;  %v2960_v52 = vld [vmem:[#allocation10 + $0x408] sm:$0xff] }
 0x3bf   :  { %v2964_v53 = vld [vmem:[#allocation10 + $0x428] sm:$0xff] }
 0x3c1   :  { %6137 = vmatpush2.bf16.msra.mxu1 %v9617_v8  ;;  %v9826_v8 = vcombine.high %v3128_v62, %v3132_v63  ;;  %v3084_v62 = vld [vmem:[#allocation10 + $0x7e8] sm:$0xff] }
 0x3c2   :  { %6138 = vmatprep.subr.bf16.mxu1 %v9610_v10  ;;  %v2992_v10 = vld [vmem:[#allocation10 + $0x508] sm:$0xff] }
 0x3c3   :  { %v9690_v41 = vcombine.high %v2992_v10, %v2996_v12  ;;  %v3208_v63 = vld [vmem:[#allocation10 + $0xbc8] sm:$0xff] }
 0x3c4   :  { %v2767_v20 = vpop.f32.mrf.mxu1 }
 0x3c5   :  { %v2768_v21 = vadd.f32 %v2767_v20, %v1194_v15  ;;  %v2808_v23 = vpop.f32.mrf.mxu0  ;;  %6139 = vmatpush2.bf16.msra.mxu1 %v9609_v14  ;;  %v3124_v14 = vld [vmem:[#allocation10 + $0x928] sm:$0xff]  ;;  %v9697_v15 = vcombine.low %v3000_v57, %v3004_v61  ;;  %v9689_v20 = vcombine.low %v2992_v10, %v2996_v12 }
 0x3c6   :  { %v2769_v26 = vpop.f32.mrf.mxu1  ;;  %6140 = vmatprep.subr.bf16.mxu1 %v9602_v16  ;;  %v2984_v16 = vld [vmem:[#allocation10 + $0x4c8] sm:$0xff] }
 0x3c7   :  { %v2809_v33 = vadd.f32 %v2808_v23, %v2768_v21  ;;  %v2770_v34 = vadd.f32 %v2769_v26, %v1198_v17  ;;  %v2810_v37 = vpop.f32.mrf.mxu0  ;;  %v2988_v17 = vld [vmem:[#allocation10 + $0x4e8] sm:$0xff]  ;;  %v9817_v21 = vcombine.low %v3120_v13, %v3124_v14 }
 0x3c8   :  { %v2771_v42 = vpop.f32.mrf.mxu1  ;;  %v9682_v23 = vcombine.high %v2984_v16, %v2988_v17  ;;  %v2976_v26 = vld [vmem:[#allocation10 + $0x488] sm:$0xff] }
 0x3c9   :  { %v2811_v43 = vadd.f32 %v2810_v37, %v2770_v34  ;;  %v2812_v46 = vpop.f32.mrf.mxu0  ;;  %6141 = vmatpush2.bf16.msra.mxu1 %v9601_v24  ;;  %v2821_v31 = vmax.f32 %v2809_v33, 0.0  ;;  %v9810_v24 = vcombine.high %v3112_v18, %v3116_v19  ;;  %v3104_v33 = vld [vmem:[#allocation10 + $0x888] sm:$0xff]  ;;  %v9681_v37 = vcombine.low %v2984_v16, %v2988_v17 }
 0x3ca   :  { %v2772_v30 = vpop.f32.mrf.mxu1  ;;  %6142 = vmatprep.subr.bf16.mxu1 %v9594_v29  ;;  %v2980_v29 = vld [vmem:[#allocation10 + $0x4a8] sm:$0xff] }
 0x3cb   :  { %v2822_v50 = vmax.f32 %v2811_v43, 0.0  ;;  %v2813_v51 = vpop.f32.mrf.mxu0  ;;  %v11501_v56 = vpack.c.bf16 %v2821_v31, %v2821_v31  ;;  %v3108_v34 = vld [vmem:[#allocation10 + $0x8a8] sm:$0xff]  ;;  %v9674_v39 = vcombine.high %v2976_v26, %v2980_v29  ;;  %v9673_v30 = vcombine.low %v2976_v26, %v2980_v29 }
 0x3cc   :  { %v9802_v42 = vcombine.high %v3104_v33, %v3108_v34  ;;  %v2968_v43 = vld [vmem:[#allocation10 + $0x448] sm:$0xff] }
 0x3cd   :  { %v11499_v55 = vpack.c.bf16 %v2822_v50, %v2822_v50  ;;  %6143 = vmatpush2.bf16.msra.mxu1 %v9593_v25  ;;  %v2972_v46 = vld [vmem:[#allocation10 + $0x468] sm:$0xff] }
 0x3ce   :  { %6194 = vmatprep.subr.bf16.mxu1 %v9842_v49  ;;  %v3096_v25 = vld [vmem:[#allocation10 + $0x848] sm:$0xff]  ;;  %v9801_v49 = vcombine.low %v3104_v33, %v3108_v34  ;;  %v9666_v50 = vcombine.high %v2968_v43, %v2972_v46 }
 0x3cf   :  { %6103 = vmatprep.mubr.bf16.mxu0 %v11499_v55  ;;  %v3100_v31 = vld [vmem:[#allocation10 + $0x868] sm:$0xff] }
 0x3d0   :  { %6145 = vmatmul.mubr.bf16.vlgmr.msra.gmra.mxu1 %v11455_v60  ;;  %6104 = vmatmul.mubr.bf16.vlgmr.msra.gmra.mxu0 %v11501_v56  ;;  %v9794_v51 = vcombine.high %v3096_v25, %v3100_v31  ;;  %v9793_v57 = vcombine.low %v3096_v25, %v3100_v31  ;;  %v3080_v61 = vld [vmem:[#allocation10 + $0x7c8] sm:$0xff] }
 0x3d1   :  { %6154 = vmatpush1.bf16.msra.mxu0 %v9713_v48  ;;  %6195 = vmatpush1.bf16.msra.mxu1 %v9841_v35  ;;  %v9818_v48 = vcombine.high %v3120_v13, %v3124_v14  ;;  %v9665_v35 = vcombine.low %v2968_v43, %v2972_v46  ;;  %v3072_v12 = vld [vmem:[#allocation10 + $0x788] sm:$0xff] }
 0x3d2   :  { %6226 = vmatprep.mubr.bf16.mxu1 %v11484_v5  ;;  %6185 = vmatprep.mubr.bf16.mxu0 %v11460_v28  ;;  %v3076_v13 = vld [vmem:[#allocation10 + $0x7a8] sm:$0xff] }
 0x3d3   :  { %6155 = vmatprep.subr.bf16.mxu0 %v9706_v58  ;;  %6196 = vmatprep.subr.bf16.mxu1 %v9834_v59  ;;  %v9658_v58 = vcombine.high %v2960_v52, %v2964_v53  ;;  %v9786_v59 = vcombine.high %v3088_v32, %v3092_v54  ;;  %v3200_v14 = vld [vmem:[#allocation10 + $0xb88] sm:$0xff] }
 0x3d4   :  { %v3064_v17 = vld [vmem:[#allocation10 + $0x748] sm:$0xff] }
 0x3d5   :  { %6156 = vmatpush1.bf16.msra.mxu0 %v9705_v1  ;;  %6197 = vmatpush1.bf16.msra.mxu1 %v9833_v3  ;;  %v3212_v1 = vld [vmem:[#allocation10 + $0xbe8] sm:$0xff]  ;;  %v9657_v3 = vcombine.low %v2960_v52, %v2964_v53 }
 0x3d6   :  { %6157 = vmatprep.subr.bf16.mxu0 %v9698_v6  ;;  %6198 = vmatprep.subr.bf16.mxu1 %v9826_v8  ;;  %v9785_v6 = vcombine.low %v3088_v32, %v3092_v54  ;;  %v9778_v8 = vcombine.high %v3080_v61, %v3084_v62  ;;  %v9906_v10 = vcombine.high %v3208_v63, %v3212_v1  ;;  %v3068_v18 = vld [vmem:[#allocation10 + $0x768] sm:$0xff] }
 0x3d7   :  { %v3192_v19 = vld [vmem:[#allocation10 + $0xb48] sm:$0xff] }
 0x3d8   :  { %v3056_v29 = vld [vmem:[#allocation10 + $0x708] sm:$0xff] }
 0x3d9   :  { %6158 = vmatpush1.bf16.msra.mxu0 %v9697_v15  ;;  %6199 = vmatpush1.bf16.msra.mxu1 %v9825_v40  ;;  %v3204_v15 = vld [vmem:[#allocation10 + $0xba8] sm:$0xff]  ;;  %v9777_v40 = vcombine.low %v3080_v61, %v3084_v62 }
 0x3da   :  { %6159 = vmatprep.subr.bf16.mxu0 %v9690_v41  ;;  %6200 = vmatprep.subr.bf16.mxu1 %v9818_v48  ;;  %v9905_v41 = vcombine.low %v3208_v63, %v3212_v1  ;;  %v9770_v48 = vcombine.high %v3072_v12, %v3076_v13  ;;  %v9898_v16 = vcombine.high %v3200_v14, %v3204_v15  ;;  %v3060_v33 = vld [vmem:[#allocation10 + $0x728] sm:$0xff] }
 0x3db   :  { %v3184_v34 = vld [vmem:[#allocation10 + $0xb08] sm:$0xff] }
 0x3dc   :  { %v3048_v46 = vld [vmem:[#allocation10 + $0x6c8] sm:$0xff] }
 0x3dd   :  { %6160 = vmatpush1.bf16.msra.mxu0 %v9689_v20  ;;  %6201 = vmatpush1.bf16.msra.mxu1 %v9817_v21  ;;  %v3196_v20 = vld [vmem:[#allocation10 + $0xb68] sm:$0xff]  ;;  %v9769_v21 = vcombine.low %v3072_v12, %v3076_v13 }
 0x3de   :  { %6161 = vmatprep.subr.bf16.mxu0 %v9682_v23  ;;  %6202 = vmatprep.subr.bf16.mxu1 %v9810_v24  ;;  %v9897_v23 = vcombine.low %v3200_v14, %v3204_v15  ;;  %v9762_v24 = vcombine.high %v3064_v17, %v3068_v18  ;;  %v9890_v26 = vcombine.high %v3192_v19, %v3196_v20  ;;  %v3052_v25 = vld [vmem:[#allocation10 + $0x6e8] sm:$0xff] }
 0x3df   :  { %v3176_v31 = vld [vmem:[#allocation10 + $0xac8] sm:$0xff] }
 0x3e0   :  { %v3040_v53 = vld [vmem:[#allocation10 + $0x688] sm:$0xff] }
 0x3e1   :  { %6162 = vmatpush1.bf16.msra.mxu0 %v9681_v37  ;;  %6203 = vmatpush1.bf16.msra.mxu1 %v9809_v38  ;;  %v3188_v37 = vld [vmem:[#allocation10 + $0xb28] sm:$0xff]  ;;  %v9761_v38 = vcombine.low %v3064_v17, %v3068_v18 }
 0x3e2   :  { %6163 = vmatprep.subr.bf16.mxu0 %v9674_v39  ;;  %6204 = vmatprep.subr.bf16.mxu1 %v9802_v42  ;;  %v9889_v39 = vcombine.low %v3192_v19, %v3196_v20  ;;  %v9754_v42 = vcombine.high %v3056_v29, %v3060_v33  ;;  %v9882_v43 = vcombine.high %v3184_v34, %v3188_v37  ;;  %v3044_v32 = vld [vmem:[#allocation10 + $0x6a8] sm:$0xff] }
 0x3e3   :  { %v3168_v54 = vld [vmem:[#allocation10 + $0xa88] sm:$0xff] }
 0x3e4   :  { %v3032_v62 = vld [vmem:[#allocation10 + $0x648] sm:$0xff] }
 0x3e5   :  { %6164 = vmatpush1.bf16.msra.mxu0 %v9673_v30  ;;  %6205 = vmatpush1.bf16.msra.mxu1 %v9801_v49  ;;  %v3180_v30 = vld [vmem:[#allocation10 + $0xae8] sm:$0xff]  ;;  %v9753_v49 = vcombine.low %v3056_v29, %v3060_v33  ;;  %v2889_v29 = vld [vmem:[#allocation10 + $0x1d0] sm:$0xff] }
 0x3e6   :  { %6165 = vmatprep.subr.bf16.mxu0 %v9666_v50  ;;  %6206 = vmatprep.subr.bf16.mxu1 %v9794_v51  ;;  %v9881_v50 = vcombine.low %v3184_v34, %v3188_v37  ;;  %v9746_v51 = vcombine.high %v3048_v46, %v3052_v25  ;;  %v9874_v52 = vcombine.high %v3176_v31, %v3180_v30  ;;  %v3036_v63 = vld [vmem:[#allocation10 + $0x668] sm:$0xff]  ;;  %v2893_v33 = vld [vmem:[#allocation10 + $0x1f0] sm:$0xff] }
 0x3e7   :  { %v3160_v1 = vld [vmem:[#allocation10 + $0xa48] sm:$0xff]  ;;  %v9729_v17 = vcombine.low %v3032_v62, %v3036_v63 }
 0x3e8   :  { %v3024_v13 = vld [vmem:[#allocation10 + $0x608] sm:$0xff] }
 0x3e9   :  { %6166 = vmatpush1.bf16.msra.mxu0 %v9665_v35  ;;  %6207 = vmatpush1.bf16.msra.mxu1 %v9793_v57  ;;  %v3172_v35 = vld [vmem:[#allocation10 + $0xaa8] sm:$0xff]  ;;  %v9745_v57 = vcombine.low %v3048_v46, %v3052_v25 }
 0x3ea   :  { %6167 = vmatprep.subr.bf16.mxu0 %v9658_v58  ;;  %6208 = vmatprep.subr.bf16.mxu1 %v9786_v59  ;;  %v9873_v58 = vcombine.low %v3176_v31, %v3180_v30  ;;  %v9738_v59 = vcombine.high %v3040_v53, %v3044_v32  ;;  %v9866_v61 = vcombine.high %v3168_v54, %v3172_v35  ;;  %v3028_v14 = vld [vmem:[#allocation10 + $0x628] sm:$0xff]  ;;  %v2881_v30 = vld [vmem:[#allocation10 + $0x190] sm:$0xff] }
 0x3eb   :  { %v3152_v15 = vld [vmem:[#allocation10 + $0xa08] sm:$0xff]  ;;  %v9722_v20 = vcombine.high %v3024_v13, %v3028_v14  ;;  %v9721_v37 = vcombine.low %v3024_v13, %v3028_v14 }
 0x3ec   :  { %v3264_v25 = vld [vmem:[#allocation10 + $0xd88] sm:$0xff] }
 0x3ed   :  { %6168 = vmatpush1.bf16.msra.mxu0 %v9657_v3  ;;  %6209 = vmatpush1.bf16.msra.mxu1 %v9785_v6  ;;  %v3164_v3 = vld [vmem:[#allocation10 + $0xa68] sm:$0xff]  ;;  %v9737_v6 = vcombine.low %v3040_v53, %v3044_v32 }
 0x3ee   :  { %6169 = vmatprep.subr.bf16.mxu0 %v9778_v8  ;;  %6210 = vmatprep.subr.bf16.mxu1 %v9906_v10  ;;  %v9865_v8 = vcombine.low %v3168_v54, %v3172_v35  ;;  %v9730_v10 = vcombine.high %v3032_v62, %v3036_v63  ;;  %v9858_v12 = vcombine.high %v3160_v1, %v3164_v3  ;;  %v3268_v31 = vld [vmem:[#allocation10 + $0xda8] sm:$0xff] }
 0x3ef   :  { %v9857_v18 = vcombine.low %v3160_v1, %v3164_v3  ;;  %v9962_v32 = vcombine.high %v3264_v25, %v3268_v31  ;;  %v3256_v35 = vld [vmem:[#allocation10 + $0xd48] sm:$0xff]  ;;  %v9961_v1 = vcombine.low %v3264_v25, %v3268_v31 }
 0x3f0   :  { %v3248_v13 = vld [vmem:[#allocation10 + $0xd08] sm:$0xff] }
 0x3f1   :  { %6170 = vmatpush2.bf16.msra.mxu0 %v9777_v40  ;;  %6211 = vmatpush2.bf16.msra.mxu1 %v9905_v41  ;;  %v3156_v40 = vld [vmem:[#allocation10 + $0xa28] sm:$0xff] }
 0x3f2   :  { %6171 = vmatprep.subr.bf16.mxu0 %v9770_v48  ;;  %6212 = vmatprep.subr.bf16.mxu1 %v9898_v16  ;;  %v3344_v41 = vld [vmem:[#allocation16 + $0x3] ss:$8 sm:$0xf] }
 0x3f3   :  { %v3345_v48 = vld [vmem:[#allocation16 + $0x3] ss:$8 sm:$0xf0] }
 0x3f4   :  { %v3252_v14 = vld [vmem:[#allocation10 + $0xd28] sm:$0xff] }
 0x3f5   :  { %6172 = vmatpush2.bf16.msra.mxu0 %v9769_v21  ;;  %6213 = vmatpush2.bf16.msra.mxu1 %v9897_v23  ;;  %v9850_v21 = vcombine.high %v3152_v15, %v3156_v40  ;;  %v3272_v23 = vld [vmem:[#allocation10 + $0xdc8] sm:$0xff] }
 0x3f6   :  { %6173 = vmatprep.subr.bf16.mxu0 %v9762_v24  ;;  %6214 = vmatprep.subr.bf16.mxu1 %v9890_v26  ;;  %v11511_v24 = vor.u32 %v3345_v48, %v3344_v41  ;;  %v3276_v26 = vld [vmem:[#allocation10 + $0xde8] sm:$0xff]  ;;  %v2869_v41 = vld [vmem:[#allocation10 + $0x130] sm:$0xff] }
 0x3f8   :  { %v3351_v46 = vrot.slane %v11511_v24, %v11391_v45 }
 0x3f9   :  { %6174 = vmatpush2.bf16.msra.mxu0 %v9761_v38  ;;  %6215 = vmatpush2.bf16.msra.mxu1 %v9889_v39  ;;  %v9849_v38 = vcombine.low %v3152_v15, %v3156_v40  ;;  %v2865_v40 = vld [vmem:[#allocation10 + $0x110] sm:$0xff] }
 0x3fa   :  { %6175 = vmatprep.subr.bf16.mxu0 %v9754_v42  ;;  %6216 = vmatprep.subr.bf16.mxu1 %v9882_v43  ;;  %v9970_v42 = vcombine.high %v3272_v23, %v3276_v26  ;;  %v9588_v43 = vcombine.high %v2889_v29, %v2893_v33 }
 0x3fd   :  { %6176 = vmatpush2.bf16.msra.mxu0 %v9753_v49  ;;  %6217 = vmatpush2.bf16.msra.mxu1 %v9881_v50  ;;  %v2885_v49 = vld [vmem:[#allocation10 + $0x1b0] sm:$0xff]  ;;  %v3355_v50 = vrot.slane %v11511_v24, %v11394_v47 }
 0x3fe   :  { %6177 = vmatprep.subr.bf16.mxu0 %v9746_v51  ;;  %6218 = vmatprep.subr.bf16.mxu1 %v9874_v52  ;;  %v9969_v51 = vcombine.low %v3272_v23, %v3276_v26  ;;  %v9587_v52 = vcombine.low %v2889_v29, %v2893_v33  ;;  %v9580_v54 = vcombine.high %v2881_v30, %v2885_v49  ;;  %v2857_v23 = vld [vmem:[#allocation10 + $0xd0] sm:$0xff] }
 0x3ff   :  { %v2861_v26 = vld [vmem:[#allocation10 + $0xf0] sm:$0xff]  ;;  %v9945_v29 = vcombine.low %v3248_v13, %v3252_v14  ;;  %v9563_v33 = vcombine.low %v2865_v40, %v2869_v41 }
 0x400   :  { %v9555_v25 = vcombine.low %v2857_v23, %v2861_v26 }
 0x401   :  { %6178 = vmatpush2.bf16.msra.mxu0 %v9745_v57  ;;  %6219 = vmatpush2.bf16.msra.mxu1 %v9873_v58  ;;  %v3260_v57 = vld [vmem:[#allocation10 + $0xd68] sm:$0xff] }
 0x402   :  { %6179 = vmatprep.subr.bf16.mxu0 %v9738_v59  ;;  %6220 = vmatprep.subr.bf16.mxu1 %v9866_v61  ;;  %v2873_v59 = vld [vmem:[#allocation10 + $0x150] sm:$0xff]  ;;  %v9953_v48 = vcombine.low %v3256_v35, %v3260_v57 }
 0x403   :  { %v2877_v61 = vld [vmem:[#allocation10 + $0x170] sm:$0xff] }
 0x404   :  { %v5982_v16 = vpop.f32.mrf.mxu1 }
 0x405   :  { %6180 = vmatpush2.bf16.msra.mxu0 %v9737_v6  ;;  %6221 = vmatpush2.bf16.msra.mxu1 %v9865_v8  ;;  %v5983_v53 = vadd.f32 %v5982_v16, %v3351_v46  ;;  %v9579_v6 = vcombine.low %v2881_v30, %v2885_v49  ;;  %v9954_v8 = vcombine.high %v3256_v35, %v3260_v57  ;;  %v3224_v49 = vld [vmem:[#allocation10 + $0xc48] sm:$0xff] }
 0x406   :  { %v5984_v19 = vpop.f32.mrf.mxu1  ;;  %6181 = vmatprep.subr.bf16.mxu0 %v9730_v10  ;;  %6222 = vmatprep.subr.bf16.mxu1 %v9858_v12  ;;  %v9572_v12 = vcombine.high %v2873_v59, %v2877_v61  ;;  %v3216_v57 = vld [vmem:[#allocation10 + $0xc08] sm:$0xff] }
 0x407   :  { %v5985_v62 = vadd.f32 %v5984_v19, %v3355_v50  ;;  %v9564_v19 = vcombine.high %v2865_v40, %v2869_v41  ;;  %v3228_v50 = vld [vmem:[#allocation10 + $0xc68] sm:$0xff] }
 0x408   :  { %v5986_v34 = vpop.f32.mrf.mxu1 }
 0x409   :  { %6182 = vmatpush2.bf16.msra.mxu0 %v9729_v17  ;;  %6223 = vmatpush2.bf16.msra.mxu1 %v9857_v18  ;;  %v9571_v17 = vcombine.low %v2873_v59, %v2877_v61  ;;  %v9946_v18 = vcombine.high %v3248_v13, %v3252_v14  ;;  %v2833_v59 = vld [vmem:[#allocation10 + $0x10] sm:$0xff] }
 0x40a   :  { %v5987_v39 = vpop.f32.mrf.mxu1  ;;  %6183 = vmatprep.subr.bf16.mxu0 %v9722_v20  ;;  %6224 = vmatprep.subr.bf16.mxu1 %v9850_v21  ;;  %v3240_v20 = vld [vmem:[#allocation10 + $0xcc8] sm:$0xff]  ;;  %v2837_v61 = vld [vmem:[#allocation10 + $0x30] sm:$0xff] }
 0x40b   :  { %v3244_v21 = vld [vmem:[#allocation10 + $0xce8] sm:$0xff]  ;;  %v2953_v13 = vld [vmem:[#allocation10 + $0x3d0] sm:$0xff]  ;;  %v9531_v40 = vcombine.low %v2833_v59, %v2837_v61 }
 0x40c   :  { %v9938_v34 = vcombine.high %v3240_v20, %v3244_v21  ;;  %v3236_v39 = vld [vmem:[#allocation10 + $0xca8] sm:$0xff]  ;;  %v9937_v46 = vcombine.low %v3240_v20, %v3244_v21  ;;  %v2957_v14 = vld [vmem:[#allocation10 + $0x3f0] sm:$0xff] }
 0x40d   :  { %6184 = vmatpush2.bf16.msra.mxu0 %v9721_v37  ;;  %6225 = vmatpush2.bf16.msra.mxu1 %v9849_v38  ;;  %v9556_v37 = vcombine.high %v2857_v23, %v2861_v26  ;;  %v3232_v38 = vld [vmem:[#allocation10 + $0xc88] sm:$0xff]  ;;  %v9651_v21 = vcombine.low %v2953_v13, %v2957_v14 }
 0x40e   :  { %6235 = vmatprep.subr.bf16.mxu0 %v9970_v42  ;;  %6276 = vmatprep.subr.bf16.mxu1 %v9588_v43  ;;  %v2849_v42 = vld [vmem:[#allocation10 + $0x90] sm:$0xff]  ;;  %v9930_v31 = vcombine.high %v3232_v38, %v3236_v39 }
 0x40f   :  { %v2853_v43 = vld [vmem:[#allocation10 + $0xb0] sm:$0xff] }
 0x410   :  { %6186 = vmatmul.mubr.bf16.vlgmr.msra.gmra.mxu0 %v11464_v36  ;;  %6227 = vmatmul.mubr.bf16.vlgmr.msra.gmra.mxu1 %v11486_v7  ;;  %v6023_v58 = vpop.f32.mrf.mxu0  ;;  %v9548_v30 = vcombine.high %v2849_v42, %v2853_v43 }
 0x411   :  { %v11519_v63 = vadd.f32 %v6023_v58, %v5983_v53  ;;  %6236 = vmatpush1.bf16.msra.mxu0 %v9969_v51  ;;  %6267 = vmatprep.mubr.bf16.mxu0 %v11499_v55  ;;  %v2841_v51 = vld [vmem:[#allocation10 + $0x50] sm:$0xff]  ;;  %v9929_v53 = vcombine.low %v3232_v38, %v3236_v39  ;;  %v3220_v58 = vld [vmem:[#allocation10 + $0xc28] sm:$0xff] }
 0x412   :  { %6277 = vmatpush1.bf16.msra.mxu1 %v9587_v52  ;;  %6308 = vmatprep.mubr.bf16.mxu1 %v11440_v0  ;;  %v6025_v3 = vpop.f32.mrf.mxu0  ;;  %v2845_v52 = vld [vmem:[#allocation10 + $0x70] sm:$0xff] }
 0x413   :  { %v11523_v10 = vadd.f32 %v6025_v3, %v5985_v62  ;;  %6237 = vmatprep.subr.bf16.mxu0 %v9962_v32  ;;  %6278 = vmatprep.subr.bf16.mxu1 %v9580_v54  ;;  %v9547_v32 = vcombine.low %v2849_v42, %v2853_v43  ;;  %v9922_v54 = vcombine.high %v3224_v49, %v3228_v50 }
 0x414   :  { %v6027_v15 = vpop.f32.mrf.mxu0  ;;  %v9540_v35 = vcombine.high %v2841_v51, %v2845_v52  ;;  %v9921_v62 = vcombine.low %v3224_v49, %v3228_v50  ;;  %v9914_v3 = vcombine.high %v3216_v57, %v3220_v58 }
 0x415   :  { %6238 = vmatpush1.bf16.msra.mxu0 %v9961_v1  ;;  %v9539_v1 = vcombine.low %v2841_v51, %v2845_v52  ;;  %v9913_v15 = vcombine.low %v3216_v57, %v3220_v58 }
 0x416   :  { %6279 = vmatpush1.bf16.msra.mxu1 %v9579_v6  ;;  %v6028_v16 = vpop.f32.mrf.mxu0  ;;  %6239 = vmatprep.subr.bf16.mxu0 %v9954_v8  ;;  %v9532_v6 = vcombine.high %v2833_v59, %v2837_v61  ;;  %v3336_v8 = vld [vmem:[#allocation10 + $0xfc8] sm:$0xff] }
 0x417   :  { %6280 = vmatprep.subr.bf16.mxu1 %v9572_v12  ;;  %v3340_v12 = vld [vmem:[#allocation10 + $0xfe8] sm:$0xff] }
 0x418   :  { %v10034_v41 = vcombine.high %v3336_v8, %v3340_v12  ;;  %v3328_v16 = vld [vmem:[#allocation10 + $0xf88] sm:$0xff]  ;;  %v10033_v20 = vcombine.low %v3336_v8, %v3340_v12 }
 0x419   :  { %6240 = vmatpush1.bf16.msra.mxu0 %v9953_v48  ;;  %v9652_v48 = vcombine.high %v2953_v13, %v2957_v14 }
 0x41a   :  { %6281 = vmatpush1.bf16.msra.mxu1 %v9571_v17  ;;  %6241 = vmatprep.subr.bf16.mxu0 %v9946_v18  ;;  %v3332_v17 = vld [vmem:[#allocation10 + $0xfa8] sm:$0xff]  ;;  %v2945_v18 = vld [vmem:[#allocation10 + $0x390] sm:$0xff] }
 0x41b   :  { %6282 = vmatprep.subr.bf16.mxu1 %v9564_v19  ;;  %v2949_v19 = vld [vmem:[#allocation10 + $0x3b0] sm:$0xff]  ;;  %v10026_v23 = vcombine.high %v3328_v16, %v3332_v17  ;;  %v10025_v38 = vcombine.low %v3328_v16, %v3332_v17 }
 0x41c   :  { %v9644_v26 = vcombine.high %v2945_v18, %v2949_v19  ;;  %v9643_v39 = vcombine.low %v2945_v18, %v2949_v19 }
 0x41d   :  { %6242 = vmatpush1.bf16.msra.mxu0 %v9945_v29  ;;  %v3320_v29 = vld [vmem:[#allocation10 + $0xf48] sm:$0xff] }
 0x41e   :  { %6283 = vmatpush1.bf16.msra.mxu1 %v9563_v33  ;;  %6243 = vmatprep.subr.bf16.mxu0 %v9938_v34  ;;  %v3324_v33 = vld [vmem:[#allocation10 + $0xf68] sm:$0xff]  ;;  %v2937_v34 = vld [vmem:[#allocation10 + $0x350] sm:$0xff] }
 0x41f   :  { %6284 = vmatprep.subr.bf16.mxu1 %v9556_v37  ;;  %v2941_v37 = vld [vmem:[#allocation10 + $0x370] sm:$0xff]  ;;  %v10018_v42 = vcombine.high %v3320_v29, %v3324_v33  ;;  %v10017_v49 = vcombine.low %v3320_v29, %v3324_v33 }
 0x420   :  { %v9636_v43 = vcombine.high %v2937_v34, %v2941_v37  ;;  %v9635_v50 = vcombine.low %v2937_v34, %v2941_v37 }
 0x421   :  { %6244 = vmatpush1.bf16.msra.mxu0 %v9937_v46  ;;  %v3312_v46 = vld [vmem:[#allocation10 + $0xf08] sm:$0xff] }
 0x422   :  { %6285 = vmatpush1.bf16.msra.mxu1 %v9555_v25  ;;  %6245 = vmatprep.subr.bf16.mxu0 %v9930_v31  ;;  %v3316_v25 = vld [vmem:[#allocation10 + $0xf28] sm:$0xff]  ;;  %v2929_v31 = vld [vmem:[#allocation10 + $0x310] sm:$0xff] }
 0x423   :  { %6286 = vmatprep.subr.bf16.mxu1 %v9548_v30  ;;  %v2933_v30 = vld [vmem:[#allocation10 + $0x330] sm:$0xff]  ;;  %v10010_v51 = vcombine.high %v3312_v46, %v3316_v25  ;;  %v10009_v57 = vcombine.low %v3312_v46, %v3316_v25 }
 0x424   :  { %v9628_v52 = vcombine.high %v2929_v31, %v2933_v30  ;;  %v9627_v58 = vcombine.low %v2929_v31, %v2933_v30 }
 0x425   :  { %6246 = vmatpush1.bf16.msra.mxu0 %v9929_v53  ;;  %v3304_v53 = vld [vmem:[#allocation10 + $0xec8] sm:$0xff] }
 0x426   :  { %6287 = vmatpush1.bf16.msra.mxu1 %v9547_v32  ;;  %6247 = vmatprep.subr.bf16.mxu0 %v9922_v54  ;;  %v3308_v32 = vld [vmem:[#allocation10 + $0xee8] sm:$0xff]  ;;  %v2921_v54 = vld [vmem:[#allocation10 + $0x2d0] sm:$0xff] }
 0x427   :  { %6288 = vmatprep.subr.bf16.mxu1 %v9540_v35  ;;  %v2925_v35 = vld [vmem:[#allocation10 + $0x2f0] sm:$0xff]  ;;  %v10002_v59 = vcombine.high %v3304_v53, %v3308_v32  ;;  %v10001_v8 = vcombine.low %v3304_v53, %v3308_v32 }
 0x428   :  { %v9620_v61 = vcombine.high %v2921_v54, %v2925_v35  ;;  %v9619_v12 = vcombine.low %v2921_v54, %v2925_v35  ;;  %v3141_v53 = vld [vmem:[#allocation10 + $0x9b0] sm:$0xff] }
 0x429   :  { %6248 = vmatpush1.bf16.msra.mxu0 %v9921_v62  ;;  %v3296_v62 = vld [vmem:[#allocation10 + $0xe88] sm:$0xff]  ;;  %v3001_v35 = vld [vmem:[#allocation10 + $0x550] sm:$0xff] }
 0x42a   :  { %6289 = vmatpush1.bf16.msra.mxu1 %v9539_v1  ;;  %6249 = vmatprep.subr.bf16.mxu0 %v9914_v3  ;;  %v3300_v1 = vld [vmem:[#allocation10 + $0xea8] sm:$0xff]  ;;  %v2913_v3 = vld [vmem:[#allocation10 + $0x290] sm:$0xff] }
 0x42b   :  { %6290 = vmatprep.subr.bf16.mxu1 %v9532_v6  ;;  %v2917_v6 = vld [vmem:[#allocation10 + $0x2b0] sm:$0xff]  ;;  %v9994_v13 = vcombine.high %v3296_v62, %v3300_v1  ;;  %v9993_v16 = vcombine.low %v3296_v62, %v3300_v1 }
 0x42c   :  { %v9612_v14 = vcombine.high %v2913_v3, %v2917_v6  ;;  %v9611_v17 = vcombine.low %v2913_v3, %v2917_v6  ;;  %v3133_v62 = vld [vmem:[#allocation10 + $0x970] sm:$0xff] }
 0x42d   :  { %6250 = vmatpush1.bf16.msra.mxu0 %v9913_v15  ;;  %v3288_v15 = vld [vmem:[#allocation10 + $0xe48] sm:$0xff] }
 0x42e   :  { %6291 = vmatpush1.bf16.msra.mxu1 %v9531_v40  ;;  %6251 = vmatprep.subr.bf16.mxu0 %v10034_v41  ;;  %v3292_v40 = vld [vmem:[#allocation10 + $0xe68] sm:$0xff]  ;;  %v2905_v41 = vld [vmem:[#allocation10 + $0x250] sm:$0xff] }
 0x42f   :  { %6292 = vmatprep.subr.bf16.mxu1 %v9652_v48  ;;  %v2909_v48 = vld [vmem:[#allocation10 + $0x270] sm:$0xff]  ;;  %v9986_v18 = vcombine.high %v3288_v15, %v3292_v40  ;;  %v9985_v29 = vcombine.low %v3288_v15, %v3292_v40 }
 0x430   :  { %v9604_v19 = vcombine.high %v2905_v41, %v2909_v48  ;;  %v9603_v33 = vcombine.low %v2905_v41, %v2909_v48  ;;  %v2993_v15 = vld [vmem:[#allocation10 + $0x510] sm:$0xff] }
 0x431   :  { %6252 = vmatpush2.bf16.msra.mxu0 %v10033_v20  ;;  %v3280_v20 = vld [vmem:[#allocation10 + $0xe08] sm:$0xff]  ;;  %v2997_v40 = vld [vmem:[#allocation10 + $0x530] sm:$0xff] }
 0x432   :  { %6293 = vmatpush2.bf16.msra.mxu1 %v9651_v21  ;;  %6253 = vmatprep.subr.bf16.mxu0 %v10026_v23  ;;  %v3284_v21 = vld [vmem:[#allocation10 + $0xe28] sm:$0xff]  ;;  %v2897_v23 = vld [vmem:[#allocation10 + $0x210] sm:$0xff] }
 0x433   :  { %6294 = vmatprep.subr.bf16.mxu1 %v9644_v26  ;;  %v2901_v26 = vld [vmem:[#allocation10 + $0x230] sm:$0xff]  ;;  %v9978_v34 = vcombine.high %v3280_v20, %v3284_v21  ;;  %v9977_v46 = vcombine.low %v3280_v20, %v3284_v21 }
 0x434   :  { %v9596_v37 = vcombine.high %v2897_v23, %v2901_v26  ;;  %v9595_v25 = vcombine.low %v2897_v23, %v2901_v26  ;;  %v3121_v41 = vld [vmem:[#allocation10 + $0x910] sm:$0xff] }
 0x435   :  { %6254 = vmatpush2.bf16.msra.mxu0 %v10025_v38  ;;  %v3017_v38 = vld [vmem:[#allocation10 + $0x5d0] sm:$0xff] }
 0x436   :  { %6295 = vmatpush2.bf16.msra.mxu1 %v9643_v39  ;;  %6255 = vmatprep.subr.bf16.mxu0 %v10018_v42  ;;  %v3021_v39 = vld [vmem:[#allocation10 + $0x5f0] sm:$0xff] }
 0x437   :  { %6296 = vmatprep.subr.bf16.mxu1 %v9636_v43  ;;  %v3145_v42 = vld [vmem:[#allocation10 + $0x9d0] sm:$0xff]  ;;  %v9716_v31 = vcombine.high %v3017_v38, %v3021_v39 }
 0x438   :  { %v3149_v43 = vld [vmem:[#allocation10 + $0x9f0] sm:$0xff] }
 0x439   :  { %6256 = vmatpush2.bf16.msra.mxu0 %v10017_v49  ;;  %v9844_v30 = vcombine.high %v3145_v42, %v3149_v43  ;;  %v3009_v49 = vld [vmem:[#allocation10 + $0x590] sm:$0xff]  ;;  %v9843_v32 = vcombine.low %v3145_v42, %v3149_v43 }
 0x43a   :  { %6297 = vmatpush2.bf16.msra.mxu1 %v9635_v50  ;;  %6257 = vmatprep.subr.bf16.mxu0 %v10010_v51  ;;  %v3013_v50 = vld [vmem:[#allocation10 + $0x5b0] sm:$0xff]  ;;  %v9715_v51 = vcombine.low %v3017_v38, %v3021_v39 }
 0x43b   :  { %6298 = vmatprep.subr.bf16.mxu1 %v9628_v52  ;;  %v3137_v52 = vld [vmem:[#allocation10 + $0x990] sm:$0xff]  ;;  %v9708_v54 = vcombine.high %v3009_v49, %v3013_v50  ;;  %v9707_v3 = vcombine.low %v3009_v49, %v3013_v50 }
 0x43c   :  { %v3125_v48 = vld [vmem:[#allocation10 + $0x930] sm:$0xff] }
 0x43d   :  { %6258 = vmatpush2.bf16.msra.mxu0 %v10009_v57  ;;  %v3005_v57 = vld [vmem:[#allocation10 + $0x570] sm:$0xff]  ;;  %v9820_v20 = vcombine.high %v3121_v41, %v3125_v48 }
 0x43e   :  { %6299 = vmatpush2.bf16.msra.mxu1 %v9627_v58  ;;  %6259 = vmatprep.subr.bf16.mxu0 %v10002_v59  ;;  %v9836_v59 = vcombine.high %v3137_v52, %v3141_v53  ;;  %v2985_v21 = vld [vmem:[#allocation10 + $0x4d0] sm:$0xff] }
 0x43f   :  { %6300 = vmatprep.subr.bf16.mxu1 %v9620_v61  ;;  %v3129_v61 = vld [vmem:[#allocation10 + $0x950] sm:$0xff] }
 0x440   :  { %v3113_v23 = vld [vmem:[#allocation10 + $0x8d0] sm:$0xff] }
 0x441   :  { %6260 = vmatpush2.bf16.msra.mxu0 %v10001_v8  ;;  %v9835_v8 = vcombine.low %v3137_v52, %v3141_v53  ;;  %v3117_v26 = vld [vmem:[#allocation10 + $0x8f0] sm:$0xff] }
 0x442   :  { %6301 = vmatpush2.bf16.msra.mxu1 %v9619_v12  ;;  %6261 = vmatprep.subr.bf16.mxu0 %v9994_v13  ;;  %v9700_v12 = vcombine.high %v3001_v35, %v3005_v57  ;;  %v2977_v38 = vld [vmem:[#allocation10 + $0x490] sm:$0xff] }
 0x443   :  { %6302 = vmatprep.subr.bf16.mxu1 %v9612_v14  ;;  %v9828_v14 = vcombine.high %v3129_v61, %v3133_v62  ;;  %v2981_v39 = vld [vmem:[#allocation10 + $0x4b0] sm:$0xff] }
 0x444   :  { %v3105_v42 = vld [vmem:[#allocation10 + $0x890] sm:$0xff]  ;;  %v9675_v53 = vcombine.low %v2977_v38, %v2981_v39 }
 0x445   :  { %6262 = vmatpush2.bf16.msra.mxu0 %v9993_v16  ;;  %v9699_v16 = vcombine.low %v3001_v35, %v3005_v57  ;;  %v3109_v43 = vld [vmem:[#allocation10 + $0x8b0] sm:$0xff] }
 0x446   :  { %6303 = vmatpush2.bf16.msra.mxu1 %v9611_v17  ;;  %6263 = vmatprep.subr.bf16.mxu0 %v9986_v18  ;;  %v9827_v18 = vcombine.low %v3129_v61, %v3133_v62  ;;  %v2969_v49 = vld [vmem:[#allocation10 + $0x450] sm:$0xff] }
 0x447   :  { %6304 = vmatprep.subr.bf16.mxu1 %v9604_v19  ;;  %v9692_v19 = vcombine.high %v2993_v15, %v2997_v40  ;;  %v2973_v50 = vld [vmem:[#allocation10 + $0x470] sm:$0xff] }
 0x448   :  { %v3101_v52 = vld [vmem:[#allocation10 + $0x870] sm:$0xff]  ;;  %v9667_v62 = vcombine.low %v2969_v49, %v2973_v50 }
 0x449   :  { %6264 = vmatpush2.bf16.msra.mxu0 %v9985_v29  ;;  %v9691_v29 = vcombine.low %v2993_v15, %v2997_v40  ;;  %v2961_v57 = vld [vmem:[#allocation10 + $0x410] sm:$0xff] }
 0x44a   :  { %6305 = vmatpush2.bf16.msra.mxu1 %v9603_v33  ;;  %6265 = vmatprep.subr.bf16.mxu0 %v9978_v34  ;;  %v9819_v33 = vcombine.low %v3121_v41, %v3125_v48  ;;  %v3093_v61 = vld [vmem:[#allocation10 + $0x830] sm:$0xff] }
 0x44b   :  { %6306 = vmatprep.subr.bf16.mxu1 %v9596_v37  ;;  %v9812_v37 = vcombine.high %v3113_v23, %v3117_v26  ;;  %v3209_v15 = vld [vmem:[#allocation10 + $0xbd0] sm:$0xff] }
 0x44c   :  { %v3213_v40 = vld [vmem:[#allocation10 + $0xbf0] sm:$0xff] }
 0x44d   :  { %6266 = vmatpush2.bf16.msra.mxu0 %v9977_v46 }
 0x44e   :  { %6307 = vmatpush2.bf16.msra.mxu1 %v9595_v25  ;;  %6317 = vmatprep.subr.bf16.mxu0 %v9716_v31  ;;  %v9811_v25 = vcombine.low %v3113_v23, %v3117_v26  ;;  %v9676_v31 = vcombine.high %v2977_v38, %v2981_v39 }
 0x44f   :  { %6358 = vmatprep.subr.bf16.mxu1 %v9844_v30  ;;  %v9804_v30 = vcombine.high %v3105_v42, %v3109_v43 }
 0x450   :  { %6268 = vmatmul.mubr.bf16.vlgmr.msra.gmra.mxu0 %v11501_v56  ;;  %v6064_v58 = vpop.f32.mrf.mxu1 }
 0x451   :  { %6309 = vmatmul.mubr.bf16.vlgmr.msra.gmra.mxu1 %v11455_v60  ;;  %v11528_v1 = vadd.f32 %v6064_v58, %v11519_v63  ;;  %6318 = vmatpush1.bf16.msra.mxu0 %v9715_v51  ;;  %v3097_v51 = vld [vmem:[#allocation10 + $0x850] sm:$0xff] }
 0x452   :  { %6349 = vmatprep.mubr.bf16.mxu0 %v11460_v28  ;;  %6359 = vmatpush1.bf16.msra.mxu1 %v9843_v32  ;;  %v6066_v6 = vpop.f32.mrf.mxu1  ;;  %v9803_v32 = vcombine.low %v3105_v42, %v3109_v43  ;;  %v9796_v35 = vcombine.high %v3097_v51, %v3101_v52  ;;  %v2965_v58 = vld [vmem:[#allocation10 + $0x430] sm:$0xff] }
 0x453   :  { %6390 = vmatprep.mubr.bf16.mxu1 %v11484_v5  ;;  %v11533_v13 = vadd.f32 %v6066_v6, %v11523_v10  ;;  %6319 = vmatprep.subr.bf16.mxu0 %v9708_v54  ;;  %v2989_v10 = vld [vmem:[#allocation10 + $0x4f0] sm:$0xff]  ;;  %v9668_v54 = vcombine.high %v2969_v49, %v2973_v50  ;;  %v9660_v6 = vcombine.high %v2961_v57, %v2965_v58 }
 0x454   :  { %6360 = vmatprep.subr.bf16.mxu1 %v9836_v59  ;;  %v6068_v63 = vpop.f32.mrf.mxu1  ;;  %v9684_v34 = vcombine.high %v2985_v21, %v2989_v10  ;;  %v9683_v46 = vcombine.low %v2985_v21, %v2989_v10  ;;  %v3089_v59 = vld [vmem:[#allocation10 + $0x810] sm:$0xff]  ;;  %v9907_v10 = vcombine.low %v3209_v15, %v3213_v40 }
 0x455   :  { %6320 = vmatpush1.bf16.msra.mxu0 %v9707_v3  ;;  %v9795_v3 = vcombine.low %v3097_v51, %v3101_v52  ;;  %v9659_v63 = vcombine.low %v2961_v57, %v2965_v58  ;;  %v9787_v41 = vcombine.low %v3089_v59, %v3093_v61 }
 0x456   :  { %6361 = vmatpush1.bf16.msra.mxu1 %v9835_v8  ;;  %v6069_v17 = vpop.f32.mrf.mxu1  ;;  %6321 = vmatprep.subr.bf16.mxu0 %v9700_v12  ;;  %v9788_v8 = vcombine.high %v3089_v59, %v3093_v61  ;;  %v3081_v12 = vld [vmem:[#allocation10 + $0x7d0] sm:$0xff] }
 0x457   :  { %6362 = vmatprep.subr.bf16.mxu1 %v9828_v14  ;;  %v3085_v14 = vld [vmem:[#allocation10 + $0x7f0] sm:$0xff] }
 0x458   :  { %v9780_v48 = vcombine.high %v3081_v12, %v3085_v14  ;;  %v3073_v17 = vld [vmem:[#allocation10 + $0x790] sm:$0xff]  ;;  %v9779_v21 = vcombine.low %v3081_v12, %v3085_v14 }
 0x459   :  { %6322 = vmatpush1.bf16.msra.mxu0 %v9699_v16  ;;  %v9908_v16 = vcombine.high %v3209_v15, %v3213_v40 }
 0x45a   :  { %6363 = vmatpush1.bf16.msra.mxu1 %v9827_v18  ;;  %6323 = vmatprep.subr.bf16.mxu0 %v9692_v19  ;;  %v3077_v18 = vld [vmem:[#allocation10 + $0x7b0] sm:$0xff] }
 0x45b   :  { %6364 = vmatprep.subr.bf16.mxu1 %v9820_v20  ;;  %v3201_v19 = vld [vmem:[#allocation10 + $0xb90] sm:$0xff]  ;;  %v9772_v23 = vcombine.high %v3073_v17, %v3077_v18  ;;  %v9771_v38 = vcombine.low %v3073_v17, %v3077_v18 }
 0x45c   :  { %v3205_v20 = vld [vmem:[#allocation10 + $0xbb0] sm:$0xff] }
 0x45d   :  { %6324 = vmatpush1.bf16.msra.mxu0 %v9691_v29  ;;  %v9900_v26 = vcombine.high %v3201_v19, %v3205_v20  ;;  %v3065_v29 = vld [vmem:[#allocation10 + $0x750] sm:$0xff]  ;;  %v9899_v39 = vcombine.low %v3201_v19, %v3205_v20 }
 0x45e   :  { %6365 = vmatpush1.bf16.msra.mxu1 %v9819_v33  ;;  %6325 = vmatprep.subr.bf16.mxu0 %v9684_v34  ;;  %v3069_v33 = vld [vmem:[#allocation10 + $0x770] sm:$0xff] }
 0x45f   :  { %6366 = vmatprep.subr.bf16.mxu1 %v9812_v37  ;;  %v3193_v34 = vld [vmem:[#allocation10 + $0xb50] sm:$0xff]  ;;  %v9764_v42 = vcombine.high %v3065_v29, %v3069_v33  ;;  %v9763_v49 = vcombine.low %v3065_v29, %v3069_v33 }
 0x460   :  { %v3197_v37 = vld [vmem:[#allocation10 + $0xb70] sm:$0xff] }
 0x461   :  { %6326 = vmatpush1.bf16.msra.mxu0 %v9683_v46  ;;  %v9892_v43 = vcombine.high %v3193_v34, %v3197_v37  ;;  %v3057_v46 = vld [vmem:[#allocation10 + $0x710] sm:$0xff]  ;;  %v9891_v50 = vcombine.low %v3193_v34, %v3197_v37 }
 0x462   :  { %6367 = vmatpush1.bf16.msra.mxu1 %v9811_v25  ;;  %6327 = vmatprep.subr.bf16.mxu0 %v9676_v31  ;;  %v3061_v25 = vld [vmem:[#allocation10 + $0x730] sm:$0xff] }
 0x463   :  { %6368 = vmatprep.subr.bf16.mxu1 %v9804_v30  ;;  %v3185_v31 = vld [vmem:[#allocation10 + $0xb10] sm:$0xff]  ;;  %v9756_v51 = vcombine.high %v3057_v46, %v3061_v25  ;;  %v9755_v57 = vcombine.low %v3057_v46, %v3061_v25 }
 0x464   :  { %v3189_v30 = vld [vmem:[#allocation10 + $0xb30] sm:$0xff] }
 0x465   :  { %6328 = vmatpush1.bf16.msra.mxu0 %v9675_v53  ;;  %v9884_v52 = vcombine.high %v3185_v31, %v3189_v30  ;;  %v3049_v53 = vld [vmem:[#allocation10 + $0x6d0] sm:$0xff]  ;;  %v9883_v58 = vcombine.low %v3185_v31, %v3189_v30 }
 0x466   :  { %6369 = vmatpush1.bf16.msra.mxu1 %v9803_v32  ;;  %6329 = vmatprep.subr.bf16.mxu0 %v9668_v54  ;;  %v3053_v32 = vld [vmem:[#allocation10 + $0x6f0] sm:$0xff] }
 0x467   :  { %6370 = vmatprep.subr.bf16.mxu1 %v9796_v35  ;;  %v3177_v54 = vld [vmem:[#allocation10 + $0xad0] sm:$0xff]  ;;  %v9748_v59 = vcombine.high %v3049_v53, %v3053_v32  ;;  %v9747_v12 = vcombine.low %v3049_v53, %v3053_v32  ;;  %v2886_v53 = vld [vmem:[#allocation10 + $0x1b8] sm:$0xff] }
 0x468   :  { %v3181_v35 = vld [vmem:[#allocation10 + $0xaf0] sm:$0xff] }
 0x469   :  { %6330 = vmatpush1.bf16.msra.mxu0 %v9667_v62  ;;  %v9876_v61 = vcombine.high %v3177_v54, %v3181_v35  ;;  %v3041_v62 = vld [vmem:[#allocation10 + $0x690] sm:$0xff]  ;;  %v9875_v14 = vcombine.low %v3177_v54, %v3181_v35 }
 0x46a   :  { %6371 = vmatpush1.bf16.msra.mxu1 %v9795_v3  ;;  %6331 = vmatprep.subr.bf16.mxu0 %v9660_v6  ;;  %v3045_v3 = vld [vmem:[#allocation10 + $0x6b0] sm:$0xff] }
 0x46b   :  { %6372 = vmatprep.subr.bf16.mxu1 %v9788_v8  ;;  %v3169_v6 = vld [vmem:[#allocation10 + $0xa90] sm:$0xff]  ;;  %v9740_v15 = vcombine.high %v3041_v62, %v3045_v3  ;;  %v9739_v17 = vcombine.low %v3041_v62, %v3045_v3  ;;  %v2874_v62 = vld [vmem:[#allocation10 + $0x158] sm:$0xff] }
 0x46c   :  { %v3173_v8 = vld [vmem:[#allocation10 + $0xab0] sm:$0xff]  ;;  %v2878_v3 = vld [vmem:[#allocation10 + $0x178] sm:$0xff] }
 0x46d   :  { %6332 = vmatpush1.bf16.msra.mxu0 %v9659_v63  ;;  %v9868_v40 = vcombine.high %v3169_v6, %v3173_v8  ;;  %v3033_v63 = vld [vmem:[#allocation10 + $0x650] sm:$0xff]  ;;  %v9867_v18 = vcombine.low %v3169_v6, %v3173_v8 }
 0x46e   :  { %6373 = vmatpush1.bf16.msra.mxu1 %v9787_v41  ;;  %6333 = vmatprep.subr.bf16.mxu0 %v9780_v48  ;;  %v3037_v41 = vld [vmem:[#allocation10 + $0x670] sm:$0xff] }
 0x46f   :  { %6374 = vmatprep.subr.bf16.mxu1 %v9908_v16  ;;  %v3161_v48 = vld [vmem:[#allocation10 + $0xa50] sm:$0xff]  ;;  %v9732_v19 = vcombine.high %v3033_v63, %v3037_v41  ;;  %v9731_v29 = vcombine.low %v3033_v63, %v3037_v41  ;;  %v9574_v41 = vcombine.high %v2874_v62, %v2878_v3 }
 0x470   :  { %v3165_v16 = vld [vmem:[#allocation10 + $0xa70] sm:$0xff] }
 0x471   :  { %6334 = vmatpush2.bf16.msra.mxu0 %v9779_v21  ;;  %v9860_v20 = vcombine.high %v3161_v48, %v3165_v16  ;;  %v3025_v21 = vld [vmem:[#allocation10 + $0x610] sm:$0xff]  ;;  %v9859_v33 = vcombine.low %v3161_v48, %v3165_v16 }
 0x472   :  { %6375 = vmatpush2.bf16.msra.mxu1 %v9907_v10  ;;  %6335 = vmatprep.subr.bf16.mxu0 %v9772_v23  ;;  %v3029_v10 = vld [vmem:[#allocation10 + $0x630] sm:$0xff] }
 0x473   :  { %6376 = vmatprep.subr.bf16.mxu1 %v9900_v26  ;;  %v3153_v23 = vld [vmem:[#allocation10 + $0xa10] sm:$0xff]  ;;  %v9724_v34 = vcombine.high %v3025_v21, %v3029_v10  ;;  %v9723_v46 = vcombine.low %v3025_v21, %v3029_v10 }
 0x474   :  { %v3157_v26 = vld [vmem:[#allocation10 + $0xa30] sm:$0xff] }
 0x475   :  { %6336 = vmatpush2.bf16.msra.mxu0 %v9771_v38  ;;  %v9852_v37 = vcombine.high %v3153_v23, %v3157_v26  ;;  %v3273_v38 = vld [vmem:[#allocation10 + $0xdd0] sm:$0xff]  ;;  %v9851_v25 = vcombine.low %v3153_v23, %v3157_v26  ;;  %v9573_v23 = vcombine.low %v2874_v62, %v2878_v3 }
 0x476   :  { %6377 = vmatpush2.bf16.msra.mxu1 %v9899_v39  ;;  %6337 = vmatprep.subr.bf16.mxu0 %v9764_v42  ;;  %v3277_v39 = vld [vmem:[#allocation10 + $0xdf0] sm:$0xff]  ;;  %v2890_v42 = vld [vmem:[#allocation10 + $0x1d8] sm:$0xff] }
 0x477   :  { %6378 = vmatprep.subr.bf16.mxu1 %v9892_v43  ;;  %v2894_v43 = vld [vmem:[#allocation10 + $0x1f8] sm:$0xff]  ;;  %v9972_v31 = vcombine.high %v3273_v38, %v3277_v39  ;;  %v3257_v35 = vld [vmem:[#allocation10 + $0xd50] sm:$0xff] }
 0x478   :  { %v9590_v30 = vcombine.high %v2890_v42, %v2894_v43  ;;  %v9589_v32 = vcombine.low %v2890_v42, %v2894_v43  ;;  %v3249_v48 = vld [vmem:[#allocation10 + $0xd10] sm:$0xff] }
 0x479   :  { %6338 = vmatpush2.bf16.msra.mxu0 %v9763_v49  ;;  %v3265_v49 = vld [vmem:[#allocation10 + $0xd90] sm:$0xff] }
 0x47a   :  { %6379 = vmatpush2.bf16.msra.mxu1 %v9891_v50  ;;  %6339 = vmatprep.subr.bf16.mxu0 %v9756_v51  ;;  %v3269_v50 = vld [vmem:[#allocation10 + $0xdb0] sm:$0xff]  ;;  %v9971_v51 = vcombine.low %v3273_v38, %v3277_v39 }
 0x47b   :  { %6380 = vmatprep.subr.bf16.mxu1 %v9884_v52  ;;  %v2882_v52 = vld [vmem:[#allocation10 + $0x198] sm:$0xff]  ;;  %v9964_v54 = vcombine.high %v3265_v49, %v3269_v50  ;;  %v9963_v8 = vcombine.low %v3265_v49, %v3269_v50  ;;  %v3241_v26 = vld [vmem:[#allocation10 + $0xcd0] sm:$0xff] }
 0x47c   :  { %v3233_v43 = vld [vmem:[#allocation10 + $0xc90] sm:$0xff] }
 0x47d   :  { %6340 = vmatpush2.bf16.msra.mxu0 %v9755_v57  ;;  %v3261_v57 = vld [vmem:[#allocation10 + $0xd70] sm:$0xff] }
 0x47e   :  { %6381 = vmatpush2.bf16.msra.mxu1 %v9883_v58  ;;  %6341 = vmatprep.subr.bf16.mxu0 %v9748_v59  ;;  %v3217_v62 = vld [vmem:[#allocation10 + $0xc10] sm:$0xff] }
 0x47f   :  { %6382 = vmatprep.subr.bf16.mxu1 %v9876_v61  ;;  %v9582_v61 = vcombine.high %v2882_v52, %v2886_v53  ;;  %v3221_v3 = vld [vmem:[#allocation10 + $0xc30] sm:$0xff] }
 0x481   :  { %6342 = vmatpush2.bf16.msra.mxu0 %v9747_v12 }
 0x482   :  { %6383 = vmatpush2.bf16.msra.mxu1 %v9875_v14  ;;  %6343 = vmatprep.subr.bf16.mxu0 %v9740_v15  ;;  %v9581_v15 = vcombine.low %v2882_v52, %v2886_v53  ;;  %v3225_v52 = vld [vmem:[#allocation10 + $0xc50] sm:$0xff] }
 0x483   :  { %6384 = vmatprep.subr.bf16.mxu1 %v9868_v40  ;;  %v9956_v40 = vcombine.high %v3257_v35, %v3261_v57  ;;  %v3229_v53 = vld [vmem:[#allocation10 + $0xc70] sm:$0xff] }
 0x485   :  { %6344 = vmatpush2.bf16.msra.mxu0 %v9739_v17 }
 0x486   :  { %6385 = vmatpush2.bf16.msra.mxu1 %v9867_v18  ;;  %6345 = vmatprep.subr.bf16.mxu0 %v9732_v19  ;;  %v2866_v18 = vld [vmem:[#allocation10 + $0x118] sm:$0xff] }
 0x487   :  { %6386 = vmatprep.subr.bf16.mxu1 %v9860_v20  ;;  %v2870_v19 = vld [vmem:[#allocation10 + $0x138] sm:$0xff]  ;;  %v9955_v20 = vcombine.low %v3257_v35, %v3261_v57 }
 0x488   :  { %v9565_v38 = vcombine.low %v2866_v18, %v2870_v19 }
 0x489   :  { %6346 = vmatpush2.bf16.msra.mxu0 %v9731_v29  ;;  %v3245_v29 = vld [vmem:[#allocation10 + $0xcf0] sm:$0xff] }
 0x48a   :  { %6387 = vmatpush2.bf16.msra.mxu1 %v9859_v33  ;;  %6347 = vmatprep.subr.bf16.mxu0 %v9724_v34  ;;  %v2858_v33 = vld [vmem:[#allocation10 + $0xd8] sm:$0xff]  ;;  %v9940_v39 = vcombine.high %v3241_v26, %v3245_v29 }
 0x48b   :  { %6388 = vmatprep.subr.bf16.mxu1 %v9852_v37  ;;  %v2862_v34 = vld [vmem:[#allocation10 + $0xf8] sm:$0xff] }
 0x48c   :  { %v9558_v42 = vcombine.high %v2858_v33, %v2862_v34  ;;  %v9557_v49 = vcombine.low %v2858_v33, %v2862_v34 }
 0x48d   :  { %6348 = vmatpush2.bf16.msra.mxu0 %v9723_v46  ;;  %v3237_v46 = vld [vmem:[#allocation10 + $0xcb0] sm:$0xff] }
 0x48e   :  { %6389 = vmatpush2.bf16.msra.mxu1 %v9851_v25  ;;  %6399 = vmatprep.subr.bf16.mxu0 %v9972_v31  ;;  %v2850_v25 = vld [vmem:[#allocation10 + $0x98] sm:$0xff]  ;;  %v9932_v50 = vcombine.high %v3233_v43, %v3237_v46  ;;  %v9931_v35 = vcombine.low %v3233_v43, %v3237_v46 }
 0x48f   :  { %6440 = vmatprep.subr.bf16.mxu1 %v9590_v30  ;;  %v2854_v31 = vld [vmem:[#allocation10 + $0xb8] sm:$0xff]  ;;  %v9939_v30 = vcombine.low %v3241_v26, %v3245_v29 }
 0x490   :  { %v11535_v58 = vpop.f32.mrf.mxu1  ;;  %6350 = vmatmul.mubr.bf16.vlgmr.msra.gmra.mxu0 %v11464_v36  ;;  %v6105_v59 = vpop.f32.mrf.mxu0  ;;  %v9549_v57 = vcombine.low %v2850_v25, %v2854_v31  ;;  %v2950_v26 = vld [vmem:[#allocation10 + $0x3b8] sm:$0xff] }
 0x491   :  { %6391 = vmatmul.mubr.bf16.vlgmr.msra.gmra.mxu1 %v11486_v7  ;;  %v11540_v6 = vadd.f32 %v6105_v59, %v11528_v1  ;;  %6400 = vmatpush1.bf16.msra.mxu0 %v9971_v51  ;;  %v3253_v1 = vld [vmem:[#allocation10 + $0xd30] sm:$0xff]  ;;  %v9550_v51 = vcombine.high %v2850_v25, %v2854_v31  ;;  %v9924_v59 = vcombine.high %v3225_v52, %v3229_v53  ;;  %v2942_v43 = vld [vmem:[#allocation10 + $0x378] sm:$0xff] }
 0x492   :  { %6431 = vmatprep.mubr.bf16.mxu0 %v11499_v55  ;;  %6441 = vmatpush1.bf16.msra.mxu1 %v9589_v32  ;;  %v11543_v12 = vpop.f32.mrf.mxu1  ;;  %v6107_v14 = vpop.f32.mrf.mxu0  ;;  %v9947_v37 = vcombine.low %v3249_v48, %v3253_v1  ;;  %v2842_v32 = vld [vmem:[#allocation10 + $0x58] sm:$0xff] }
 0x493   :  { %6472 = vmatprep.mubr.bf16.mxu1 %v11440_v0  ;;  %v11547_v63 = vadd.f32 %v6107_v14, %v11533_v13  ;;  %6401 = vmatprep.subr.bf16.mxu0 %v9964_v54  ;;  %v9948_v0 = vcombine.high %v3249_v48, %v3253_v1  ;;  %v9566_v13 = vcombine.high %v2866_v18, %v2870_v19  ;;  %v2846_v54 = vld [vmem:[#allocation10 + $0x78] sm:$0xff]  ;;  %v3337_v1 = vld [vmem:[#allocation10 + $0xfd0] sm:$0xff] }
 0x494   :  { %v6150_v16 = vpop.f32.mrf.mxu1  ;;  %6442 = vmatprep.subr.bf16.mxu1 %v9582_v61  ;;  %v6109_v17 = vpop.f32.mrf.mxu0  ;;  %v9542_v61 = vcombine.high %v2842_v32, %v2846_v54  ;;  %v2838_v14 = vld [vmem:[#allocation10 + $0x38] sm:$0xff]  ;;  %v9915_v19 = vcombine.low %v3217_v62, %v3221_v3 }
 0x495   :  { %6402 = vmatpush1.bf16.msra.mxu0 %v9963_v8  ;;  %v2834_v8 = vld [vmem:[#allocation10 + $0x18] sm:$0xff]  ;;  %v3341_v16 = vld [vmem:[#allocation10 + $0xff0] sm:$0xff] }
 0x496   :  { %6443 = vmatpush1.bf16.msra.mxu1 %v9581_v15  ;;  %v6151_v21 = vpop.f32.mrf.mxu1  ;;  %v6110_v10 = vpop.f32.mrf.mxu0  ;;  %6403 = vmatprep.subr.bf16.mxu0 %v9956_v40  ;;  %v9923_v15 = vcombine.low %v3225_v52, %v3229_v53  ;;  %v9541_v40 = vcombine.low %v2842_v32, %v2846_v54  ;;  %v9534_v48 = vcombine.high %v2834_v8, %v2838_v14  ;;  %v2954_v17 = vld [vmem:[#allocation10 + $0x3d8] sm:$0xff] }
 0x497   :  { %6444 = vmatprep.subr.bf16.mxu1 %v9574_v41  ;;  %v9916_v41 = vcombine.high %v3217_v62, %v3221_v3  ;;  %v2958_v18 = vld [vmem:[#allocation10 + $0x3f8] sm:$0xff]  ;;  %v10036_v21 = vcombine.high %v3337_v1, %v3341_v16  ;;  %v10035_v29 = vcombine.low %v3337_v1, %v3341_v16 }
 0x498   :  { %v9654_v10 = vcombine.high %v2954_v17, %v2958_v18  ;;  %v9653_v33 = vcombine.low %v2954_v17, %v2958_v18  ;;  %v2934_v52 = vld [vmem:[#allocation10 + $0x338] sm:$0xff] }
 0x499   :  { %6404 = vmatpush1.bf16.msra.mxu0 %v9955_v20  ;;  %v9533_v20 = vcombine.low %v2834_v8, %v2838_v14  ;;  %v2926_v62 = vld [vmem:[#allocation10 + $0x2f8] sm:$0xff] }
 0x49a   :  { %6445 = vmatpush1.bf16.msra.mxu1 %v9573_v23  ;;  %6405 = vmatprep.subr.bf16.mxu0 %v9948_v0  ;;  %v3329_v23 = vld [vmem:[#allocation10 + $0xf90] sm:$0xff]  ;;  %v2918_v1 = vld [vmem:[#allocation10 + $0x2b8] sm:$0xff] }
 0x49b   :  { %6446 = vmatprep.subr.bf16.mxu1 %v9566_v13  ;;  %v3333_v0 = vld [vmem:[#allocation10 + $0xfb0] sm:$0xff]  ;;  %v2946_v13 = vld [vmem:[#allocation10 + $0x398] sm:$0xff] }
 0x49c   :  { %v10028_v34 = vcombine.high %v3329_v23, %v3333_v0  ;;  %v10027_v46 = vcombine.low %v3329_v23, %v3333_v0  ;;  %v9645_v25 = vcombine.low %v2946_v13, %v2950_v26  ;;  %v2910_v23 = vld [vmem:[#allocation10 + $0x278] sm:$0xff] }
 0x49d   :  { %6406 = vmatpush1.bf16.msra.mxu0 %v9947_v37  ;;  %v9646_v37 = vcombine.high %v2946_v13, %v2950_v26 }
 0x49e   :  { %6447 = vmatpush1.bf16.msra.mxu1 %v9565_v38  ;;  %6407 = vmatprep.subr.bf16.mxu0 %v9940_v39  ;;  %v3321_v38 = vld [vmem:[#allocation10 + $0xf50] sm:$0xff] }
 0x49f   :  { %6448 = vmatprep.subr.bf16.mxu1 %v9558_v42  ;;  %v3325_v39 = vld [vmem:[#allocation10 + $0xf70] sm:$0xff]  ;;  %v2938_v42 = vld [vmem:[#allocation10 + $0x358] sm:$0xff] }
 0x4a0   :  { %v10020_v31 = vcombine.high %v3321_v38, %v3325_v39  ;;  %v10019_v53 = vcombine.low %v3321_v38, %v3325_v39  ;;  %v9637_v32 = vcombine.low %v2938_v42, %v2942_v43  ;;  %v2902_v38 = vld [vmem:[#allocation10 + $0x238] sm:$0xff] }
 0x4a1   :  { %6408 = vmatpush1.bf16.msra.mxu0 %v9939_v30  ;;  %v9638_v30 = vcombine.high %v2938_v42, %v2942_v43 }
 0x4a2   :  { %6449 = vmatpush1.bf16.msra.mxu1 %v9557_v49  ;;  %6409 = vmatprep.subr.bf16.mxu0 %v9932_v50  ;;  %v3313_v49 = vld [vmem:[#allocation10 + $0xf10] sm:$0xff] }
 0x4a3   :  { %6450 = vmatprep.subr.bf16.mxu1 %v9550_v51  ;;  %v3317_v50 = vld [vmem:[#allocation10 + $0xf30] sm:$0xff]  ;;  %v2930_v51 = vld [vmem:[#allocation10 + $0x318] sm:$0xff] }
 0x4a4   :  { %v10012_v54 = vcombine.high %v3313_v49, %v3317_v50  ;;  %v10011_v3 = vcombine.low %v3313_v49, %v3317_v50  ;;  %v9629_v8 = vcombine.low %v2930_v51, %v2934_v52  ;;  %v3150_v49 = vld [vmem:[#allocation10 + $0x9f8] sm:$0xff] }
 0x4a5   :  { %6410 = vmatpush1.bf16.msra.mxu0 %v9931_v35  ;;  %v9630_v35 = vcombine.high %v2930_v51, %v2934_v52 }
 0x4a6   :  { %6451 = vmatpush1.bf16.msra.mxu1 %v9549_v57  ;;  %6411 = vmatprep.subr.bf16.mxu0 %v9924_v59  ;;  %v3305_v57 = vld [vmem:[#allocation10 + $0xed0] sm:$0xff] }
 0x4a7   :  { %6452 = vmatprep.subr.bf16.mxu1 %v9542_v61  ;;  %v3309_v59 = vld [vmem:[#allocation10 + $0xef0] sm:$0xff]  ;;  %v2922_v61 = vld [vmem:[#allocation10 + $0x2d8] sm:$0xff] }
 0x4a8   :  { %v10004_v14 = vcombine.high %v3305_v57, %v3309_v59  ;;  %v10003_v16 = vcombine.low %v3305_v57, %v3309_v59  ;;  %v9621_v17 = vcombine.low %v2922_v61, %v2926_v62  ;;  %v3363_v57 = vrot.slane %v11511_v24, %v11402_v4 }
 0x4a9   :  { %6412 = vmatpush1.bf16.msra.mxu0 %v9923_v15  ;;  %v9622_v15 = vcombine.high %v2922_v61, %v2926_v62  ;;  %v3138_v61 = vld [vmem:[#allocation10 + $0x998] sm:$0xff] }
 0x4aa   :  { %6453 = vmatpush1.bf16.msra.mxu1 %v9541_v40  ;;  %6413 = vmatprep.subr.bf16.mxu0 %v9916_v41  ;;  %v3297_v40 = vld [vmem:[#allocation10 + $0xe90] sm:$0xff]  ;;  %v3142_v62 = vld [vmem:[#allocation10 + $0x9b8] sm:$0xff] }
 0x4ab   :  { %6454 = vmatprep.subr.bf16.mxu1 %v9534_v48  ;;  %v3301_v41 = vld [vmem:[#allocation10 + $0xeb0] sm:$0xff]  ;;  %v2914_v48 = vld [vmem:[#allocation10 + $0x298] sm:$0xff] }
 0x4ac   :  { %v9996_v18 = vcombine.high %v3297_v40, %v3301_v41  ;;  %v9995_v0 = vcombine.low %v3297_v40, %v3301_v41  ;;  %v9613_v13 = vcombine.low %v2914_v48, %v2918_v1  ;;  %v3006_v40 = vld [vmem:[#allocation10 + $0x578] sm:$0xff] }
 0x4ad   :  { %6414 = vmatpush1.bf16.msra.mxu0 %v9915_v19  ;;  %v9614_v19 = vcombine.high %v2914_v48, %v2918_v1  ;;  %v9838_v1 = vcombine.high %v3138_v61, %v3142_v62 }
 0x4ae   :  { %6455 = vmatpush1.bf16.msra.mxu1 %v9533_v20  ;;  %6415 = vmatprep.subr.bf16.mxu0 %v10036_v21  ;;  %v3289_v20 = vld [vmem:[#allocation10 + $0xe50] sm:$0xff] }
 0x4af   :  { %6456 = vmatprep.subr.bf16.mxu1 %v9654_v10  ;;  %v3293_v21 = vld [vmem:[#allocation10 + $0xe70] sm:$0xff]  ;;  %v2906_v10 = vld [vmem:[#allocation10 + $0x258] sm:$0xff] }
 0x4b0   :  { %v9988_v26 = vcombine.high %v3289_v20, %v3293_v21  ;;  %v9987_v39 = vcombine.low %v3289_v20, %v3293_v21  ;;  %v9605_v42 = vcombine.low %v2906_v10, %v2910_v23 }
 0x4b1   :  { %6416 = vmatpush2.bf16.msra.mxu0 %v10035_v29  ;;  %v9606_v29 = vcombine.high %v2906_v10, %v2910_v23  ;;  %v9837_v10 = vcombine.low %v3138_v61, %v3142_v62 }
 0x4b2   :  { %6457 = vmatpush2.bf16.msra.mxu1 %v9653_v33  ;;  %6417 = vmatprep.subr.bf16.mxu0 %v10028_v34  ;;  %v3281_v33 = vld [vmem:[#allocation10 + $0xe10] sm:$0xff] }
 0x4b3   :  { %6458 = vmatprep.subr.bf16.mxu1 %v9646_v37  ;;  %v3285_v34 = vld [vmem:[#allocation10 + $0xe30] sm:$0xff]  ;;  %v2898_v37 = vld [vmem:[#allocation10 + $0x218] sm:$0xff] }
 0x4b4   :  { %v9980_v43 = vcombine.high %v3281_v33, %v3285_v34  ;;  %v9979_v50 = vcombine.low %v3281_v33, %v3285_v34  ;;  %v9597_v51 = vcombine.low %v2898_v37, %v2902_v38  ;;  %v3122_v34 = vld [vmem:[#allocation10 + $0x918] sm:$0xff] }
 0x4b5   :  { %6418 = vmatpush2.bf16.msra.mxu0 %v10027_v46  ;;  %v9598_v46 = vcombine.high %v2898_v37, %v2902_v38  ;;  %v3126_v37 = vld [vmem:[#allocation10 + $0x938] sm:$0xff] }
 0x4b6   :  { %6459 = vmatpush2.bf16.msra.mxu1 %v9645_v25  ;;  %6419 = vmatprep.subr.bf16.mxu0 %v10020_v31  ;;  %v3018_v25 = vld [vmem:[#allocation10 + $0x5d8] sm:$0xff] }
 0x4b7   :  { %6460 = vmatprep.subr.bf16.mxu1 %v9638_v30  ;;  %v3022_v31 = vld [vmem:[#allocation10 + $0x5f8] sm:$0xff] }
 0x4b8   :  { %v3146_v30 = vld [vmem:[#allocation10 + $0x9d8] sm:$0xff]  ;;  %v9718_v52 = vcombine.high %v3018_v25, %v3022_v31  ;;  %v9717_v59 = vcombine.low %v3018_v25, %v3022_v31 }
 0x4b9   :  { %6420 = vmatpush2.bf16.msra.mxu0 %v10019_v53  ;;  %v3359_v53 = vrot.slane %v11511_v24, %v11399_v2  ;;  %v2986_v25 = vld [vmem:[#allocation10 + $0x4d8] sm:$0xff] }
 0x4ba   :  { %6461 = vmatpush2.bf16.msra.mxu1 %v9637_v32  ;;  %6421 = vmatprep.subr.bf16.mxu0 %v10012_v54  ;;  %v9846_v32 = vcombine.high %v3146_v30, %v3150_v49  ;;  %v3010_v54 = vld [vmem:[#allocation10 + $0x598] sm:$0xff] }
 0x4bb   :  { %6462 = vmatprep.subr.bf16.mxu1 %v9630_v35  ;;  %v3014_v35 = vld [vmem:[#allocation10 + $0x5b8] sm:$0xff] }
 0x4bc   :  { %v9709_v20 = vcombine.low %v3010_v54, %v3014_v35  ;;  %v2990_v31 = vld [vmem:[#allocation10 + $0x4f8] sm:$0xff] }
 0x4bd   :  { %6422 = vmatpush2.bf16.msra.mxu0 %v10011_v3  ;;  %v9845_v3 = vcombine.low %v3146_v30, %v3150_v49  ;;  %v3114_v30 = vld [vmem:[#allocation10 + $0x8d8] sm:$0xff] }
 0x4be   :  { %6463 = vmatpush2.bf16.msra.mxu1 %v9629_v8  ;;  %6423 = vmatprep.subr.bf16.mxu0 %v10004_v14  ;;  %v6147_v8 = vadd.f32 %v11535_v58, %v3359_v53  ;;  %v9710_v14 = vcombine.high %v3010_v54, %v3014_v35  ;;  %v3118_v49 = vld [vmem:[#allocation10 + $0x8f8] sm:$0xff] }
 0x4bf   :  { %6464 = vmatprep.subr.bf16.mxu1 %v9622_v15  ;;  %v3002_v15 = vld [vmem:[#allocation10 + $0x558] sm:$0xff]  ;;  %v9814_v53 = vcombine.high %v3114_v30, %v3118_v49  ;;  %v9813_v61 = vcombine.low %v3114_v30, %v3118_v49 }
 0x4c0   :  { %v9702_v23 = vcombine.high %v3002_v15, %v3006_v40  ;;  %v9701_v38 = vcombine.low %v3002_v15, %v3006_v40  ;;  %v2982_v54 = vld [vmem:[#allocation10 + $0x4b8] sm:$0xff] }
 0x4c1   :  { %6424 = vmatpush2.bf16.msra.mxu0 %v10003_v16  ;;  %v3130_v16 = vld [vmem:[#allocation10 + $0x958] sm:$0xff] }
 0x4c2   :  { %6465 = vmatpush2.bf16.msra.mxu1 %v9621_v17  ;;  %6425 = vmatprep.subr.bf16.mxu0 %v9996_v18  ;;  %v3134_v17 = vld [vmem:[#allocation10 + $0x978] sm:$0xff]  ;;  %v6149_v18 = vadd.f32 %v11543_v12, %v3363_v57 }
 0x4c3   :  { %6466 = vmatprep.subr.bf16.mxu1 %v9614_v19  ;;  %v2994_v12 = vld [vmem:[#allocation10 + $0x518] sm:$0xff] }
 0x4c4   :  { %v3106_v35 = vld [vmem:[#allocation10 + $0x898] sm:$0xff] }
 0x4c5   :  { %6426 = vmatpush2.bf16.msra.mxu0 %v9995_v0  ;;  %v3110_v57 = vld [vmem:[#allocation10 + $0x8b8] sm:$0xff] }
 0x4c6   :  { %6467 = vmatpush2.bf16.msra.mxu1 %v9613_v13  ;;  %6427 = vmatprep.subr.bf16.mxu0 %v9988_v26  ;;  %v9830_v26 = vcombine.high %v3130_v16, %v3134_v17  ;;  %v3098_v15 = vld [vmem:[#allocation10 + $0x858] sm:$0xff] }
 0x4c7   :  { %6468 = vmatprep.subr.bf16.mxu1 %v9606_v29  ;;  %v2998_v29 = vld [vmem:[#allocation10 + $0x538] sm:$0xff] }
 0x4c8   :  { %v3102_v40 = vld [vmem:[#allocation10 + $0x878] sm:$0xff] }
 0x4c9   :  { %6428 = vmatpush2.bf16.msra.mxu0 %v9987_v39  ;;  %v3066_v30 = vld [vmem:[#allocation10 + $0x758] sm:$0xff] }
 0x4ca   :  { %6469 = vmatpush2.bf16.msra.mxu1 %v9605_v42  ;;  %6429 = vmatprep.subr.bf16.mxu0 %v9980_v43  ;;  %v9829_v43 = vcombine.low %v3130_v16, %v3134_v17  ;;  %v9798_v16 = vcombine.high %v3098_v15, %v3102_v40  ;;  %v2962_v17 = vld [vmem:[#allocation10 + $0x418] sm:$0xff] }
 0x4cb   :  { %6470 = vmatprep.subr.bf16.mxu1 %v9598_v46  ;;  %v9822_v46 = vcombine.high %v3122_v34, %v3126_v37  ;;  %v3070_v49 = vld [vmem:[#allocation10 + $0x778] sm:$0xff] }
 0x4cd   :  { %6430 = vmatpush2.bf16.msra.mxu0 %v9979_v50  ;;  %v9693_v50 = vcombine.low %v2994_v12, %v2998_v29 }
 0x4ce   :  { %6471 = vmatpush2.bf16.msra.mxu1 %v9597_v51  ;;  %6481 = vmatprep.subr.bf16.mxu0 %v9718_v52  ;;  %v9821_v51 = vcombine.low %v3122_v34, %v3126_v37  ;;  %v9686_v52 = vcombine.high %v2986_v25, %v2990_v31 }
 0x4cf   :  { %6522 = vmatprep.subr.bf16.mxu1 %v9846_v32  ;;  %v2978_v32 = vld [vmem:[#allocation10 + $0x498] sm:$0xff] }
 0x4d0   :  { %v6187_v41 = vpop.f32.mrf.mxu0  ;;  %v6228_v48 = vpop.f32.mrf.mxu1  ;;  %6432 = vmatmul.mubr.bf16.vlgmr.msra.gmra.mxu0 %v11501_v56  ;;  %v9678_v62 = vcombine.high %v2978_v32, %v2982_v54 }
 0x4d1   :  { %v6188_v19 = vadd.f32 %v6187_v41, %v6147_v8  ;;  %6473 = vmatmul.mubr.bf16.vlgmr.msra.gmra.mxu1 %v11455_v60  ;;  %6482 = vmatpush1.bf16.msra.mxu0 %v9717_v59  ;;  %v9685_v59 = vcombine.low %v2986_v25, %v2990_v31  ;;  %v2970_v8 = vld [vmem:[#allocation10 + $0x458] sm:$0xff]  ;;  %v9677_v41 = vcombine.low %v2978_v32, %v2982_v54 }
 0x4d2   :  { %6513 = vmatprep.mubr.bf16.mxu0 %v11460_v28  ;;  %6523 = vmatpush1.bf16.msra.mxu1 %v9845_v3  ;;  %v6189_v58 = vpop.f32.mrf.mxu0  ;;  %v6230_v21 = vpop.f32.mrf.mxu1  ;;  %v9806_v3 = vcombine.high %v3106_v35, %v3110_v57  ;;  %v9766_v32 = vcombine.high %v3066_v30, %v3070_v49 }
 0x4d3   :  { %v11558_v0 = vadd.f32 %v6228_v48, %v6188_v19  ;;  %6554 = vmatprep.mubr.bf16.mxu1 %v11484_v5  ;;  %v6190_v13 = vadd.f32 %v6189_v58, %v6149_v18  ;;  %6483 = vmatprep.subr.bf16.mxu0 %v9710_v14  ;;  %v9694_v5 = vcombine.high %v2994_v12, %v2998_v29  ;;  %v2974_v14 = vld [vmem:[#allocation10 + $0x478] sm:$0xff] }
 0x4d4   :  { %v6191_v33 = vpop.f32.mrf.mxu0  ;;  %v6232_v60 = vpop.f32.mrf.mxu1  ;;  %6524 = vmatprep.subr.bf16.mxu1 %v9838_v1  ;;  %v9805_v48 = vcombine.low %v3106_v35, %v3110_v57  ;;  %v9670_v1 = vcombine.high %v2970_v8, %v2974_v14  ;;  %v2966_v18 = vld [vmem:[#allocation10 + $0x438] sm:$0xff]  ;;  %v9669_v58 = vcombine.low %v2970_v8, %v2974_v14 }
 0x4d5   :  { %v11561_v28 = vadd.f32 %v6230_v21, %v6190_v13  ;;  %6484 = vmatpush1.bf16.msra.mxu0 %v9709_v20  ;;  %v3090_v19 = vld [vmem:[#allocation10 + $0x818] sm:$0xff]  ;;  %v9797_v21 = vcombine.low %v3098_v15, %v3102_v40  ;;  %v9661_v33 = vcombine.low %v2962_v17, %v2966_v18 }
 0x4d6   :  { %6525 = vmatpush1.bf16.msra.mxu1 %v9837_v10  ;;  %v6192_v39 = vpop.f32.mrf.mxu0  ;;  %v6233_v42 = vpop.f32.mrf.mxu1  ;;  %6485 = vmatprep.subr.bf16.mxu0 %v9702_v23  ;;  %v3094_v20 = vld [vmem:[#allocation10 + $0x838] sm:$0xff]  ;;  %v9662_v10 = vcombine.high %v2962_v17, %v2966_v18 }
 0x4d7   :  { %6526 = vmatprep.subr.bf16.mxu1 %v9830_v26  ;;  %v9790_v23 = vcombine.high %v3090_v19, %v3094_v20  ;;  %v3082_v13 = vld [vmem:[#allocation10 + $0x7d8] sm:$0xff]  ;;  %v9789_v60 = vcombine.low %v3090_v19, %v3094_v20 }
 0x4d8   :  { %v3086_v26 = vld [vmem:[#allocation10 + $0x7f8] sm:$0xff] }
 0x4d9   :  { %6486 = vmatpush1.bf16.msra.mxu0 %v9701_v38  ;;  %v3210_v12 = vld [vmem:[#allocation10 + $0xbd8] sm:$0xff]  ;;  %v9782_v34 = vcombine.high %v3082_v13, %v3086_v26 }
 0x4da   :  { %6527 = vmatpush1.bf16.msra.mxu1 %v9829_v43  ;;  %6487 = vmatprep.subr.bf16.mxu0 %v9694_v5  ;;  %v3214_v29 = vld [vmem:[#allocation10 + $0xbf8] sm:$0xff]  ;;  %v9781_v5 = vcombine.low %v3082_v13, %v3086_v26 }
 0x4db   :  { %6528 = vmatprep.subr.bf16.mxu1 %v9822_v46  ;;  %v9910_v37 = vcombine.high %v3210_v12, %v3214_v29  ;;  %v3074_v38 = vld [vmem:[#allocation10 + $0x798] sm:$0xff]  ;;  %v9909_v46 = vcombine.low %v3210_v12, %v3214_v29 }
 0x4dc   :  { %v3078_v39 = vld [vmem:[#allocation10 + $0x7b8] sm:$0xff] }
 0x4dd   :  { %6488 = vmatpush1.bf16.msra.mxu0 %v9693_v50  ;;  %v3202_v42 = vld [vmem:[#allocation10 + $0xb98] sm:$0xff]  ;;  %v9774_v25 = vcombine.high %v3074_v38, %v3078_v39 }
 0x4de   :  { %6529 = vmatpush1.bf16.msra.mxu1 %v9821_v51  ;;  %6489 = vmatprep.subr.bf16.mxu0 %v9686_v52  ;;  %v3206_v43 = vld [vmem:[#allocation10 + $0xbb8] sm:$0xff]  ;;  %v9773_v52 = vcombine.low %v3074_v38, %v3078_v39 }
 0x4df   :  { %6530 = vmatprep.subr.bf16.mxu1 %v9814_v53  ;;  %v9902_v31 = vcombine.high %v3202_v42, %v3206_v43  ;;  %v3194_v50 = vld [vmem:[#allocation10 + $0xb58] sm:$0xff]  ;;  %v9901_v53 = vcombine.low %v3202_v42, %v3206_v43 }
 0x4e0   :  { %v3198_v51 = vld [vmem:[#allocation10 + $0xb78] sm:$0xff] }
 0x4e1   :  { %6490 = vmatpush1.bf16.msra.mxu0 %v9685_v59  ;;  %v9894_v54 = vcombine.high %v3194_v50, %v3198_v51  ;;  %v3058_v35 = vld [vmem:[#allocation10 + $0x718] sm:$0xff] }
 0x4e2   :  { %6531 = vmatpush1.bf16.msra.mxu1 %v9813_v61  ;;  %6491 = vmatprep.subr.bf16.mxu0 %v9678_v62  ;;  %v3062_v57 = vld [vmem:[#allocation10 + $0x738] sm:$0xff]  ;;  %v9765_v62 = vcombine.low %v3066_v30, %v3070_v49 }
 0x4e3   :  { %6532 = vmatprep.subr.bf16.mxu1 %v9806_v3  ;;  %v3186_v59 = vld [vmem:[#allocation10 + $0xb18] sm:$0xff]  ;;  %v9893_v3 = vcombine.low %v3194_v50, %v3198_v51  ;;  %v9758_v8 = vcombine.high %v3058_v35, %v3062_v57 }
 0x4e4   :  { %v3190_v61 = vld [vmem:[#allocation10 + $0xb38] sm:$0xff] }
 0x4e5   :  { %6492 = vmatpush1.bf16.msra.mxu0 %v9677_v41  ;;  %v9886_v14 = vcombine.high %v3186_v59, %v3190_v61  ;;  %v3050_v15 = vld [vmem:[#allocation10 + $0x6d8] sm:$0xff] }
 0x4e6   :  { %6533 = vmatpush1.bf16.msra.mxu1 %v9805_v48  ;;  %6493 = vmatprep.subr.bf16.mxu0 %v9670_v1  ;;  %v3054_v40 = vld [vmem:[#allocation10 + $0x6f8] sm:$0xff]  ;;  %v9757_v1 = vcombine.low %v3058_v35, %v3062_v57 }
 0x4e7   :  { %6534 = vmatprep.subr.bf16.mxu1 %v9798_v16  ;;  %v3178_v41 = vld [vmem:[#allocation10 + $0xad8] sm:$0xff]  ;;  %v9885_v16 = vcombine.low %v3186_v59, %v3190_v61  ;;  %v9750_v17 = vcombine.high %v3050_v15, %v3054_v40  ;;  %v10561_v61 = vld [vmem:[#allocation11 + $0xe0] ss:$16 sps:$4 sm:$0xff]  }
 0x4e8   :  { %v3182_v48 = vld [vmem:[#allocation10 + $0xaf8] sm:$0xff] }
 0x4e9   :  { %6494 = vmatpush1.bf16.msra.mxu0 %v9669_v58  ;;  %v9878_v18 = vcombine.high %v3178_v41, %v3182_v48  ;;  %v3042_v19 = vld [vmem:[#allocation10 + $0x698] sm:$0xff] }
 0x4ea   :  { %6535 = vmatpush1.bf16.msra.mxu1 %v9797_v21  ;;  %6495 = vmatprep.subr.bf16.mxu0 %v9662_v10  ;;  %v3046_v20 = vld [vmem:[#allocation10 + $0x6b8] sm:$0xff]  ;;  %v9749_v10 = vcombine.low %v3050_v15, %v3054_v40  ;;  %v10566_v15 = vld [vmem:[#allocation11 + $0xc4] ss:$16 sps:$4 sm:$0xff]   ;;  %v11566_v40 = vpack.c.bf16 %v11547_v63, %v11547_v63 }
 0x4eb   :  { %6536 = vmatprep.subr.bf16.mxu1 %v9790_v23  ;;  %v3170_v58 = vld [vmem:[#allocation10 + $0xa98] sm:$0xff]  ;;  %v9877_v23 = vcombine.low %v3178_v41, %v3182_v48  ;;  %v9742_v13 = vcombine.high %v3042_v19, %v3046_v20 }
 0x4ec   :  { %v3174_v21 = vld [vmem:[#allocation10 + $0xab8] sm:$0xff] }
 0x4ed   :  { %6496 = vmatpush1.bf16.msra.mxu0 %v9661_v33  ;;  %v9870_v26 = vcombine.high %v3170_v58, %v3174_v21  ;;  %v3034_v12 = vld [vmem:[#allocation10 + $0x658] sm:$0xff] }
 0x4ee   :  { %6537 = vmatpush1.bf16.msra.mxu1 %v9789_v60  ;;  %6497 = vmatprep.subr.bf16.mxu0 %v9782_v34  ;;  %v3038_v29 = vld [vmem:[#allocation10 + $0x678] sm:$0xff]  ;;  %v9741_v34 = vcombine.low %v3042_v19, %v3046_v20 }
 0x4ef   :  { %6538 = vmatprep.subr.bf16.mxu1 %v9910_v37  ;;  %v3162_v33 = vld [vmem:[#allocation10 + $0xa58] sm:$0xff]  ;;  %v9869_v37 = vcombine.low %v3170_v58, %v3174_v21  ;;  %v9734_v38 = vcombine.high %v3034_v12, %v3038_v29  ;;  %v10567_v21 = vld [vmem:[#allocation11 + $0xa0] ss:$16 sps:$4 sm:$0xff]  }
 0x4f0   :  { %v3166_v60 = vld [vmem:[#allocation10 + $0xa78] sm:$0xff] }
 0x4f1   :  { %6498 = vmatpush2.bf16.msra.mxu0 %v9781_v5  ;;  %v9862_v39 = vcombine.high %v3162_v33, %v3166_v60  ;;  %v3026_v42 = vld [vmem:[#allocation10 + $0x618] sm:$0xff] }
 0x4f2   :  { %6539 = vmatpush2.bf16.msra.mxu1 %v9909_v46  ;;  %6499 = vmatprep.subr.bf16.mxu0 %v9774_v25  ;;  %v3030_v43 = vld [vmem:[#allocation10 + $0x638] sm:$0xff]  ;;  %v9733_v25 = vcombine.low %v3034_v12, %v3038_v29 }
 0x4f3   :  { %6540 = vmatprep.subr.bf16.mxu1 %v9902_v31  ;;  %v3154_v5 = vld [vmem:[#allocation10 + $0xa18] sm:$0xff]  ;;  %v9861_v31 = vcombine.low %v3162_v33, %v3166_v60  ;;  %v9726_v30 = vcombine.high %v3026_v42, %v3030_v43  ;;  %v10570_v33 = vld [vmem:[#allocation11 + $0x80] ss:$16 sps:$4 sm:$0xff]  }
 0x4f4   :  { %v3158_v46 = vld [vmem:[#allocation10 + $0xa38] sm:$0xff] }
 0x4f5   :  { %6500 = vmatpush2.bf16.msra.mxu0 %v9773_v52  ;;  %v9854_v49 = vcombine.high %v3154_v5, %v3158_v46  ;;  %v3274_v50 = vld [vmem:[#allocation10 + $0xdd8] sm:$0xff]  ;;  %v9725_v52 = vcombine.low %v3026_v42, %v3030_v43  ;;  %v10573_v42 = vld [vmem:[#allocation11 + $0x60] ss:$16 sps:$4 sm:$0xff]  }
 0x4f6   :  { %6541 = vmatpush2.bf16.msra.mxu1 %v9901_v53  ;;  %6501 = vmatprep.subr.bf16.mxu0 %v9766_v32  ;;  %v3278_v51 = vld [vmem:[#allocation10 + $0xdf8] sm:$0xff]  ;;  %v9853_v53 = vcombine.low %v3154_v5, %v3158_v46  ;;  %v10578_v5 = vld [vmem:[#allocation11 + $0x44] ss:$16 sps:$4 sm:$0xff]  }
 0x4f7   :  { %6542 = vmatprep.subr.bf16.mxu1 %v9894_v54  ;;  %v9974_v32 = vcombine.high %v3274_v50, %v3278_v51  ;;  %v10563_v54 = vld [vmem:[#allocation11 + $0xe4] ss:$16 sps:$4 sm:$0xff]   ;;  %v3266_v35 = vld [vmem:[#allocation10 + $0xd98] sm:$0xff]  ;;  %v9973_v59 = vcombine.low %v3274_v50, %v3278_v51 }
 0x4f8   :  { %v3270_v57 = vld [vmem:[#allocation10 + $0xdb8] sm:$0xff]  ;;  %v10581_v50 = vld [vmem:[#allocation11 + $0x24] ss:$16 sps:$4 sm:$0xff]  }
 0x4f9   :  { %6502 = vmatpush2.bf16.msra.mxu0 %v9765_v62  ;;  %v9966_v62 = vcombine.high %v3266_v35, %v3270_v57  ;;  %v3254_v19 = vld [vmem:[#allocation10 + $0xd38] sm:$0xff] }
 0x4fa   :  { %6543 = vmatpush2.bf16.msra.mxu1 %v9893_v3  ;;  %6503 = vmatprep.subr.bf16.mxu0 %v9758_v8  ;;  %v3258_v3 = vld [vmem:[#allocation10 + $0xd58] sm:$0xff] }
 0x4fb   :  { %6544 = vmatprep.subr.bf16.mxu1 %v9886_v14  ;;  %v3262_v8 = vld [vmem:[#allocation10 + $0xd78] sm:$0xff] }
 0x4fc   :  { %v9957_v58 = vcombine.low %v3258_v3, %v3262_v8  ;;  %v3246_v12 = vld [vmem:[#allocation10 + $0xcf8] sm:$0xff] }
 0x4fd   :  { %6504 = vmatpush2.bf16.msra.mxu0 %v9757_v1  ;;  %v9965_v1 = vcombine.low %v3266_v35, %v3270_v57  ;;  %v3226_v46 = vld [vmem:[#allocation10 + $0xc58] sm:$0xff]  ;;  %v10584_v35 = vld [vmem:[#allocation11 + $0x4] ss:$16 sps:$4 sm:$0xff]  }
 0x4fe   :  { %6545 = vmatpush2.bf16.msra.mxu1 %v9885_v16  ;;  %6505 = vmatprep.subr.bf16.mxu0 %v9750_v17  ;;  %v9958_v17 = vcombine.high %v3258_v3, %v3262_v8  ;;  %v3218_v51 = vld [vmem:[#allocation10 + $0xc18] sm:$0xff]  ;;  %v10587_v8 = vld [vmem:[#allocation11 + $0x1e4] ss:$16 sps:$4 sm:$0xff]  }
 0x4ff   :  { %6546 = vmatprep.subr.bf16.mxu1 %v9878_v18  ;;  %v3250_v18 = vld [vmem:[#allocation10 + $0xd18] sm:$0xff] }
 0x500   :  { %v9949_v29 = vcombine.low %v3250_v18, %v3254_v19  ;;  %v3338_v57 = vld [vmem:[#allocation10 + $0xfd8] sm:$0xff] }
 0x501   :  { %6506 = vmatpush2.bf16.msra.mxu0 %v9749_v10  ;;  %v9950_v10 = vcombine.high %v3250_v18, %v3254_v19  ;;  %v3322_v18 = vld [vmem:[#allocation10 + $0xf58] sm:$0xff] }
 0x502   :  { %6547 = vmatpush2.bf16.msra.mxu1 %v9877_v23  ;;  %6507 = vmatprep.subr.bf16.mxu0 %v9742_v13  ;;  %v10572_v13 = vld [vmem:[#allocation11 + $0x84] ss:$16 sps:$4 sm:$0xff]   ;;  %v3326_v19 = vld [vmem:[#allocation10 + $0xf78] sm:$0xff] }
 0x503   :  { %6548 = vmatprep.subr.bf16.mxu1 %v9870_v26  ;;  %v3242_v26 = vld [vmem:[#allocation10 + $0xcd8] sm:$0xff] }
 0x504   :  { %v9942_v60 = vcombine.high %v3242_v26, %v3246_v12 }
 0x505   :  { %6508 = vmatpush2.bf16.msra.mxu0 %v9741_v34  ;;  %v10575_v34 = vld [vmem:[#allocation11 + $0x64] ss:$16 sps:$4 sm:$0xff]  }
 0x506   :  { %6549 = vmatpush2.bf16.msra.mxu1 %v9869_v37  ;;  %6509 = vmatprep.subr.bf16.mxu0 %v9734_v38  ;;  %v3234_v37 = vld [vmem:[#allocation10 + $0xc98] sm:$0xff] }
 0x507   :  { %6550 = vmatprep.subr.bf16.mxu1 %v9862_v39  ;;  %v3238_v38 = vld [vmem:[#allocation10 + $0xcb8] sm:$0xff]  ;;  %v9941_v39 = vcombine.low %v3242_v26, %v3246_v12  ;;  %v10596_v12 = vld [vmem:[#allocation11 + $0x184] ss:$16 sps:$4 sm:$0xff]  }
 0x508   :  { %v9934_v43 = vcombine.high %v3234_v37, %v3238_v38 }
 0x509   :  { %6510 = vmatpush2.bf16.msra.mxu0 %v9733_v25  ;;  %v3230_v25 = vld [vmem:[#allocation10 + $0xc78] sm:$0xff] }
 0x50a   :  { %6551 = vmatpush2.bf16.msra.mxu1 %v9861_v31  ;;  %6511 = vmatprep.subr.bf16.mxu0 %v9726_v30  ;;  %v9933_v31 = vcombine.low %v3234_v37, %v3238_v38  ;;  %v10576_v30 = vld [vmem:[#allocation11 + $0x40] ss:$16 sps:$4 sm:$0xff]   ;;  %v10599_v38 = vld [vmem:[#allocation11 + $0x164] ss:$16 sps:$4 sm:$0xff]  }
 0x50b   :  { %6552 = vmatprep.subr.bf16.mxu1 %v9854_v49  ;;  %v9926_v49 = vcombine.high %v3226_v46, %v3230_v25 }
 0x50d   :  { %6512 = vmatpush2.bf16.msra.mxu0 %v9725_v52  ;;  %v3222_v52 = vld [vmem:[#allocation10 + $0xc38] sm:$0xff] }
 0x50e   :  { %6553 = vmatpush2.bf16.msra.mxu1 %v9853_v53  ;;  %6563 = vmatprep.subr.bf16.mxu0 %v9974_v32  ;;  %v9925_v53 = vcombine.low %v3226_v46, %v3230_v25  ;;  %v10579_v32 = vld [vmem:[#allocation11 + $0x20] ss:$16 sps:$4 sm:$0xff]   ;;  %v10602_v25 = vld [vmem:[#allocation11 + $0x144] ss:$16 sps:$4 sm:$0xff]  }
 0x50f   :  { %8171 = vmatprep.subr.bf16.mxu1 %v10563_v54  ;;  %v9918_v54 = vcombine.high %v3218_v51, %v3222_v52 }
 0x510   :  { %v6269_v14 = vpop.f32.mrf.mxu0  ;;  %6514 = vmatmul.mubr.bf16.vlgmr.msra.gmra.mxu0 %v11464_v36  ;;  %v10564_v36 = vld [vmem:[#allocation11 + $0xc0] ss:$16 sps:$4 sm:$0xff]  }
 0x511   :  { %v11569_v41 = vadd.f32 %v6269_v14, %v11558_v0  ;;  %v11571_v48 = vpop.f32.mrf.mxu1  ;;  %6555 = vmatmul.mubr.bf16.vlgmr.msra.gmra.mxu1 %v11486_v7  ;;  %6564 = vmatpush1.bf16.msra.mxu0 %v9973_v59  ;;  %v10569_v0 = vld [vmem:[#allocation11 + $0xa4] ss:$16 sps:$4 sm:$0xff]   ;;  %v3342_v59 = vld [vmem:[#allocation10 + $0xff8] sm:$0xff] }
 0x512   :  { %6595 = vmatprep.mubr.bf16.mxu0 %v11499_v55  ;;  %8172 = vmatpush1.bf16.msra.mxu1 %v10561_v61  ;;  %v11575_v16 = vpop.f32.mrf.mxu0  ;;  %v9917_v61 = vcombine.low %v3218_v51, %v3222_v52  ;;  %v10038_v3 = vcombine.high %v3338_v57, %v3342_v59  ;;  %v3330_v14 = vld [vmem:[#allocation10 + $0xf98] sm:$0xff]  ;;  %v10605_v52 = vld [vmem:[#allocation11 + $0x124] ss:$16 sps:$4 sm:$0xff]  }
 0x513   :  { %8203 = vmatprep.mubr.bf16.mxu1 %v11566_v40  ;;  %v11578_v63 = vpop.f32.mrf.mxu1  ;;  %6565 = vmatprep.subr.bf16.mxu0 %v9966_v62  ;;  %v10582_v62 = vld [vmem:[#allocation11] ss:$16 sps:$4 sm:$0xff]  }
 0x514   :  { %v6273_v20 = vpop.f32.mrf.mxu0  ;;  %8173 = vmatprep.subr.bf16.mxu1 %v10566_v15  ;;  %v3334_v15 = vld [vmem:[#allocation10 + $0xfb8] sm:$0xff] }
 0x515   :  { %v6314_v7 = vpop.f32.mrf.mxu1  ;;  %6566 = vmatpush1.bf16.msra.mxu0 %v9965_v1  ;;  %v10037_v1 = vcombine.low %v3338_v57, %v3342_v59  ;;  %v10029_v20 = vcombine.low %v3330_v14, %v3334_v15  ;;  %v10608_v59 = vld [vmem:[#allocation11 + $0x104] ss:$16 sps:$4 sm:$0xff]  }
 0x516   :  { %8174 = vmatpush1.bf16.msra.mxu1 %v10564_v36  ;;  %v6274_v55 = vpop.f32.mrf.mxu0  ;;  %6567 = vmatprep.subr.bf16.mxu0 %v9958_v17  ;;  %v10585_v36 = vld [vmem:[#allocation11 + $0x1e0] ss:$16 sps:$4 sm:$0xff]   ;;  %v10030_v17 = vcombine.high %v3330_v14, %v3334_v15  ;;  %v10617_v14 = vld [vmem:[#allocation11 + $0x4e4] ss:$16 sps:$4 sm:$0xff]   ;;  %v6272_v15 = vadd.f32 %v11575_v16, %v11561_v28 }
 0x517   :  { %v6315_v23 = vpop.f32.mrf.mxu1  ;;  %8175 = vmatprep.subr.bf16.mxu1 %v10569_v0  ;;  %v10590_v0 = vld [vmem:[#allocation11 + $0x1c4] ss:$16 sps:$4 sm:$0xff]   ;;  %v10588_v7 = vld [vmem:[#allocation11 + $0x1c0] ss:$16 sps:$4 sm:$0xff]  }
 0x518   :  { %v10593_v55 = vld [vmem:[#allocation11 + $0x1a4] ss:$16 sps:$4 sm:$0xff]   ;;  %v10021_v23 = vcombine.low %v3322_v18, %v3326_v19 }
 0x519   :  { %6568 = vmatpush1.bf16.msra.mxu0 %v9957_v58  ;;  %v10022_v58 = vcombine.high %v3322_v18, %v3326_v19  ;;  %v10615_v18 = vld [vmem:[#allocation11 + $0x4e0] ss:$16 sps:$4 sm:$0xff]   ;;  %v11590_v19 = vpack.c.bf16 %v6272_v15, %v6272_v15 }
 0x51a   :  { %8176 = vmatpush1.bf16.msra.mxu1 %v10567_v21  ;;  %6569 = vmatprep.subr.bf16.mxu0 %v9950_v10  ;;  %v3314_v21 = vld [vmem:[#allocation10 + $0xf18] sm:$0xff]  ;;  %v10669_v15 = vld [vmem:[#allocation11 + $0x5c0] ss:$16 sps:$4 sm:$0xff]  }
 0x51b   :  { %8177 = vmatprep.subr.bf16.mxu1 %v10572_v13  ;;  %v3318_v10 = vld [vmem:[#allocation10 + $0xf38] sm:$0xff]  ;;  %v10591_v13 = vld [vmem:[#allocation11 + $0x1a0] ss:$16 sps:$4 sm:$0xff]  }
 0x51c   :  { %v10014_v26 = vcombine.high %v3314_v21, %v3318_v10 }
 0x51d   :  { %6570 = vmatpush1.bf16.msra.mxu0 %v9949_v29  ;;  %v3306_v29 = vld [vmem:[#allocation10 + $0xed8] sm:$0xff] }
 0x51e   :  { %8178 = vmatpush1.bf16.msra.mxu1 %v10570_v33  ;;  %6571 = vmatprep.subr.bf16.mxu0 %v9942_v60  ;;  %v3310_v33 = vld [vmem:[#allocation10 + $0xef8] sm:$0xff]  ;;  %v10013_v60 = vcombine.low %v3314_v21, %v3318_v10  ;;  %v10621_v21 = vld [vmem:[#allocation11 + $0x4c0] ss:$16 sps:$4 sm:$0xff]   ;;  %v10629_v10 = vld [vmem:[#allocation11 + $0x4a4] ss:$16 sps:$4 sm:$0xff]  }
 0x51f   :  { %8179 = vmatprep.subr.bf16.mxu1 %v10575_v34  ;;  %v10594_v34 = vld [vmem:[#allocation11 + $0x180] ss:$16 sps:$4 sm:$0xff]   ;;  %v10006_v37 = vcombine.high %v3306_v29, %v3310_v33 }
 0x521   :  { %6572 = vmatpush1.bf16.msra.mxu0 %v9941_v39  ;;  %v3298_v39 = vld [vmem:[#allocation10 + $0xe98] sm:$0xff] }
 0x522   :  { %8180 = vmatpush1.bf16.msra.mxu1 %v10573_v42  ;;  %6573 = vmatprep.subr.bf16.mxu0 %v9934_v43  ;;  %v3302_v42 = vld [vmem:[#allocation10 + $0xeb8] sm:$0xff]  ;;  %v10005_v43 = vcombine.low %v3306_v29, %v3310_v33  ;;  %v10627_v33 = vld [vmem:[#allocation11 + $0x4a0] ss:$16 sps:$4 sm:$0xff]  }
 0x523   :  { %8181 = vmatprep.subr.bf16.mxu1 %v10578_v5  ;;  %v10597_v5 = vld [vmem:[#allocation11 + $0x160] ss:$16 sps:$4 sm:$0xff]   ;;  %v9998_v46 = vcombine.high %v3298_v39, %v3302_v42 }
 0x525   :  { %6574 = vmatpush1.bf16.msra.mxu0 %v9933_v31  ;;  %v3290_v31 = vld [vmem:[#allocation10 + $0xe58] sm:$0xff] }
 0x526   :  { %8182 = vmatpush1.bf16.msra.mxu1 %v10576_v30  ;;  %6575 = vmatprep.subr.bf16.mxu0 %v9926_v49  ;;  %v3294_v30 = vld [vmem:[#allocation10 + $0xe78] sm:$0xff]  ;;  %v9997_v49 = vcombine.low %v3298_v39, %v3302_v42  ;;  %v10641_v39 = vld [vmem:[#allocation11 + $0x464] ss:$16 sps:$4 sm:$0xff]   ;;  %v10630_v42 = vld [vmem:[#allocation11 + $0x260] ss:$16 sps:$4 sm:$0xff]  }
 0x527   :  { %8183 = vmatprep.subr.bf16.mxu1 %v10581_v50  ;;  %v10600_v50 = vld [vmem:[#allocation11 + $0x140] ss:$16 sps:$4 sm:$0xff]   ;;  %v9990_v51 = vcombine.high %v3290_v31, %v3294_v30 }
 0x529   :  { %6576 = vmatpush1.bf16.msra.mxu0 %v9925_v53  ;;  %v3282_v53 = vld [vmem:[#allocation10 + $0xe18] sm:$0xff] }
 0x52a   :  { %8184 = vmatpush1.bf16.msra.mxu1 %v10579_v32  ;;  %6577 = vmatprep.subr.bf16.mxu0 %v9918_v54  ;;  %v3286_v32 = vld [vmem:[#allocation10 + $0xe38] sm:$0xff]  ;;  %v9989_v54 = vcombine.low %v3290_v31, %v3294_v30  ;;  %v10644_v31 = vld [vmem:[#allocation11 + $0x224] ss:$16 sps:$4 sm:$0xff]   ;;  %v10645_v30 = vld [vmem:[#allocation11 + $0x440] ss:$16 sps:$4 sm:$0xff]  }
 0x52b   :  { %8185 = vmatprep.subr.bf16.mxu1 %v10584_v35  ;;  %v10603_v35 = vld [vmem:[#allocation11 + $0x120] ss:$16 sps:$4 sm:$0xff]   ;;  %v9982_v57 = vcombine.high %v3282_v53, %v3286_v32 }
 0x52d   :  { %6578 = vmatpush1.bf16.msra.mxu0 %v9917_v61  ;;  %v9981_v61 = vcombine.low %v3282_v53, %v3286_v32  ;;  %v10659_v53 = vld [vmem:[#allocation11 + $0x404] ss:$16 sps:$4 sm:$0xff]   ;;  %v10648_v32 = vld [vmem:[#allocation11 + $0x200] ss:$16 sps:$4 sm:$0xff]  }
 0x52e   :  { %8186 = vmatpush1.bf16.msra.mxu1 %v10582_v62  ;;  %6579 = vmatprep.subr.bf16.mxu0 %v10038_v3  ;;  %v10606_v62 = vld [vmem:[#allocation11 + $0x100] ss:$16 sps:$4 sm:$0xff]   ;;  %v10611_v3 = vld [vmem:[#allocation11 + $0x2e4] ss:$16 sps:$4 sm:$0xff]  }
 0x52f   :  { %8187 = vmatprep.subr.bf16.mxu1 %v10587_v8  ;;  %v3367_v8 = vrot.slane %v11511_v24, %v1185_v22 }
 0x531   :  { %6580 = vmatpush2.bf16.msra.mxu0 %v10037_v1  ;;  %v10609_v1 = vld [vmem:[#allocation11 + $0x2e0] ss:$16 sps:$4 sm:$0xff]  }
 0x532   :  { %8188 = vmatpush2.bf16.msra.mxu1 %v10585_v36  ;;  %6581 = vmatprep.subr.bf16.mxu0 %v10030_v17  ;;  %v10614_v36 = vld [vmem:[#allocation11 + $0x2c4] ss:$16 sps:$4 sm:$0xff]   ;;  %v11587_v17 = vpack.c.bf16 %v11540_v6, %v11540_v6 }
 0x533   :  { %8189 = vmatprep.subr.bf16.mxu1 %v10590_v0  ;;  %v6311_v0 = vadd.f32 %v11571_v48, %v3367_v8  ;;  %v10620_v48 = vld [vmem:[#allocation11 + $0x2a4] ss:$16 sps:$4 sm:$0xff]   ;;  %v10660_v8 = vld [vmem:[#allocation11 + $0x3c0] ss:$16 sps:$4 sm:$0xff]  }
 0x535   :  { %6582 = vmatpush2.bf16.msra.mxu0 %v10029_v20  ;;  %v10623_v20 = vld [vmem:[#allocation11 + $0x4c4] ss:$16 sps:$4 sm:$0xff]  }
 0x536   :  { %8190 = vmatpush2.bf16.msra.mxu1 %v10588_v7  ;;  %6583 = vmatprep.subr.bf16.mxu0 %v10022_v58  ;;  %v10612_v7 = vld [vmem:[#allocation11 + $0x2c0] ss:$16 sps:$4 sm:$0xff]  }
 0x537   :  { %8191 = vmatprep.subr.bf16.mxu1 %v10593_v55 }
 0x539   :  { %6584 = vmatpush2.bf16.msra.mxu0 %v10021_v23 }
 0x53a   :  { %8192 = vmatpush2.bf16.msra.mxu1 %v10591_v13  ;;  %6585 = vmatprep.subr.bf16.mxu0 %v10014_v26  ;;  %v10618_v13 = vld [vmem:[#allocation11 + $0x2a0] ss:$16 sps:$4 sm:$0xff]  }
 0x53b   :  { %8193 = vmatprep.subr.bf16.mxu1 %v10596_v12  ;;  %v10626_v12 = vld [vmem:[#allocation11 + $0x284] ss:$16 sps:$4 sm:$0xff]  }
 0x53d   :  { %6586 = vmatpush2.bf16.msra.mxu0 %v10013_v60  ;;  %v10635_v60 = vld [vmem:[#allocation11 + $0x484] ss:$16 sps:$4 sm:$0xff]  }
 0x53e   :  { %8194 = vmatpush2.bf16.msra.mxu1 %v10594_v34  ;;  %6587 = vmatprep.subr.bf16.mxu0 %v10006_v37  ;;  %v10624_v34 = vld [vmem:[#allocation11 + $0x280] ss:$16 sps:$4 sm:$0xff]   ;;  %v10632_v37 = vld [vmem:[#allocation11 + $0x264] ss:$16 sps:$4 sm:$0xff]  }
 0x53f   :  { %8195 = vmatprep.subr.bf16.mxu1 %v10599_v38  ;;  %v10633_v38 = vld [vmem:[#allocation11 + $0x480] ss:$16 sps:$4 sm:$0xff]  }
 0x541   :  { %6588 = vmatpush2.bf16.msra.mxu0 %v10005_v43  ;;  %v10638_v43 = vld [vmem:[#allocation11 + $0x244] ss:$16 sps:$4 sm:$0xff]  }
 0x542   :  { %8196 = vmatpush2.bf16.msra.mxu1 %v10597_v5  ;;  %6589 = vmatprep.subr.bf16.mxu0 %v9998_v46  ;;  %v10639_v5 = vld [vmem:[#allocation11 + $0x460] ss:$16 sps:$4 sm:$0xff]   ;;  %v10647_v46 = vld [vmem:[#allocation11 + $0x444] ss:$16 sps:$4 sm:$0xff]  }
 0x543   :  { %8197 = vmatprep.subr.bf16.mxu1 %v10602_v25  ;;  %v10636_v25 = vld [vmem:[#allocation11 + $0x240] ss:$16 sps:$4 sm:$0xff]  }
 0x545   :  { %6590 = vmatpush2.bf16.msra.mxu0 %v9997_v49  ;;  %v10653_v49 = vld [vmem:[#allocation11 + $0x424] ss:$16 sps:$4 sm:$0xff]  }
 0x546   :  { %8198 = vmatpush2.bf16.msra.mxu1 %v10600_v50  ;;  %6591 = vmatprep.subr.bf16.mxu0 %v9990_v51  ;;  %v10642_v50 = vld [vmem:[#allocation11 + $0x220] ss:$16 sps:$4 sm:$0xff]   ;;  %v10650_v51 = vld [vmem:[#allocation11 + $0x204] ss:$16 sps:$4 sm:$0xff]  }
 0x547   :  { %8199 = vmatprep.subr.bf16.mxu1 %v10605_v52  ;;  %v10651_v52 = vld [vmem:[#allocation11 + $0x420] ss:$16 sps:$4 sm:$0xff]  }
 0x549   :  { %6592 = vmatpush2.bf16.msra.mxu0 %v9989_v54  ;;  %v10656_v54 = vld [vmem:[#allocation11 + $0x3e4] ss:$16 sps:$4 sm:$0xff]  }
 0x54a   :  { %8200 = vmatpush2.bf16.msra.mxu1 %v10603_v35  ;;  %6593 = vmatprep.subr.bf16.mxu0 %v9982_v57  ;;  %v10657_v35 = vld [vmem:[#allocation11 + $0x400] ss:$16 sps:$4 sm:$0xff]   ;;  %v10665_v57 = vld [vmem:[#allocation11 + $0x5e4] ss:$16 sps:$4 sm:$0xff]  }
 0x54b   :  { %8201 = vmatprep.subr.bf16.mxu1 %v10608_v59  ;;  %v10654_v59 = vld [vmem:[#allocation11 + $0x3e0] ss:$16 sps:$4 sm:$0xff]  }
 0x54d   :  { %6594 = vmatpush2.bf16.msra.mxu0 %v9981_v61  ;;  %v10662_v61 = vld [vmem:[#allocation11 + $0x3c4] ss:$16 sps:$4 sm:$0xff]  }
 0x54e   :  { %8202 = vmatpush2.bf16.msra.mxu1 %v10606_v62  ;;  %8212 = vmatprep.subr.bf16.mxu0 %v10611_v3  ;;  %v10663_v62 = vld [vmem:[#allocation11 + $0x5e0] ss:$16 sps:$4 sm:$0xff]   ;;  %v10671_v3 = vld [vmem:[#allocation11 + $0x5c4] ss:$16 sps:$4 sm:$0xff]  }
 0x54f   :  { %8253 = vmatprep.subr.bf16.mxu1 %v10617_v14  ;;  %v10668_v14 = vld [vmem:[#allocation11 + $0x3a4] ss:$16 sps:$4 sm:$0xff]  }
 0x550   :  { %v6351_v22 = vpop.f32.mrf.mxu0  ;;  %6596 = vmatmul.mubr.bf16.vlgmr.msra.gmra.mxu0 %v11501_v56 }
 0x551   :  { %v6352_v28 = vadd.f32 %v6351_v22, %v6311_v0  ;;  %v6392_v16 = vpop.f32.mrf.mxu1  ;;  %8204 = vmatmul.mubr.bf16.vlgmr.msra.gmra.mxu1 %v11587_v17  ;;  %8213 = vmatpush1.bf16.msra.mxu0 %v10609_v1  ;;  %v10677_v1 = vld [vmem:[#allocation11 + $0x5a4] ss:$16 sps:$4 sm:$0xff]  }
 0x552   :  { %8244 = vmatprep.mubr.bf16.mxu0 %v11590_v19  ;;  %v11595_v6 = vpop.f32.mrf.mxu0  ;;  %8214 = vmatprep.subr.bf16.mxu0 %v10614_v36  ;;  %v10666_v36 = vld [vmem:[#allocation11 + $0x3a0] ss:$16 sps:$4 sm:$0xff]   ;;  %v10674_v0 = vld [vmem:[#allocation11 + $0x384] ss:$16 sps:$4 sm:$0xff]  }
 0x553   :  { %v11597_v58 = vadd.f32 %v6392_v16, %v6352_v28  ;;  %v11599_v55 = vpop.f32.mrf.mxu1  ;;  %8254 = vmatpush1.bf16.msra.mxu1 %v10615_v18  ;;  %v10675_v18 = vld [vmem:[#allocation11 + $0x5a0] ss:$16 sps:$4 sm:$0xff]   ;;  %v10683_v22 = vld [vmem:[#allocation11 + $0x584] ss:$16 sps:$4 sm:$0xff]  }
 0x554   :  { %v6355_v56 = vpop.f32.mrf.mxu0  ;;  %8255 = vmatprep.subr.bf16.mxu1 %v10623_v20  ;;  %v10672_v20 = vld [vmem:[#allocation11 + $0x380] ss:$16 sps:$4 sm:$0xff]   ;;  %v10680_v28 = vld [vmem:[#allocation11 + $0x364] ss:$16 sps:$4 sm:$0xff]  }
 0x555   :  { %v6396_v23 = vpop.f32.mrf.mxu1  ;;  %8215 = vmatpush1.bf16.msra.mxu0 %v10612_v7  ;;  %v10681_v16 = vld [vmem:[#allocation11 + $0x580] ss:$16 sps:$4 sm:$0xff]   ;;  %v10689_v7 = vld [vmem:[#allocation11 + $0x564] ss:$16 sps:$4 sm:$0xff]  }
 0x556   :  { %v6356_v26 = vpop.f32.mrf.mxu0  ;;  %8216 = vmatprep.subr.bf16.mxu0 %v10620_v48  ;;  %v10678_v48 = vld [vmem:[#allocation11 + $0x360] ss:$16 sps:$4 sm:$0xff]  }
 0x557   :  { %v6397_v29 = vpop.f32.mrf.mxu1  ;;  %8256 = vmatpush1.bf16.msra.mxu1 %v10621_v21  ;;  %v10686_v21 = vld [vmem:[#allocation11 + $0x344] ss:$16 sps:$4 sm:$0xff]   ;;  %v10687_v56 = vld [vmem:[#allocation11 + $0x560] ss:$16 sps:$4 sm:$0xff]  }
 0x558   :  { %8257 = vmatprep.subr.bf16.mxu1 %v10629_v10  ;;  %v10695_v10 = vld [vmem:[#allocation11 + $0x544] ss:$16 sps:$4 sm:$0xff]   ;;  %v10684_v23 = vld [vmem:[#allocation11 + $0x340] ss:$16 sps:$4 sm:$0xff]  }
 0x559   :  { %8217 = vmatpush1.bf16.msra.mxu0 %v10618_v13  ;;  %v10692_v13 = vld [vmem:[#allocation11 + $0x324] ss:$16 sps:$4 sm:$0xff]   ;;  %v10693_v26 = vld [vmem:[#allocation11 + $0x540] ss:$16 sps:$4 sm:$0xff]  }
 0x55a   :  { %8218 = vmatprep.subr.bf16.mxu0 %v10626_v12  ;;  %v10701_v12 = vld [vmem:[#allocation11 + $0x524] ss:$16 sps:$4 sm:$0xff]   ;;  %v10690_v29 = vld [vmem:[#allocation11 + $0x320] ss:$16 sps:$4 sm:$0xff]  }
 0x55b   :  { %8258 = vmatpush1.bf16.msra.mxu1 %v10627_v33  ;;  %v10698_v33 = vld [vmem:[#allocation11 + $0x304] ss:$16 sps:$4 sm:$0xff]  }
 0x55c   :  { %8259 = vmatprep.subr.bf16.mxu1 %v10635_v60  ;;  %v3371_v60 = vrot.slane %v11511_v24, %v1189_v27  ;;  %v11608_v27 = vpack.c.bf16 %v11569_v41, %v11569_v41 }
 0x55d   :  { %8219 = vmatpush1.bf16.msra.mxu0 %v10624_v34  ;;  %v10699_v34 = vld [vmem:[#allocation11 + $0x520] ss:$16 sps:$4 sm:$0xff]  }
 0x55e   :  { %8220 = vmatprep.subr.bf16.mxu0 %v10632_v37  ;;  %v10704_v37 = vld [vmem:[#allocation11 + $0x504] ss:$16 sps:$4 sm:$0xff]  }
 0x55f   :  { %8260 = vmatpush1.bf16.msra.mxu1 %v10633_v38  ;;  %v10696_v38 = vld [vmem:[#allocation11 + $0x300] ss:$16 sps:$4 sm:$0xff]  }
 0x560   :  { %8261 = vmatprep.subr.bf16.mxu1 %v10641_v39  ;;  %v10755_v39 = vld [vmem:[#allocation11 + $0x6e4] ss:$16 sps:$4 sm:$0xff]  }
 0x561   :  { %8221 = vmatpush1.bf16.msra.mxu0 %v10630_v42  ;;  %v6313_v42 = vadd.f32 %v11578_v63, %v3371_v60  ;;  %v10809_v60 = vld [vmem:[#allocation11 + $0x7c4] ss:$16 sps:$4 sm:$0xff]  }
 0x562   :  { %8222 = vmatprep.subr.bf16.mxu0 %v10638_v43  ;;  %v10702_v43 = vld [vmem:[#allocation11 + $0x500] ss:$16 sps:$4 sm:$0xff]  }
 0x563   :  { %8262 = vmatpush1.bf16.msra.mxu1 %v10639_v5  ;;  %v10707_v5 = vld [vmem:[#allocation11 + $0xec] ss:$16 sps:$4 sm:$0xff]  }
 0x564   :  { %8263 = vmatprep.subr.bf16.mxu1 %v10647_v46  ;;  %v6354_v46 = vadd.f32 %v11595_v6, %v6313_v42  ;;  %v10729_v42 = vld [vmem:[#allocation11 + $0x1e8] ss:$16 sps:$4 sm:$0xff]  }
 0x565   :  { %8223 = vmatpush1.bf16.msra.mxu0 %v10636_v25  ;;  %v10753_v25 = vld [vmem:[#allocation11 + $0x6e0] ss:$16 sps:$4 sm:$0xff]  }
 0x566   :  { %8224 = vmatprep.subr.bf16.mxu0 %v10644_v31  ;;  %v10761_v31 = vld [vmem:[#allocation11 + $0x6c4] ss:$16 sps:$4 sm:$0xff]   ;;  %v6395_v63 = vadd.f32 %v11599_v55, %v6354_v46 }
 0x567   :  { %8264 = vmatpush1.bf16.msra.mxu1 %v10645_v30  ;;  %v10821_v46 = vld [vmem:[#allocation11 + $0x784] ss:$16 sps:$4 sm:$0xff]  }
 0x568   :  { %8265 = vmatprep.subr.bf16.mxu1 %v10653_v49 }
 0x569   :  { %8225 = vmatpush1.bf16.msra.mxu0 %v10642_v50  ;;  %v10759_v50 = vld [vmem:[#allocation11 + $0x6c0] ss:$16 sps:$4 sm:$0xff]  }
 0x56a   :  { %8226 = vmatprep.subr.bf16.mxu0 %v10650_v51 }
 0x56b   :  { %8266 = vmatpush1.bf16.msra.mxu1 %v10651_v52  ;;  %v10767_v52 = vld [vmem:[#allocation11 + $0x6a4] ss:$16 sps:$4 sm:$0xff]  }
 0x56c   :  { %8267 = vmatprep.subr.bf16.mxu1 %v10659_v53 }
 0x56d   :  { %8227 = vmatpush1.bf16.msra.mxu0 %v10648_v32 }
 0x56e   :  { %8228 = vmatprep.subr.bf16.mxu0 %v10656_v54 }
 0x56f   :  { %8268 = vmatpush1.bf16.msra.mxu1 %v10657_v35 }
 0x570   :  { %8269 = vmatprep.subr.bf16.mxu1 %v10665_v57  ;;  %v10705_v57 = vld [vmem:[#allocation11 + $0xe8] ss:$16 sps:$4 sm:$0xff]  }
 0x571   :  { %8229 = vmatpush2.bf16.msra.mxu0 %v10654_v59 }
 0x572   :  { %8230 = vmatprep.subr.bf16.mxu0 %v10662_v61  ;;  %v10710_v61 = vld [vmem:[#allocation11 + $0xcc] ss:$16 sps:$4 sm:$0xff]  }
 0x573   :  { %8270 = vmatpush2.bf16.msra.mxu1 %v10663_v62  ;;  %v10765_v62 = vld [vmem:[#allocation11 + $0x6a0] ss:$16 sps:$4 sm:$0xff]  }
 0x574   :  { %8271 = vmatprep.subr.bf16.mxu1 %v10671_v3 }
 0x575   :  { %8231 = vmatpush2.bf16.msra.mxu0 %v10660_v8  ;;  %v10708_v8 = vld [vmem:[#allocation11 + $0xc8] ss:$16 sps:$4 sm:$0xff]  }
 0x576   :  { %8232 = vmatprep.subr.bf16.mxu0 %v10668_v14  ;;  %v10713_v14 = vld [vmem:[#allocation11 + $0xac] ss:$16 sps:$4 sm:$0xff]  }
 0x577   :  { %8272 = vmatpush2.bf16.msra.mxu1 %v10669_v15  ;;  %v10771_v15 = vld [vmem:[#allocation11 + $0x680] ss:$16 sps:$4 sm:$0xff]  }
 0x578   :  { %8273 = vmatprep.subr.bf16.mxu1 %v10677_v1  ;;  %v10779_v1 = vld [vmem:[#allocation11 + $0x664] ss:$16 sps:$4 sm:$0xff]  }
 0x579   :  { %8233 = vmatpush2.bf16.msra.mxu0 %v10666_v36  ;;  %v10711_v36 = vld [vmem:[#allocation11 + $0xa8] ss:$16 sps:$4 sm:$0xff]  }
 0x57a   :  { %8234 = vmatprep.subr.bf16.mxu0 %v10674_v0  ;;  %v10716_v0 = vld [vmem:[#allocation11 + $0x8c] ss:$16 sps:$4 sm:$0xff]  }
 0x57b   :  { %8274 = vmatpush2.bf16.msra.mxu1 %v10675_v18  ;;  %v10777_v18 = vld [vmem:[#allocation11 + $0x660] ss:$16 sps:$4 sm:$0xff]  }
 0x57c   :  { %8275 = vmatprep.subr.bf16.mxu1 %v10683_v22  ;;  %v10785_v22 = vld [vmem:[#allocation11 + $0x644] ss:$16 sps:$4 sm:$0xff]  }
 0x57d   :  { %8235 = vmatpush2.bf16.msra.mxu0 %v10672_v20  ;;  %v10714_v20 = vld [vmem:[#allocation11 + $0x88] ss:$16 sps:$4 sm:$0xff]  }
 0x57e   :  { %8236 = vmatprep.subr.bf16.mxu0 %v10680_v28  ;;  %v10719_v28 = vld [vmem:[#allocation11 + $0x6c] ss:$16 sps:$4 sm:$0xff]  }
 0x57f   :  { %8276 = vmatpush2.bf16.msra.mxu1 %v10681_v16  ;;  %v10791_v16 = vld [vmem:[#allocation11 + $0x624] ss:$16 sps:$4 sm:$0xff]  }
 0x580   :  { %8277 = vmatprep.subr.bf16.mxu1 %v10689_v7  ;;  %v10717_v7 = vld [vmem:[#allocation11 + $0x68] ss:$16 sps:$4 sm:$0xff]  }
 0x581   :  { %8237 = vmatpush2.bf16.msra.mxu0 %v10678_v48  ;;  %v10722_v48 = vld [vmem:[#allocation11 + $0x4c] ss:$16 sps:$4 sm:$0xff]  }
 0x582   :  { %8238 = vmatprep.subr.bf16.mxu0 %v10686_v21  ;;  %v10789_v21 = vld [vmem:[#allocation11 + $0x620] ss:$16 sps:$4 sm:$0xff]  }
 0x583   :  { %8278 = vmatpush2.bf16.msra.mxu1 %v10687_v56  ;;  %v10797_v56 = vld [vmem:[#allocation11 + $0x604] ss:$16 sps:$4 sm:$0xff]  }
 0x584   :  { %8279 = vmatprep.subr.bf16.mxu1 %v10695_v10  ;;  %v10720_v10 = vld [vmem:[#allocation11 + $0x48] ss:$16 sps:$4 sm:$0xff]  }
 0x585   :  { %8239 = vmatpush2.bf16.msra.mxu0 %v10684_v23  ;;  %v10725_v23 = vld [vmem:[#allocation11 + $0x2c] ss:$16 sps:$4 sm:$0xff]  }
 0x586   :  { %8240 = vmatprep.subr.bf16.mxu0 %v10692_v13  ;;  %v10795_v13 = vld [vmem:[#allocation11 + $0x600] ss:$16 sps:$4 sm:$0xff]  }
 0x587   :  { %8280 = vmatpush2.bf16.msra.mxu1 %v10693_v26  ;;  %v10803_v26 = vld [vmem:[#allocation11 + $0x7e4] ss:$16 sps:$4 sm:$0xff]  }
 0x588   :  { %8281 = vmatprep.subr.bf16.mxu1 %v10701_v12  ;;  %v10723_v12 = vld [vmem:[#allocation11 + $0x28] ss:$16 sps:$4 sm:$0xff]  }
 0x589   :  { %8241 = vmatpush2.bf16.msra.mxu0 %v10690_v29  ;;  %v10728_v29 = vld [vmem:[#allocation11 + $0xc] ss:$16 sps:$4 sm:$0xff]  }
 0x58a   :  { %8242 = vmatprep.subr.bf16.mxu0 %v10698_v33  ;;  %v10801_v33 = vld [vmem:[#allocation11 + $0x7e0] ss:$16 sps:$4 sm:$0xff]  }
 0x58b   :  { %8282 = vmatpush2.bf16.msra.mxu1 %v10699_v34  ;;  %v10726_v34 = vld [vmem:[#allocation11 + $0x8] ss:$16 sps:$4 sm:$0xff]  }
 0x58c   :  { %8283 = vmatprep.subr.bf16.mxu1 %v10704_v37  ;;  %v10731_v37 = vld [vmem:[#allocation11 + $0x1ec] ss:$16 sps:$4 sm:$0xff]  }
 0x58d   :  { %8243 = vmatpush2.bf16.msra.mxu0 %v10696_v38  ;;  %v10807_v38 = vld [vmem:[#allocation11 + $0x7c0] ss:$16 sps:$4 sm:$0xff]  }
 0x58e   :  { %8294 = vmatprep.subr.bf16.mxu0 %v10755_v39  ;;  %v10815_v39 = vld [vmem:[#allocation11 + $0x7a4] ss:$16 sps:$4 sm:$0xff]  }
 0x58f   :  { %8284 = vmatpush2.bf16.msra.mxu1 %v10702_v43  ;;  %v10734_v43 = vld [vmem:[#allocation11 + $0x1cc] ss:$16 sps:$4 sm:$0xff]  }
 0x590   :  { %v6433_v30 = vpop.f32.mrf.mxu0  ;;  %8245 = vmatmul.mubr.bf16.vlgmr.msra.gmra.mxu0 %v11608_v27  ;;  %8335 = vmatprep.subr.bf16.mxu1 %v10707_v5  ;;  %v10813_v5 = vld [vmem:[#allocation11 + $0x7a0] ss:$16 sps:$4 sm:$0xff]  }
 0x591   :  { %v11612_v49 = vpop.f32.mrf.mxu1  ;;  %8295 = vmatpush1.bf16.msra.mxu0 %v10753_v25  ;;  %v6434_v6 = vadd.f32 %v6433_v30, %v11597_v58  ;;  %v10773_v58 = vld [vmem:[#allocation11 + $0x684] ss:$16 sps:$4 sm:$0xff]   ;;  %v10732_v25 = vld [vmem:[#allocation11 + $0x1c8] ss:$16 sps:$4 sm:$0xff]   ;;  %v10819_v30 = vld [vmem:[#allocation11 + $0x780] ss:$16 sps:$4 sm:$0xff]  }
 0x592   :  { %v6435_v51 = vpop.f32.mrf.mxu0  ;;  %8296 = vmatprep.subr.bf16.mxu0 %v10761_v31  ;;  %v10737_v31 = vld [vmem:[#allocation11 + $0x1ac] ss:$16 sps:$4 sm:$0xff]  }
 0x593   :  { %v6436_v41 = vadd.f32 %v6435_v51, %v6395_v63  ;;  %v11615_v53 = vpop.f32.mrf.mxu1  ;;  %v11619_v59 = vpack.c.bf16 %v6434_v6, %v6434_v6  ;;  %v10827_v63 = vld [vmem:[#allocation11 + $0x764] ss:$16 sps:$4 sm:$0xff]   ;;  %v10740_v6 = vld [vmem:[#allocation11 + $0x18c] ss:$16 sps:$4 sm:$0xff]   ;;  %v10825_v51 = vld [vmem:[#allocation11 + $0x760] ss:$16 sps:$4 sm:$0xff]  }
 0x594   :  { %v6437_v32 = vpop.f32.mrf.mxu0 }
 0x595   :  { %v11617_v54 = vpack.c.bf16 %v6436_v41, %v6436_v41  ;;  %v6478_v35 = vpop.f32.mrf.mxu1  ;;  %8297 = vmatpush1.bf16.msra.mxu0 %v10759_v50  ;;  %v10735_v50 = vld [vmem:[#allocation11 + $0x1a8] ss:$16 sps:$4 sm:$0xff]   ;;  %v10743_v32 = vld [vmem:[#allocation11 + $0x16c] ss:$16 sps:$4 sm:$0xff]  }
 0x596   :  { %v6438_v55 = vpop.f32.mrf.mxu0  ;;  %8298 = vmatprep.subr.bf16.mxu0 %v10767_v52  ;;  %v10833_v52 = vld [vmem:[#allocation11 + $0x744] ss:$16 sps:$4 sm:$0xff]   ;;  %v10738_v41 = vld [vmem:[#allocation11 + $0x188] ss:$16 sps:$4 sm:$0xff]   ;;  %v10831_v35 = vld [vmem:[#allocation11 + $0x740] ss:$16 sps:$4 sm:$0xff]  }
 0x597   :  { %v6479_v3 = vpop.f32.mrf.mxu1  ;;  %8285 = vmatprep.mubr.bf16.mxu1 %v11617_v54  ;;  %v10741_v55 = vld [vmem:[#allocation11 + $0x168] ss:$16 sps:$4 sm:$0xff]  }
 0x598   :  { %8286 = vmatmul.mubr.bf16.vlgmr.msra.gmra.mxu1 %v11619_v59  ;;  %v10845_v3 = vld [vmem:[#allocation11 + $0x704] ss:$16 sps:$4 sm:$0xff]  }
 0x599   :  { %8336 = vmatpush1.bf16.msra.mxu1 %v10705_v57  ;;  %8367 = vmatprep.mubr.bf16.mxu1 %v11566_v40  ;;  %v10783_v40 = vld [vmem:[#allocation11 + $0x640] ss:$16 sps:$4 sm:$0xff]   ;;  %v10839_v57 = vld [vmem:[#allocation11 + $0x724] ss:$16 sps:$4 sm:$0xff]  }
 0x59a   :  { %8337 = vmatprep.subr.bf16.mxu1 %v10710_v61  ;;  %8299 = vmatpush1.bf16.msra.mxu0 %v10765_v62  ;;  %v10746_v61 = vld [vmem:[#allocation11 + $0x14c] ss:$16 sps:$4 sm:$0xff]   ;;  %v10837_v62 = vld [vmem:[#allocation11 + $0x720] ss:$16 sps:$4 sm:$0xff]  }
 0x59b   :  { %8300 = vmatprep.subr.bf16.mxu0 %v10773_v58  ;;  %v10744_v58 = vld [vmem:[#allocation11 + $0x148] ss:$16 sps:$4 sm:$0xff]  }
 0x59d   :  { %8338 = vmatpush1.bf16.msra.mxu1 %v10708_v8  ;;  %v10749_v8 = vld [vmem:[#allocation11 + $0x12c] ss:$16 sps:$4 sm:$0xff]  }
 0x59e   :  { %8339 = vmatprep.subr.bf16.mxu1 %v10713_v14  ;;  %8301 = vmatpush1.bf16.msra.mxu0 %v10771_v15  ;;  %v10843_v14 = vld [vmem:[#allocation11 + $0x700] ss:$16 sps:$4 sm:$0xff]   ;;  %v3375_v15 = vrot.slane %v11511_v24, %v1193_v9 }
 0x59f   :  { %8302 = vmatprep.subr.bf16.mxu0 %v10779_v1  ;;  %v10851_v1 = vld [vmem:[#allocation11 + $0x2ec] ss:$16 sps:$4 sm:$0xff]  }
 0x5a1   :  { %8340 = vmatpush1.bf16.msra.mxu1 %v10711_v36  ;;  %v10747_v36 = vld [vmem:[#allocation11 + $0x128] ss:$16 sps:$4 sm:$0xff]  }
 0x5a2   :  { %8341 = vmatprep.subr.bf16.mxu1 %v10716_v0  ;;  %8303 = vmatpush1.bf16.msra.mxu0 %v10777_v18  ;;  %v10752_v0 = vld [vmem:[#allocation11 + $0x10c] ss:$16 sps:$4 sm:$0xff]   ;;  %v6475_v18 = vadd.f32 %v11612_v49, %v3375_v15 }
 0x5a3   :  { %8304 = vmatprep.subr.bf16.mxu0 %v10785_v22  ;;  %v10764_v49 = vld [vmem:[#allocation11 + $0x4cc] ss:$16 sps:$4 sm:$0xff]  }
 0x5a5   :  { %8342 = vmatpush1.bf16.msra.mxu1 %v10714_v20 }
 0x5a6   :  { %8343 = vmatprep.subr.bf16.mxu1 %v10719_v28  ;;  %8305 = vmatpush1.bf16.msra.mxu0 %v10783_v40  ;;  %v10750_v40 = vld [vmem:[#allocation11 + $0x108] ss:$16 sps:$4 sm:$0xff]  }
 0x5a7   :  { %8306 = vmatprep.subr.bf16.mxu0 %v10791_v16 }
 0x5a9   :  { %8344 = vmatpush1.bf16.msra.mxu1 %v10717_v7  ;;  %v10758_v7 = vld [vmem:[#allocation11 + $0x4ec] ss:$16 sps:$4 sm:$0xff]  }
 0x5aa   :  { %8345 = vmatprep.subr.bf16.mxu1 %v10722_v48  ;;  %8307 = vmatpush1.bf16.msra.mxu0 %v10789_v21 }
 0x5ab   :  { %8308 = vmatprep.subr.bf16.mxu0 %v10797_v56 }
 0x5ad   :  { %8346 = vmatpush1.bf16.msra.mxu1 %v10720_v10  ;;  %v10756_v10 = vld [vmem:[#allocation11 + $0x4e8] ss:$16 sps:$4 sm:$0xff]  }
 0x5ae   :  { %8347 = vmatprep.subr.bf16.mxu1 %v10725_v23  ;;  %8309 = vmatpush1.bf16.msra.mxu0 %v10795_v13 }
 0x5af   :  { %8310 = vmatprep.subr.bf16.mxu0 %v10803_v26  ;;  %v10762_v26 = vld [vmem:[#allocation11 + $0x4c8] ss:$16 sps:$4 sm:$0xff]  }
 0x5b1   :  { %8348 = vmatpush1.bf16.msra.mxu1 %v10723_v12  ;;  %v10770_v12 = vld [vmem:[#allocation11 + $0x4ac] ss:$16 sps:$4 sm:$0xff]  }
 0x5b2   :  { %8349 = vmatprep.subr.bf16.mxu1 %v10728_v29  ;;  %8311 = vmatpush2.bf16.msra.mxu0 %v10801_v33  ;;  %v10768_v29 = vld [vmem:[#allocation11 + $0x4a8] ss:$16 sps:$4 sm:$0xff]   ;;  %v10776_v33 = vld [vmem:[#allocation11 + $0x48c] ss:$16 sps:$4 sm:$0xff]  }
 0x5b3   :  { %8312 = vmatprep.subr.bf16.mxu0 %v10809_v60  ;;  %v10774_v60 = vld [vmem:[#allocation11 + $0x488] ss:$16 sps:$4 sm:$0xff]  }
 0x5b5   :  { %8350 = vmatpush1.bf16.msra.mxu1 %v10726_v34  ;;  %v10782_v34 = vld [vmem:[#allocation11 + $0x46c] ss:$16 sps:$4 sm:$0xff]  }
 0x5b6   :  { %8351 = vmatprep.subr.bf16.mxu1 %v10731_v37  ;;  %8313 = vmatpush2.bf16.msra.mxu0 %v10807_v38  ;;  %v10780_v37 = vld [vmem:[#allocation11 + $0x468] ss:$16 sps:$4 sm:$0xff]   ;;  %v10788_v38 = vld [vmem:[#allocation11 + $0x44c] ss:$16 sps:$4 sm:$0xff]  }
 0x5b7   :  { %8314 = vmatprep.subr.bf16.mxu0 %v10815_v39  ;;  %v10794_v39 = vld [vmem:[#allocation11 + $0x42c] ss:$16 sps:$4 sm:$0xff]  }
 0x5b9   :  { %8352 = vmatpush2.bf16.msra.mxu1 %v10729_v42  ;;  %v10800_v42 = vld [vmem:[#allocation11 + $0x40c] ss:$16 sps:$4 sm:$0xff]  }
 0x5ba   :  { %8353 = vmatprep.subr.bf16.mxu1 %v10734_v43  ;;  %8315 = vmatpush2.bf16.msra.mxu0 %v10813_v5  ;;  %v10798_v43 = vld [vmem:[#allocation11 + $0x408] ss:$16 sps:$4 sm:$0xff]   ;;  %v10806_v5 = vld [vmem:[#allocation11 + $0x5ec] ss:$16 sps:$4 sm:$0xff]  }
 0x5bb   :  { %8316 = vmatprep.subr.bf16.mxu0 %v10821_v46  ;;  %v10804_v46 = vld [vmem:[#allocation11 + $0x5e8] ss:$16 sps:$4 sm:$0xff]  }
 0x5bd   :  { %8354 = vmatpush2.bf16.msra.mxu1 %v10732_v25  ;;  %v10812_v25 = vld [vmem:[#allocation11 + $0x5cc] ss:$16 sps:$4 sm:$0xff]  }
 0x5be   :  { %8355 = vmatprep.subr.bf16.mxu1 %v10737_v31  ;;  %8317 = vmatpush2.bf16.msra.mxu0 %v10819_v30  ;;  %v10810_v31 = vld [vmem:[#allocation11 + $0x5c8] ss:$16 sps:$4 sm:$0xff]   ;;  %v10818_v30 = vld [vmem:[#allocation11 + $0x5ac] ss:$16 sps:$4 sm:$0xff]  }
 0x5bf   :  { %8318 = vmatprep.subr.bf16.mxu0 %v10827_v63  ;;  %v10816_v63 = vld [vmem:[#allocation11 + $0x5a8] ss:$16 sps:$4 sm:$0xff]  }
 0x5c1   :  { %8356 = vmatpush2.bf16.msra.mxu1 %v10735_v50  ;;  %v10824_v50 = vld [vmem:[#allocation11 + $0x58c] ss:$16 sps:$4 sm:$0xff]  }
 0x5c2   :  { %8357 = vmatprep.subr.bf16.mxu1 %v10740_v6  ;;  %8319 = vmatpush2.bf16.msra.mxu0 %v10825_v51  ;;  %v10822_v6 = vld [vmem:[#allocation11 + $0x588] ss:$16 sps:$4 sm:$0xff]   ;;  %v10830_v51 = vld [vmem:[#allocation11 + $0x56c] ss:$16 sps:$4 sm:$0xff]  }
 0x5c3   :  { %8320 = vmatprep.subr.bf16.mxu0 %v10833_v52  ;;  %v10828_v52 = vld [vmem:[#allocation11 + $0x568] ss:$16 sps:$4 sm:$0xff]  }
 0x5c5   :  { %8358 = vmatpush2.bf16.msra.mxu1 %v10738_v41  ;;  %v10836_v41 = vld [vmem:[#allocation11 + $0x54c] ss:$16 sps:$4 sm:$0xff]  }
 0x5c6   :  { %8359 = vmatprep.subr.bf16.mxu1 %v10743_v32  ;;  %8321 = vmatpush2.bf16.msra.mxu0 %v10831_v35  ;;  %v3379_v32 = vrot.slane %v11511_v24, %v1197_v11  ;;  %v10834_v35 = vld [vmem:[#allocation11 + $0x548] ss:$16 sps:$4 sm:$0xff]  }
 0x5c7   :  { %8322 = vmatprep.subr.bf16.mxu0 %v10839_v57  ;;  %v10842_v57 = vld [vmem:[#allocation11 + $0x52c] ss:$16 sps:$4 sm:$0xff]  }
 0x5c9   :  { %8360 = vmatpush2.bf16.msra.mxu1 %v10741_v55  ;;  %v6477_v55 = vadd.f32 %v11615_v53, %v3379_v32  ;;  %v10969_v32 = vld [vmem:[#allocation13 + $0xf0] ss:$8 sps:$4 sm:$0xff]  }
 0x5ca   :  { %8361 = vmatprep.subr.bf16.mxu1 %v10746_v61  ;;  %8323 = vmatpush2.bf16.msra.mxu0 %v10837_v62  ;;  %v10840_v62 = vld [vmem:[#allocation11 + $0x528] ss:$16 sps:$4 sm:$0xff]  }
 0x5cb   :  { %8324 = vmatprep.subr.bf16.mxu0 %v10845_v3  ;;  %v10848_v3 = vld [vmem:[#allocation11 + $0x50c] ss:$16 sps:$4 sm:$0xff]  }
 0x5cd   :  { %8362 = vmatpush2.bf16.msra.mxu1 %v10744_v58 }
 0x5ce   :  { %8363 = vmatprep.subr.bf16.mxu1 %v10749_v8  ;;  %8325 = vmatpush2.bf16.msra.mxu0 %v10843_v14 }
 0x5cf   :  { %8376 = vmatprep.subr.bf16.mxu0 %v10851_v1 }
 0x5d0   :  { %v6515_v22 = vpop.f32.mrf.mxu0 }
 0x5d1   :  { %v6516_v20 = vadd.f32 %v6515_v22, %v6475_v18  ;;  %v6556_v28 = vpop.f32.mrf.mxu1  ;;  %8364 = vmatpush2.bf16.msra.mxu1 %v10747_v36  ;;  %v10849_v18 = vld [vmem:[#allocation11 + $0x2e8] ss:$16 sps:$4 sm:$0xff]  }
 0x5d2   :  { %v11628_v16 = vpop.f32.mrf.mxu0  ;;  %8365 = vmatprep.subr.bf16.mxu1 %v10752_v0 }
 0x5d3   :  { %v11630_v9 = vadd.f32 %v6556_v28, %v6516_v20  ;;  %v11632_v48 = vpop.f32.mrf.mxu1  ;;  %v6518_v61 = vadd.f32 %v11628_v16, %v6477_v55  ;;  %v10854_v28 = vld [vmem:[#allocation11 + $0x2cc] ss:$16 sps:$4 sm:$0xff]   ;;  %v10852_v16 = vld [vmem:[#allocation11 + $0x2c8] ss:$16 sps:$4 sm:$0xff]  }
 0x5d4   :  { %v6519_v21 = vpop.f32.mrf.mxu0  ;;  %v10882_v55 = vld [vmem:[#allocation11 + $0x388] ss:$16 sps:$4 sm:$0xff]  }
 0x5d5   :  { %v6560_v56 = vpop.f32.mrf.mxu1  ;;  %8366 = vmatpush2.bf16.msra.mxu1 %v10750_v40  ;;  %v6559_v8 = vadd.f32 %v11632_v48, %v6518_v61  ;;  %v10860_v48 = vld [vmem:[#allocation11 + $0x28c] ss:$16 sps:$4 sm:$0xff]   ;;  %v10945_v21 = vld [vmem:[#allocation13 + $0x70] ss:$8 sps:$4 sm:$0xff]   ;;  %v10972_v61 = vld [vmem:[#allocation13 + $0xe0] ss:$8 sps:$4 sm:$0xff]  }
 0x5d6   :  { %v6520_v23 = vpop.f32.mrf.mxu0  ;;  %8417 = vmatprep.subr.bf16.mxu1 %v10758_v7  ;;  %v10857_v7 = vld [vmem:[#allocation11 + $0x2ac] ss:$16 sps:$4 sm:$0xff]  }
 0x5d7   :  { %v6561_v13 = vpop.f32.mrf.mxu1  ;;  %v10947_v56 = vld [vmem:[#allocation13 + $0x74] ss:$8 sps:$4 sm:$0xff]   ;;  %v10858_v23 = vld [vmem:[#allocation11 + $0x288] ss:$16 sps:$4 sm:$0xff]  }
 0x5d8   :  { %8368 = vmatmul.mubr.bf16.vlgmr.msra.gmra.mxu1 %v11587_v17  ;;  %v10786_v17 = vld [vmem:[#allocation11 + $0x448] ss:$16 sps:$4 sm:$0xff]   ;;  %v10953_v13 = vld [vmem:[#allocation13 + $0x54] ss:$8 sps:$4 sm:$0xff]  }
 0x5d9   :  { %8418 = vmatpush1.bf16.msra.mxu1 %v10756_v10  ;;  %8449 = vmatprep.mubr.bf16.mxu1 %v11617_v54  ;;  %v10792_v54 = vld [vmem:[#allocation11 + $0x428] ss:$16 sps:$4 sm:$0xff]   ;;  %v10950_v10 = vld [vmem:[#allocation13 + $0x64] ss:$8 sps:$4 sm:$0xff]  }
 0x5da   :  { %8419 = vmatprep.subr.bf16.mxu1 %v10764_v49  ;;  %v10863_v49 = vld [vmem:[#allocation11 + $0x26c] ss:$16 sps:$4 sm:$0xff]  }
 0x5dd   :  { %8420 = vmatpush1.bf16.msra.mxu1 %v10762_v26  ;;  %v10951_v26 = vld [vmem:[#allocation13 + $0x50] ss:$8 sps:$4 sm:$0xff]  }
 0x5de   :  { %8421 = vmatprep.subr.bf16.mxu1 %v10770_v12  ;;  %v10866_v12 = vld [vmem:[#allocation11 + $0x24c] ss:$16 sps:$4 sm:$0xff]  }
 0x5e1   :  { %8422 = vmatpush1.bf16.msra.mxu1 %v10768_v29  ;;  %v10956_v29 = vld [vmem:[#allocation13 + $0x44] ss:$8 sps:$4 sm:$0xff]  }
 0x5e2   :  { %8423 = vmatprep.subr.bf16.mxu1 %v10776_v33  ;;  %v10864_v33 = vld [vmem:[#allocation11 + $0x248] ss:$16 sps:$4 sm:$0xff]  }
 0x5e5   :  { %8424 = vmatpush1.bf16.msra.mxu1 %v10774_v60  ;;  %v10954_v60 = vld [vmem:[#allocation13 + $0x40] ss:$8 sps:$4 sm:$0xff]  }
 0x5e6   :  { %8425 = vmatprep.subr.bf16.mxu1 %v10782_v34  ;;  %v10869_v34 = vld [vmem:[#allocation11 + $0x22c] ss:$16 sps:$4 sm:$0xff]  }
 0x5e9   :  { %8426 = vmatpush1.bf16.msra.mxu1 %v10780_v37  ;;  %v10959_v37 = vld [vmem:[#allocation13 + $0x34] ss:$8 sps:$4 sm:$0xff]  }
 0x5ea   :  { %8427 = vmatprep.subr.bf16.mxu1 %v10788_v38  ;;  %v10867_v38 = vld [vmem:[#allocation11 + $0x228] ss:$16 sps:$4 sm:$0xff]  }
 0x5ed   :  { %8428 = vmatpush1.bf16.msra.mxu1 %v10786_v17  ;;  %v10957_v17 = vld [vmem:[#allocation13 + $0x30] ss:$8 sps:$4 sm:$0xff]  }
 0x5ee   :  { %8429 = vmatprep.subr.bf16.mxu1 %v10794_v39  ;;  %v10872_v39 = vld [vmem:[#allocation11 + $0x20c] ss:$16 sps:$4 sm:$0xff]  }
 0x5f1   :  { %8430 = vmatpush1.bf16.msra.mxu1 %v10792_v54  ;;  %v10962_v54 = vld [vmem:[#allocation13 + $0x24] ss:$8 sps:$4 sm:$0xff]  }
 0x5f2   :  { %8431 = vmatprep.subr.bf16.mxu1 %v10800_v42  ;;  %v10870_v42 = vld [vmem:[#allocation11 + $0x208] ss:$16 sps:$4 sm:$0xff]  }
 0x5f5   :  { %8432 = vmatpush1.bf16.msra.mxu1 %v10798_v43  ;;  %v10960_v43 = vld [vmem:[#allocation13 + $0x20] ss:$8 sps:$4 sm:$0xff]  }
 0x5f6   :  { %8433 = vmatprep.subr.bf16.mxu1 %v10806_v5  ;;  %v10875_v5 = vld [vmem:[#allocation11 + $0x3ec] ss:$16 sps:$4 sm:$0xff]  }
 0x5f9   :  { %8434 = vmatpush2.bf16.msra.mxu1 %v10804_v46  ;;  %v10965_v46 = vld [vmem:[#allocation13 + $0x14] ss:$8 sps:$4 sm:$0xff]  }
 0x5fa   :  { %8435 = vmatprep.subr.bf16.mxu1 %v10812_v25  ;;  %v10873_v25 = vld [vmem:[#allocation11 + $0x3e8] ss:$16 sps:$4 sm:$0xff]  }
 0x5fd   :  { %8436 = vmatpush2.bf16.msra.mxu1 %v10810_v31  ;;  %v10963_v31 = vld [vmem:[#allocation13 + $0x10] ss:$8 sps:$4 sm:$0xff]  }
 0x5fe   :  { %8437 = vmatprep.subr.bf16.mxu1 %v10818_v30  ;;  %v10878_v30 = vld [vmem:[#allocation11 + $0x3cc] ss:$16 sps:$4 sm:$0xff]  }
 0x601   :  { %8438 = vmatpush2.bf16.msra.mxu1 %v10816_v63  ;;  %v10968_v63 = vld [vmem:[#allocation13 + $0x4] ss:$8 sps:$4 sm:$0xff]  }
 0x602   :  { %8439 = vmatprep.subr.bf16.mxu1 %v10824_v50  ;;  %v10876_v50 = vld [vmem:[#allocation11 + $0x3c8] ss:$16 sps:$4 sm:$0xff]  }
 0x605   :  { %8440 = vmatpush2.bf16.msra.mxu1 %v10822_v6  ;;  %v10966_v6 = vld [vmem:[#allocation13] ss:$8 sps:$4 sm:$0xff]  }
 0x606   :  { %8441 = vmatprep.subr.bf16.mxu1 %v10830_v51  ;;  %v10881_v51 = vld [vmem:[#allocation11 + $0x3ac] ss:$16 sps:$4 sm:$0xff]  }
 0x609   :  { %8442 = vmatpush2.bf16.msra.mxu1 %v10828_v52  ;;  %v10971_v52 = vld [vmem:[#allocation13 + $0xf4] ss:$8 sps:$4 sm:$0xff]  }
 0x60a   :  { %8443 = vmatprep.subr.bf16.mxu1 %v10836_v41  ;;  %v10879_v41 = vld [vmem:[#allocation11 + $0x3a8] ss:$16 sps:$4 sm:$0xff]  }
 0x60d   :  { %8444 = vmatpush2.bf16.msra.mxu1 %v10834_v35  ;;  %v10884_v35 = vld [vmem:[#allocation11 + $0x38c] ss:$16 sps:$4 sm:$0xff]  }
 0x60e   :  { %8445 = vmatprep.subr.bf16.mxu1 %v10842_v57  ;;  %v10974_v57 = vld [vmem:[#allocation13 + $0xe4] ss:$8 sps:$4 sm:$0xff]  }
 0x610   :  { %v6597_v58 = vpop.f32.mrf.mxu0 }
 0x611   :  { %v11642_v14 = vpop.f32.mrf.mxu1  ;;  %8446 = vmatpush2.bf16.msra.mxu1 %v10840_v62  ;;  %v6598_v11 = vadd.f32 %v6597_v58, %v11630_v9  ;;  %v10855_v9 = vld [vmem:[#allocation11 + $0x2a8] ss:$16 sps:$4 sm:$0xff]   ;;  %v10887_v62 = vld [vmem:[#allocation11 + $0x36c] ss:$16 sps:$4 sm:$0xff]  }
 0x612   :  { %v6599_v24 = vpop.f32.mrf.mxu0  ;;  %8447 = vmatprep.subr.bf16.mxu1 %v10848_v3  ;;  %v10977_v3 = vld [vmem:[#allocation13 + $0xd4] ss:$8 sps:$4 sm:$0xff]   ;;  %v10885_v58 = vld [vmem:[#allocation11 + $0x368] ss:$16 sps:$4 sm:$0xff]  }
 0x613   :  { %v6600_v15 = vadd.f32 %v6599_v24, %v6559_v8  ;;  %v11645_v1 = vpop.f32.mrf.mxu1  ;;  %v11649_v22 = vpack.c.bf16 %v6598_v11, %v6598_v11  ;;  %v10975_v8 = vld [vmem:[#allocation13 + $0xd0] ss:$8 sps:$4 sm:$0xff]   ;;  %v10980_v11 = vld [vmem:[#allocation13 + $0xc4] ss:$8 sps:$4 sm:$0xff]  }
 0x614   :  { %v6601_v53 = vpop.f32.mrf.mxu0  ;;  %v11655_v24 = vld [vmem:[#allocation16 + $0x4] ss:$8 sm:$0xf] }
 0x615   :  { %v11647_v36 = vpack.c.bf16 %v6600_v15, %v6600_v15  ;;  %v8209_v0 = vpop.f32.mrf.mxu1  ;;  %8448 = vmatpush2.bf16.msra.mxu1 %v10846_v44  ;;  %v10890_v44 = vld [vmem:[#allocation11 + $0x34c] ss:$16 sps:$4 sm:$0xff]   ;;  %v10888_v15 = vld [vmem:[#allocation11 + $0x348] ss:$16 sps:$4 sm:$0xff]  }
 0x616   :  { %v6602_v20 = vpop.f32.mrf.mxu0  ;;  %8900 = vmatprep.subr.bf16.mxu1 %v10947_v56  ;;  %v10978_v53 = vld [vmem:[#allocation13 + $0xc0] ss:$8 sps:$4 sm:$0xff]   ;;  %v10893_v0 = vld [vmem:[#allocation11 + $0x32c] ss:$16 sps:$4 sm:$0xff]  }
 0x617   :  { %v8210_v40 = vpop.f32.mrf.mxu1  ;;  %8326 = vmatprep.mubr.bf16.mxu0 %v11647_v36  ;;  %v6874_v20 = vrot.slane %v11655_v24, %v11391_v45 }
 0x618   :  { %8450 = vmatmul.mubr.bf16.vlgmr.msra.gmra.mxu1 %v11619_v59  ;;  %8327 = vmatmul.mubr.bf16.vlgmr.msra.gmra.mxu0 %v11649_v22  ;;  %v10948_v59 = vld [vmem:[#allocation13 + $0x60] ss:$8 sps:$4 sm:$0xff]  }
 0x619   :  { %8377 = vmatpush1.bf16.msra.mxu0 %v10849_v18  ;;  %8408 = vmatprep.mubr.bf16.mxu0 %v11590_v19  ;;  %v10861_v19 = vld [vmem:[#allocation11 + $0x268] ss:$16 sps:$4 sm:$0xff]   ;;  %v10983_v18 = vld [vmem:[#allocation13 + $0xb4] ss:$8 sps:$4 sm:$0xff]  }
 0x61a   :  { %8378 = vmatprep.subr.bf16.mxu0 %v10854_v28  ;;  %8901 = vmatpush1.bf16.msra.mxu1 %v10945_v21  ;;  %v6878_v28 = vrot.slane %v11655_v24, %v11394_v47  ;;  %v10891_v40 = vld [vmem:[#allocation11 + $0x328] ss:$16 sps:$4 sm:$0xff]  }
 0x61b   :  { %8902 = vmatprep.subr.bf16.mxu1 %v10950_v10 }
 0x61c   :  { %v8208_v56 = vadd.f32 %v11645_v1, %v6878_v28 }
 0x61d   :  { %8379 = vmatpush1.bf16.msra.mxu0 %v10852_v16  ;;  %v10981_v16 = vld [vmem:[#allocation13 + $0xb0] ss:$8 sps:$4 sm:$0xff]  }
 0x61e   :  { %8380 = vmatprep.subr.bf16.mxu0 %v10857_v7  ;;  %8903 = vmatpush1.bf16.msra.mxu1 %v10948_v59  ;;  %v10896_v7 = vld [vmem:[#allocation11 + $0x30c] ss:$16 sps:$4 sm:$0xff]   ;;  %v10984_v59 = vld [vmem:[#allocation13 + $0xa0] ss:$8 sps:$4 sm:$0xff]  }
 0x61f   :  { %8904 = vmatprep.subr.bf16.mxu1 %v10953_v13  ;;  %v10899_v13 = vld [vmem:[#allocation11 + $0x6ec] ss:$16 sps:$4 sm:$0xff]  }
 0x621   :  { %8381 = vmatpush1.bf16.msra.mxu0 %v10855_v9  ;;  %v10986_v9 = vld [vmem:[#allocation13 + $0xa4] ss:$8 sps:$4 sm:$0xff]  }
 0x622   :  { %8382 = vmatprep.subr.bf16.mxu0 %v10860_v48  ;;  %8905 = vmatpush1.bf16.msra.mxu1 %v10951_v26  ;;  %v8206_v48 = vadd.f32 %v11642_v14, %v6874_v20  ;;  %v10902_v14 = vld [vmem:[#allocation11 + $0x6cc] ss:$16 sps:$4 sm:$0xff]  }
 0x623   :  { %8906 = vmatprep.subr.bf16.mxu1 %v10956_v29 }
 0x625   :  { %8383 = vmatpush1.bf16.msra.mxu0 %v10858_v23  ;;  %v10894_v23 = vld [vmem:[#allocation11 + $0x308] ss:$16 sps:$4 sm:$0xff]  }
 0x626   :  { %8384 = vmatprep.subr.bf16.mxu0 %v10863_v49  ;;  %8907 = vmatpush1.bf16.msra.mxu1 %v10954_v60 }
 0x627   :  { %8908 = vmatprep.subr.bf16.mxu1 %v10959_v37  ;;  %v10987_v37 = vld [vmem:[#allocation13 + $0x90] ss:$8 sps:$4 sm:$0xff]  }
 0x629   :  { %8385 = vmatpush1.bf16.msra.mxu0 %v10861_v19 }
 0x62a   :  { %8386 = vmatprep.subr.bf16.mxu0 %v10866_v12  ;;  %8909 = vmatpush1.bf16.msra.mxu1 %v10957_v17  ;;  %v10897_v12 = vld [vmem:[#allocation11 + $0x6e8] ss:$16 sps:$4 sm:$0xff]   ;;  %v10905_v17 = vld [vmem:[#allocation11 + $0x6ac] ss:$16 sps:$4 sm:$0xff]  }
 0x62b   :  { %8910 = vmatprep.subr.bf16.mxu1 %v10962_v54 }
 0x62d   :  { %8387 = vmatpush1.bf16.msra.mxu0 %v10864_v33  ;;  %v10989_v33 = vld [vmem:[#allocation13 + $0x94] ss:$8 sps:$4 sm:$0xff]  }
 0x62e   :  { %8388 = vmatprep.subr.bf16.mxu0 %v10869_v34  ;;  %8911 = vmatpush1.bf16.msra.mxu1 %v10960_v43  ;;  %v10900_v34 = vld [vmem:[#allocation11 + $0x6c8] ss:$16 sps:$4 sm:$0xff]  }
 0x62f   :  { %8912 = vmatprep.subr.bf16.mxu1 %v10965_v46  ;;  %v10990_v43 = vld [vmem:[#allocation13 + $0x80] ss:$8 sps:$4 sm:$0xff]   ;;  %v10908_v46 = vld [vmem:[#allocation11 + $0x68c] ss:$16 sps:$4 sm:$0xff]  }
 0x631   :  { %8389 = vmatpush1.bf16.msra.mxu0 %v10867_v38 }
 0x632   :  { %8390 = vmatprep.subr.bf16.mxu0 %v10872_v39  ;;  %8913 = vmatpush1.bf16.msra.mxu1 %v10963_v31  ;;  %v10909_v31 = vld [vmem:[#allocation11 + $0x668] ss:$16 sps:$4 sm:$0xff]  }
 0x633   :  { %8914 = vmatprep.subr.bf16.mxu1 %v10968_v63  ;;  %v10912_v63 = vld [vmem:[#allocation11 + $0x648] ss:$16 sps:$4 sm:$0xff]  }
 0x635   :  { %8391 = vmatpush1.bf16.msra.mxu0 %v10870_v42  ;;  %v10992_v42 = vld [vmem:[#allocation13 + $0x84] ss:$8 sps:$4 sm:$0xff]  }
 0x636   :  { %8392 = vmatprep.subr.bf16.mxu0 %v10875_v5  ;;  %8915 = vmatpush1.bf16.msra.mxu1 %v10966_v6  ;;  %v10915_v6 = vld [vmem:[#allocation11 + $0x628] ss:$16 sps:$4 sm:$0xff]  }
 0x637   :  { %8916 = vmatprep.subr.bf16.mxu1 %v10971_v52  ;;  %v10918_v52 = vld [vmem:[#allocation11 + $0x608] ss:$16 sps:$4 sm:$0xff]  }
 0x639   :  { %8393 = vmatpush2.bf16.msra.mxu0 %v10873_v25  ;;  %v10911_v25 = vld [vmem:[#allocation11 + $0x66c] ss:$16 sps:$4 sm:$0xff]  }
 0x63a   :  { %8394 = vmatprep.subr.bf16.mxu0 %v10878_v30  ;;  %8917 = vmatpush2.bf16.msra.mxu1 %v10969_v32  ;;  %v10914_v30 = vld [vmem:[#allocation11 + $0x64c] ss:$16 sps:$4 sm:$0xff]   ;;  %v10921_v32 = vld [vmem:[#allocation11 + $0x7e8] ss:$16 sps:$4 sm:$0xff]  }
 0x63b   :  { %8918 = vmatprep.subr.bf16.mxu1 %v10974_v57  ;;  %v10924_v57 = vld [vmem:[#allocation11 + $0x7c8] ss:$16 sps:$4 sm:$0xff]  }
 0x63d   :  { %8395 = vmatpush2.bf16.msra.mxu0 %v10876_v50  ;;  %v10917_v50 = vld [vmem:[#allocation11 + $0x62c] ss:$16 sps:$4 sm:$0xff]  }
 0x63e   :  { %8396 = vmatprep.subr.bf16.mxu0 %v10881_v51  ;;  %8919 = vmatpush2.bf16.msra.mxu1 %v10972_v61  ;;  %v10920_v51 = vld [vmem:[#allocation11 + $0x60c] ss:$16 sps:$4 sm:$0xff]   ;;  %v10927_v61 = vld [vmem:[#allocation11 + $0x7a8] ss:$16 sps:$4 sm:$0xff]  }
 0x63f   :  { %8920 = vmatprep.subr.bf16.mxu1 %v10977_v3  ;;  %v10930_v3 = vld [vmem:[#allocation11 + $0x788] ss:$16 sps:$4 sm:$0xff]  }
 0x641   :  { %8397 = vmatpush2.bf16.msra.mxu0 %v10879_v41  ;;  %v10923_v41 = vld [vmem:[#allocation11 + $0x7ec] ss:$16 sps:$4 sm:$0xff]  }
 0x642   :  { %8398 = vmatprep.subr.bf16.mxu0 %v10884_v35  ;;  %8921 = vmatpush2.bf16.msra.mxu1 %v10975_v8  ;;  %v10926_v35 = vld [vmem:[#allocation11 + $0x7cc] ss:$16 sps:$4 sm:$0xff]   ;;  %v10933_v8 = vld [vmem:[#allocation11 + $0x768] ss:$16 sps:$4 sm:$0xff]  }
 0x643   :  { %8922 = vmatprep.subr.bf16.mxu1 %v10980_v11  ;;  %v10936_v11 = vld [vmem:[#allocation11 + $0x748] ss:$16 sps:$4 sm:$0xff]  }
 0x645   :  { %8399 = vmatpush2.bf16.msra.mxu0 %v10882_v55  ;;  %v10929_v55 = vld [vmem:[#allocation11 + $0x7ac] ss:$16 sps:$4 sm:$0xff]  }
 0x646   :  { %8400 = vmatprep.subr.bf16.mxu0 %v10887_v62  ;;  %8923 = vmatpush2.bf16.msra.mxu1 %v10978_v53  ;;  %v10932_v62 = vld [vmem:[#allocation11 + $0x78c] ss:$16 sps:$4 sm:$0xff]   ;;  %v10939_v53 = vld [vmem:[#allocation11 + $0x728] ss:$16 sps:$4 sm:$0xff]  }
 0x647   :  { %8924 = vmatprep.subr.bf16.mxu1 %v10983_v18  ;;  %v10942_v18 = vld [vmem:[#allocation11 + $0x708] ss:$16 sps:$4 sm:$0xff]  }
 0x649   :  { %8401 = vmatpush2.bf16.msra.mxu0 %v10885_v58  ;;  %v10935_v58 = vld [vmem:[#allocation11 + $0x76c] ss:$16 sps:$4 sm:$0xff]  }
 0x64a   :  { %8402 = vmatprep.subr.bf16.mxu0 %v10890_v44  ;;  %8925 = vmatpush2.bf16.msra.mxu1 %v10981_v16  ;;  %v10938_v44 = vld [vmem:[#allocation11 + $0x74c] ss:$16 sps:$4 sm:$0xff]  }
 0x64b   :  { %8926 = vmatprep.subr.bf16.mxu1 %v10986_v9  ;;  %v10995_v9 = vld [vmem:[#allocation13 + $0x174] ss:$8 sps:$4 sm:$0xff]  }
 0x64d   :  { %8403 = vmatpush2.bf16.msra.mxu0 %v10888_v15  ;;  %v10941_v15 = vld [vmem:[#allocation11 + $0x72c] ss:$16 sps:$4 sm:$0xff]  }
 0x64e   :  { %8404 = vmatprep.subr.bf16.mxu0 %v10893_v0  ;;  %8927 = vmatpush2.bf16.msra.mxu1 %v10984_v59  ;;  %v10944_v0 = vld [vmem:[#allocation11 + $0x70c] ss:$16 sps:$4 sm:$0xff]   ;;  %v11002_v59 = vld [vmem:[#allocation13 + $0x140] ss:$8 sps:$4 sm:$0xff]  }
 0x64f   :  { %8928 = vmatprep.subr.bf16.mxu1 %v10989_v33  ;;  %v11017_v33 = vld [vmem:[#allocation13 + $0x1f0] ss:$8 sps:$4 sm:$0xff]  }
 0x650   :  { %v8246_v21 = vpop.f32.mrf.mxu0 }
 0x651   :  { %v8247_v10 = vadd.f32 %v8246_v21, %v8206_v48  ;;  %8405 = vmatpush2.bf16.msra.mxu0 %v10891_v40  ;;  %v10998_v48 = vld [vmem:[#allocation13 + $0x164] ss:$8 sps:$4 sm:$0xff]   ;;  %v10996_v21 = vld [vmem:[#allocation13 + $0x160] ss:$8 sps:$4 sm:$0xff]  }
 0x652   :  { %v8248_v49 = vpop.f32.mrf.mxu0  ;;  %8406 = vmatprep.subr.bf16.mxu0 %v10896_v7  ;;  %8929 = vmatpush2.bf16.msra.mxu1 %v10987_v37  ;;  %v10993_v7 = vld [vmem:[#allocation13 + $0x170] ss:$8 sps:$4 sm:$0xff]   ;;  %v11020_v37 = vld [vmem:[#allocation13 + $0x1e0] ss:$8 sps:$4 sm:$0xff]  }
 0x653   :  { %v8249_v19 = vadd.f32 %v8248_v49, %v8208_v56  ;;  %8930 = vmatprep.subr.bf16.mxu1 %v10992_v42  ;;  %v11001_v56 = vld [vmem:[#allocation13 + $0x154] ss:$8 sps:$4 sm:$0xff]   ;;  %v11005_v49 = vld [vmem:[#allocation13 + $0x130] ss:$8 sps:$4 sm:$0xff]   ;;  %v11026_v42 = vld [vmem:[#allocation13 + $0x1c0] ss:$8 sps:$4 sm:$0xff]  }
 0x654   :  { %v8250_v26 = vpop.f32.mrf.mxu0 }
 0x655   :  { %8407 = vmatpush2.bf16.msra.mxu0 %v10894_v23  ;;  %v11004_v23 = vld [vmem:[#allocation13 + $0x144] ss:$8 sps:$4 sm:$0xff]   ;;  %v11013_v26 = vld [vmem:[#allocation13 + $0x114] ss:$8 sps:$4 sm:$0xff]  }
 0x656   :  { %v8251_v29 = vpop.f32.mrf.mxu0  ;;  %8458 = vmatprep.subr.bf16.mxu0 %v10899_v13  ;;  %8931 = vmatpush2.bf16.msra.mxu1 %v10990_v43  ;;  %v11010_v13 = vld [vmem:[#allocation13 + $0x124] ss:$8 sps:$4 sm:$0xff]   ;;  %v11029_v43 = vld [vmem:[#allocation13 + $0x1b0] ss:$8 sps:$4 sm:$0xff]  }
 0x657   :  { %v11016_v29 = vld [vmem:[#allocation13 + $0x104] ss:$8 sps:$4 sm:$0xff]  }
 0x658   :  { %8409 = vmatmul.mubr.bf16.vlgmr.msra.gmra.mxu0 %v11608_v27  ;;  %v8287_v1 = vpop.f32.mrf.mxu1  ;;  %v10903_v27 = vld [vmem:[#allocation11 + $0x6a8] ss:$16 sps:$4 sm:$0xff]  }
 0x659   :  { %v11664_v60 = vadd.f32 %v8287_v1, %v8247_v10  ;;  %8459 = vmatpush1.bf16.msra.mxu0 %v10897_v12  ;;  %8490 = vmatprep.mubr.bf16.mxu0 %v11647_v36  ;;  %v10906_v36 = vld [vmem:[#allocation11 + $0x688] ss:$16 sps:$4 sm:$0xff]   ;;  %v11019_v1 = vld [vmem:[#allocation13 + $0x1f4] ss:$8 sps:$4 sm:$0xff]  }
 0x65a   :  { %v8289_v38 = vpop.f32.mrf.mxu1  ;;  %8460 = vmatprep.subr.bf16.mxu0 %v10902_v14  ;;  %v10999_v10 = vld [vmem:[#allocation13 + $0x150] ss:$8 sps:$4 sm:$0xff]   ;;  %v11014_v14 = vld [vmem:[#allocation13 + $0x100] ss:$8 sps:$4 sm:$0xff]  }
 0x65b   :  { %v11667_v39 = vadd.f32 %v8289_v38, %v8249_v19  ;;  %v11008_v19 = vld [vmem:[#allocation13 + $0x120] ss:$8 sps:$4 sm:$0xff]   ;;  %v11011_v12 = vld [vmem:[#allocation13 + $0x110] ss:$8 sps:$4 sm:$0xff]   ;;  %v11025_v38 = vld [vmem:[#allocation13 + $0x1d4] ss:$8 sps:$4 sm:$0xff]  }
 0x65c   :  { %v8291_v54 = vpop.f32.mrf.mxu1 }
 0x65d   :  { %8461 = vmatpush1.bf16.msra.mxu0 %v10900_v34  ;;  %v11022_v34 = vld [vmem:[#allocation13 + $0x1e4] ss:$8 sps:$4 sm:$0xff]  }
 0x65e   :  { %v8292_v5 = vpop.f32.mrf.mxu1  ;;  %8462 = vmatprep.subr.bf16.mxu0 %v10905_v17  ;;  %v11023_v17 = vld [vmem:[#allocation13 + $0x1d0] ss:$8 sps:$4 sm:$0xff]   ;;  %v11028_v54 = vld [vmem:[#allocation13 + $0x1c4] ss:$8 sps:$4 sm:$0xff]  }
 0x65f   :  { %v11034_v5 = vld [vmem:[#allocation13 + $0x1a4] ss:$8 sps:$4 sm:$0xff]  }
 0x661   :  { %8463 = vmatpush1.bf16.msra.mxu0 %v10903_v27  ;;  %v11031_v27 = vld [vmem:[#allocation13 + $0x1b4] ss:$8 sps:$4 sm:$0xff]  }
 0x662   :  { %8464 = vmatprep.subr.bf16.mxu0 %v10908_v46  ;;  %v11032_v46 = vld [vmem:[#allocation13 + $0x1a0] ss:$8 sps:$4 sm:$0xff]  }
 0x665   :  { %8465 = vmatpush1.bf16.msra.mxu0 %v10906_v36  ;;  %v11037_v36 = vld [vmem:[#allocation13 + $0x194] ss:$8 sps:$4 sm:$0xff]  }
 0x666   :  { %8466 = vmatprep.subr.bf16.mxu0 %v10911_v25 }
 0x669   :  { %8467 = vmatpush1.bf16.msra.mxu0 %v10909_v31 }
 0x66a   :  { %8468 = vmatprep.subr.bf16.mxu0 %v10914_v30  ;;  %v11035_v30 = vld [vmem:[#allocation13 + $0x190] ss:$8 sps:$4 sm:$0xff]  }
 0x66d   :  { %8469 = vmatpush1.bf16.msra.mxu0 %v10912_v63 }
 0x66e   :  { %8470 = vmatprep.subr.bf16.mxu0 %v10917_v50 }
 0x671   :  { %8471 = vmatpush1.bf16.msra.mxu0 %v10915_v6 }
 0x672   :  { %8472 = vmatprep.subr.bf16.mxu0 %v10920_v51 }
 0x675   :  { %8473 = vmatpush1.bf16.msra.mxu0 %v10918_v52  ;;  %v11040_v52 = vld [vmem:[#allocation13 + $0x184] ss:$8 sps:$4 sm:$0xff]  }
 0x676   :  { %8474 = vmatprep.subr.bf16.mxu0 %v10923_v41 }
 0x679   :  { %8475 = vmatpush2.bf16.msra.mxu0 %v10921_v32 }
 0x67a   :  { %8476 = vmatprep.subr.bf16.mxu0 %v10926_v35  ;;  %v11038_v35 = vld [vmem:[#allocation13 + $0x180] ss:$8 sps:$4 sm:$0xff]  }
 0x67d   :  { %8477 = vmatpush2.bf16.msra.mxu0 %v10924_v57 }
 0x67e   :  { %8478 = vmatprep.subr.bf16.mxu0 %v10929_v55 }
 0x681   :  { %8479 = vmatpush2.bf16.msra.mxu0 %v10927_v61 }
 0x682   :  { %8480 = vmatprep.subr.bf16.mxu0 %v10932_v62 }
 0x685   :  { %8481 = vmatpush2.bf16.msra.mxu0 %v10930_v3 }
 0x686   :  { %8482 = vmatprep.subr.bf16.mxu0 %v10935_v58 }
 0x689   :  { %8483 = vmatpush2.bf16.msra.mxu0 %v10933_v8 }
 0x68a   :  { %8484 = vmatprep.subr.bf16.mxu0 %v10938_v44  ;;  %v11041_v44 = vld [vmem:[#allocation14 + $0x78] sm:$0xff]  }
 0x68b   :  { %10375 = vmatprep.subr.bf16.mxu1 %v11041_v44 }
 0x68d   :  { %8485 = vmatpush2.bf16.msra.mxu0 %v10936_v11  ;;  %v11042_v11 = vld [vmem:[#allocation14 + $0x38] sm:$0xff]  }
 0x68e   :  { %8486 = vmatprep.subr.bf16.mxu0 %v10941_v15  ;;  %v11043_v15 = vld [vmem:[#allocation14 + $0x70] sm:$0xff]  }
 0x691   :  { %8487 = vmatpush2.bf16.msra.mxu0 %v10939_v53  ;;  %v11045_v53 = vld [vmem:[#allocation14 + $0x68] sm:$0xff]  }
 0x692   :  { %8488 = vmatprep.subr.bf16.mxu0 %v10944_v0  ;;  %v11046_v0 = vld [vmem:[#allocation14 + $0x28] sm:$0xff]  }
 0x695   :  { %8489 = vmatpush2.bf16.msra.mxu0 %v10942_v18  ;;  %v11047_v18 = vld [vmem:[#allocation14 + $0x60] sm:$0xff]  }
 0x696   :  { %8941 = vmatprep.subr.bf16.mxu0 %v10995_v9  ;;  %v11051_v9 = vld [vmem:[#allocation14 + $0x50] sm:$0xff]  }
 0x698   :  { %v11669_v20 = vpop.f32.mrf.mxu1  ;;  %8491 = vmatmul.mubr.bf16.vlgmr.msra.gmra.mxu0 %v11649_v22  ;;  %v11007_v22 = vld [vmem:[#allocation13 + $0x134] ss:$8 sps:$4 sm:$0xff]  }
 0x699   :  { %8942 = vmatpush1.bf16.msra.mxu0 %v10993_v7  ;;  %v11050_v7 = vld [vmem:[#allocation14 + $0x18] sm:$0xff]  }
 0x69a   :  { %v11672_v28 = vpop.f32.mrf.mxu1  ;;  %8943 = vmatprep.subr.bf16.mxu0 %v10998_v48  ;;  %v11052_v48 = vld [vmem:[#allocation14 + $0x10] sm:$0xff]  }
 0x69c   :  { %v8373_v40 = vpop.f32.mrf.mxu1 }
 0x69d   :  { %8944 = vmatpush1.bf16.msra.mxu0 %v10996_v21  ;;  %v11048_v40 = vld [vmem:[#allocation14 + $0x20] sm:$0xff]   ;;  %v6882_v21 = vrot.slane %v11655_v24, %v11399_v2  ;;  %v11053_v2 = vld [vmem:[#allocation14 + $0x48] sm:$0xff]  }
 0x69e   :  { %v8374_v16 = vpop.f32.mrf.mxu1  ;;  %8945 = vmatprep.subr.bf16.mxu0 %v11001_v56  ;;  %v6886_v56 = vrot.slane %v11655_v24, %v11402_v4  ;;  %v11054_v24 = vld [vmem:[#allocation14 + $0x8] sm:$0xff]  }
 0x69f   :  { %v11049_v16 = vld [vmem:[#allocation14 + $0x58] sm:$0xff]  }
 0x6a1   :  { %8946 = vmatpush1.bf16.msra.mxu0 %v10999_v10  ;;  %v8370_v10 = vadd.f32 %v11669_v20, %v6882_v21 }
 0x6a2   :  { %8947 = vmatprep.subr.bf16.mxu0 %v11004_v23  ;;  %v8372_v23 = vadd.f32 %v11672_v28, %v6886_v56  ;;  %v11055_v28 = vld [vmem:[#allocation14 + $0x40] sm:$0xff]  }
 0x6a5   :  { %8948 = vmatpush1.bf16.msra.mxu0 %v11002_v59 }
 0x6a6   :  { %8949 = vmatprep.subr.bf16.mxu0 %v11007_v22 }
 0x6a9   :  { %8950 = vmatpush1.bf16.msra.mxu0 %v11005_v49 }
 0x6aa   :  { %8951 = vmatprep.subr.bf16.mxu0 %v11010_v13 }
 0x6ad   :  { %8952 = vmatpush1.bf16.msra.mxu0 %v11008_v19 }
 0x6ae   :  { %8953 = vmatprep.subr.bf16.mxu0 %v11013_v26 }
 0x6b1   :  { %8954 = vmatpush1.bf16.msra.mxu0 %v11011_v12 }
 0x6b2   :  { %8955 = vmatprep.subr.bf16.mxu0 %v11016_v29 }
 0x6b5   :  { %8956 = vmatpush1.bf16.msra.mxu0 %v11014_v14 }
 0x6b6   :  { %8957 = vmatprep.subr.bf16.mxu0 %v11019_v1 }
 0x6b9   :  { %8958 = vmatpush2.bf16.msra.mxu0 %v11017_v33 }
 0x6ba   :  { %8959 = vmatprep.subr.bf16.mxu0 %v11022_v34 }
 0x6bd   :  { %8960 = vmatpush2.bf16.msra.mxu0 %v11020_v37 }
 0x6be   :  { %8961 = vmatprep.subr.bf16.mxu0 %v11025_v38  ;;  %v11056_v38 = vld [vmem:[#allocation14] sm:$0xff]  }
 0x6c1   :  { %8962 = vmatpush2.bf16.msra.mxu0 %v11023_v17 }
 0x6c2   :  { %8963 = vmatprep.subr.bf16.mxu0 %v11028_v54  ;;  %v8568_v54 = vld [vmem:[#allocation16 + $0x5] ss:$8 sm:$0x3] }
 0x6c5   :  { %8964 = vmatpush2.bf16.msra.mxu0 %v11026_v42  ;;  %v8573_v42 = vrot.slane %v8568_v54, %v11391_v45 }
 0x6c6   :  { %8965 = vmatprep.subr.bf16.mxu0 %v11031_v27  ;;  %v8577_v27 = vrot.slane %v8568_v54, %v11394_v47 }
 0x6c9   :  { %8966 = vmatpush2.bf16.msra.mxu0 %v11029_v43 }
 0x6ca   :  { %8967 = vmatprep.subr.bf16.mxu0 %v11034_v5 }
 0x6cd   :  { %8968 = vmatpush2.bf16.msra.mxu0 %v11032_v46 }
 0x6ce   :  { %8969 = vmatprep.subr.bf16.mxu0 %v11037_v36 }
 0x6d1   :  { %8970 = vmatpush2.bf16.msra.mxu0 %v11035_v30 }
 0x6d2   :  { %8971 = vmatprep.subr.bf16.mxu0 %v11040_v52  ;;  %v9016_v52 = vld [vmem:[#allocation16 + $0x6] ss:$0 sm:$0xff] }
 0x6d5   :  { %8972 = vmatpush2.bf16.msra.mxu0 %v11038_v35 }
 0x6d8   :  { %v8451_v25 = vpop.f32.mrf.mxu1  ;;  %v8328_v31 = vpop.f32.mrf.mxu0 }
 0x6d9   :  { %v8329_v63 = vadd.f32 %v8328_v31, %v11664_v60 }
 0x6da   :  { %v8453_v50 = vpop.f32.mrf.mxu1  ;;  %v8330_v6 = vpop.f32.mrf.mxu0 }
 0x6db   :  { %v8331_v51 = vadd.f32 %v8330_v6, %v11667_v39  ;;  %v8499_v55 = vpack.c.bf16 %v8329_v63, %v8329_v63  ;;  %v11044_v39 = vld [vmem:[#allocation14 + $0x30] sm:$0xff]  }
 0x6dc   :  { %v8455_v41 = vpop.f32.mrf.mxu1  ;;  %v8332_v32 = vpop.f32.mrf.mxu0 }
 0x6dd   :  { %v8500_v57 = vpack.c.bf16 %v8331_v51, %v8331_v51 }
 0x6de   :  { %v8456_v61 = vpop.f32.mrf.mxu1  ;;  %v8333_v62 = vpop.f32.mrf.mxu0 }
 0x6df   :  { %8932 = vmatprep.mubr.bf16.mxu1 %v8500_v57 }
 0x6e0   :  { %8933 = vmatmul.mubr.bf16.vlgmr.msra.gmra.mxu1 %v8499_v55 }
 0x6e1   :  { %10376 = vmatpush3.bf16.msra.mxu1 %v11042_v11 }
 0x6e2   :  { %10377 = vmatprep.subr.bf16.mxu1 %v11043_v15 }
 0x6e5   :  { %10378 = vmatpush3.bf16.msra.mxu1 %v11044_v39 }
 0x6e6   :  { %10379 = vmatprep.subr.bf16.mxu1 %v11045_v53 }
 0x6e9   :  { %10380 = vmatpush3.bf16.msra.mxu1 %v11046_v0 }
 0x6ea   :  { %10381 = vmatprep.subr.bf16.mxu1 %v11047_v18 }
 0x6ed   :  { %10382 = vmatpush3.bf16.msra.mxu1 %v11048_v40 }
 0x6ee   :  { %10383 = vmatprep.subr.bf16.mxu1 %v11049_v16 }
 0x6f1   :  { %10384 = vmatpush3.bf16.msra.mxu1 %v11050_v7 }
 0x6f2   :  { %10385 = vmatprep.subr.bf16.mxu1 %v11051_v9 }
 0x6f5   :  { %10386 = vmatpush3.bf16.msra.mxu1 %v11052_v48 }
 0x6f6   :  { %10387 = vmatprep.subr.bf16.mxu1 %v11053_v2 }
 0x6f9   :  { %10388 = vmatpush3.bf16.msra.mxu1 %v11054_v24 }
 0x6fa   :  { %10389 = vmatprep.subr.bf16.mxu1 %v11055_v28 }
 0x6fd   :  { %10390 = vmatpush3.bf16.msra.mxu1 %v11056_v38 }
 0x718   :  { %v8410_v3 = vpop.f32.mrf.mxu0 }
 0x719   :  { %v8411_v59 = vadd.f32 %v8410_v3, %v8370_v10 }
 0x71a   :  { %v8412_v58 = vpop.f32.mrf.mxu0 }
 0x71b   :  { %v8413_v22 = vadd.f32 %v8412_v58, %v8372_v23  ;;  %v8452_v49 = vadd.f32 %v8451_v25, %v8411_v59 }
 0x71c   :  { %v8414_v60 = vpop.f32.mrf.mxu0 }
 0x71d   :  { %v8454_v19 = vadd.f32 %v8453_v50, %v8413_v22 }
 0x71e   :  { %v8415_v8 = vpop.f32.mrf.mxu0 }
 0x758   :  { %v8492_v13 = vpop.f32.mrf.mxu0 }
 0x759   :  { %v8493_v26 = vadd.f32 %v8492_v13, %v8452_v49 }
 0x75a   :  { %v8494_v12 = vpop.f32.mrf.mxu0 }
 0x75b   :  { %v8495_v29 = vadd.f32 %v8494_v12, %v8454_v19  ;;  %v8501_v33 = vpack.c.bf16 %v8493_v26, %v8493_v26 }
 0x75c   :  { %v8496_v14 = vpop.f32.mrf.mxu0 }
 0x75d   :  { %v8502_v1 = vpack.c.bf16 %v8495_v29, %v8495_v29 }
 0x75e   :  { %v8497_v34 = vpop.f32.mrf.mxu0 }
 0x75f   :  { %8973 = vmatprep.mubr.bf16.mxu0 %v8502_v1 }
 0x760   :  { %8974 = vmatmul.mubr.bf16.vlgmr.msra.gmra.mxu0 %v8501_v33 }
 0x7a0   :  { %v8934_v4 = vpop.f32.mrf.mxu1 }
 0x7a1   :  { %v8935_v43 = vadd.f32 %v8934_v4, %v8573_v42 }
 0x7a2   :  { %v8936_v20 = vpop.f32.mrf.mxu1 }
 0x7a3   :  { %v8937_v46 = vadd.f32 %v8936_v20, %v8577_v27 }
 0x7a4   :  { %v8938_v37 = vpop.f32.mrf.mxu1 }
 0x7a6   :  { %v8939_v17 = vpop.f32.mrf.mxu1 }
 0x820   :  { %v8975_v5 = vpop.f32.mrf.mxu0 }
 0x821   :  { %v8976_v36 = vadd.f32 %v8975_v5, %v8935_v43 }
 0x822   :  { %v8977_v25 = vpop.f32.mrf.mxu0 }
 0x823   :  { %v8978_v31 = vadd.f32 %v8977_v25, %v8937_v46  ;;  %v8982_v50 = vpack.c.bf16 %v8976_v36, %v8976_v36 }
 0x824   :  { %v8979_v30 = vpop.f32.mrf.mxu0 }
 0x825   :  { %v8983_v63 = vpack.c.bf16 %v8978_v31, %v8978_v31 }
 0x826   :  { %v8980_v6 = vpop.f32.mrf.mxu0 }
 0x827   :  { %9145 = vmatprep.mubr.bf16.mxu1 %v8983_v63 }
 0x828   :  { %9146 = vmatmul.mubr.bf16.vlgmr.msra.gmra.mxu1 %v8982_v50 }
 0x8e8   :  { %v10391_v51 = vpop.f32.mrf.mxu1 }
 0x8ea   :  { %v10392_v41 = vpop.f32.mrf.mxu1 }
 0x8eb   :  { %v10393_v45 = vadd.f32 %v10392_v41, %v10391_v51 }
 0x8ec   :  { %v10394_v32 = vpop.f32.mrf.mxu1 }
 0x8ed   :  { %v9148_v47 = vadd.f32 %v10393_v45, %v9016_v52 }
 0x8ee   :  { %v10395_v35 = vpop.f32.mrf.mxu1 }
 0x8ef   :  { %9153 = vst [vmem:[#allocation17] sm:$0xff] %v9148_v47 }
 0x8f0   :  { %11248 = shalt.err (!%p11245_p7)
}
 0x8f1   :  { %9163 = dma.vmem_to_hbm [thread:$0]  %s9161_s8, 128, %s11696_s9, [#allocation4]  }
 0x8f2   :  { %11267 = dma.done.wait [#allocation4], 128  }
 0x8f3   :  { %11268 = vsyncadd [#allocation4], 4294967168 }
 0x8f4   :  { %9167 = vsyncpa [#allocation3], 1 }
 0x8f5   :  { %9168 = vsyncpa [#allocation6], 1 }
 0x8f6   :  { %9169 = vsyncpa [#allocation9], 1 }
 0x8f7   :  { %9170 = vsyncpa [#allocation12], 1 }
 0x8f8   :  { %9171 = vsyncpa [#allocation15], 1 }
 0x8f9   :  { %9172 = vsyncpa [#allocation4], 1 }

</bundles_post_ra>
